<compile_context>
chip_gen: v7x
topology: tpu7x:2x2x1
jax: 0.10.0
libtpu: 0.0.40
codegen_flags: <defaults>
</compile_context>

<pallas_src>
import functools
import numpy as np
import jax
import jax.numpy as jnp
from jax.experimental import pallas as pl
from jax.experimental.pallas import tpu as pltpu

_LN_EPS = 1e-5
_SQRT_HALF = np.float32(1.0 / np.sqrt(2.0))
_VMEM_LIMIT = 48 * 1024 * 1024   # headroom for v7x's 64 MiB/TC physical VMEM


# ----------------------------- small helpers -----------------------------

def _round_up(x, m):
    return ((x + m - 1) // m) * m


def _pick_row_tile(m):
    """Row tile (multiple of 8, <=256). Prefer one that divides m (avoids a pad
    copy) and yields >=2 grid steps so both v7x TensorCores get work."""
    cands = [t for t in range(8, min(256, m) + 1, 8) if m % t == 0]
    if cands:
        two_step = [t for t in cands if m // t >= 2]
        return max(two_step) if two_step else max(cands)
    return min(256, _round_up(m, 8))


def _col_tile(n):
    for t in (512, 256, 128):
        if n % t == 0:
            return t
    return n


def _cparams(sem):
    return pltpu.CompilerParams(dimension_semantics=sem,
                                vmem_limit_bytes=_VMEM_LIMIT)


def _pad_rows(x, mp):
    m = x.shape[0]
    if mp == m:
        return x
    return jnp.pad(x, ((0, mp - m),) + ((0, 0),) * (x.ndim - 1))


def _gelu_f32(y):
    # exact (erf) GELU == torch F.gelu(approximate='none'), in f32
    return 0.5 * y * (1.0 + jax.lax.erf(y * _SQRT_HALF))


def _ln_f32(y, g, b, eps):
    mu = jnp.mean(y, axis=-1, keepdims=True)
    var = jnp.mean((y - mu) ** 2, axis=-1, keepdims=True)
    return (y - mu) * jax.lax.rsqrt(var + eps) * g + b


# ----------------------------- Pallas kernels -----------------------------

def _resize_kernel(x_ref, mh_ref, mwt_ref, o_ref):
    # T image slabs per grid step:  out[t] = Mh @ x[t] @ Mw^T
    mh = mh_ref[...]
    mwt = mwt_ref[...]
    T = x_ref.shape[0]                       # static block size
    for t in range(T):
        yi = jnp.dot(mh, x_ref[t], preferred_element_type=jnp.float32)
        o_ref[t] = jnp.dot(yi, mwt, preferred_element_type=jnp.float32)


def _linear_kernel(x_ref, w_ref, b_ref, o_ref, *, act):
    # bf16 MXU inputs, f32 accumulation
    y = jnp.dot(x_ref[...], w_ref[...], preferred_element_type=jnp.float32) + b_ref[...]
    if act == "gelu":
        y = _gelu_f32(y)
    elif act == "sigmoid":
        y = jax.nn.sigmoid(y)
    o_ref[...] = y.astype(o_ref.dtype)


def _encoder_layer_kernel(x_ref, wqkv_ref, bqkv_ref, wo_ref, bo_ref,
                          g1_ref, be1_ref, w1_ref, b1_ref, w2_ref, b2_ref,
                          g2_ref, be2_ref, o_ref, *, num_heads, eps):
    """One full post-norm nn.TransformerEncoderLayer per grid step (1 batch elem).

    QKV slab, per-head scores, attention output and the 4E FFN intermediate all
    live in VMEM/vregs; only the (S,E) residual stream crosses HBM per layer.
    The attention scale is pre-folded into the q weights/bias on the host.
    """
    xb = x_ref[0]                                    # (S, E) bf16
    x = xb.astype(jnp.float32)

    # --- multi-head self-attention; head outputs folded straight into the
    # --- lane-dense (S, E) f32 out-projection accumulator (no lane slicing,
    # --- no per-head partial stores).
    acc = jnp.zeros(x.shape, jnp.float32)
    for h in range(num_heads):                       # static unroll (small H)
        q = jnp.dot(xb, wqkv_ref[0, h], preferred_element_type=jnp.float32) + bqkv_ref[0, h]
        k = jnp.dot(xb, wqkv_ref[1, h], preferred_element_type=jnp.float32) + bqkv_ref[1, h]
        v = jnp.dot(xb, wqkv_ref[2, h], preferred_element_type=jnp.float32) + bqkv_ref[2, h]
        s = jax.lax.dot_general(q.astype(jnp.bfloat16), k.astype(jnp.bfloat16),
                                (((1,), (1,)), ((), ())),
                                preferred_element_type=jnp.float32)        # (S, S)
        m = jnp.max(s, axis=-1, keepdims=True)
        p = jnp.exp(s - m)
        l = jnp.sum(p, axis=-1, keepdims=True)
        o = jnp.dot(p.astype(jnp.bfloat16), v.astype(jnp.bfloat16),
                    preferred_element_type=jnp.float32)                    # (S, dh)
        o = o * (1.0 / l)                            # normalize (S,dh) not (S,S); exact
        acc = acc + jnp.dot(o.astype(jnp.bfloat16), wo_ref[h],
                            preferred_element_type=jnp.float32)            # (S, E)

    y1 = acc + bo_ref[...] + x                       # out-proj bias + residual
    y1 = _ln_f32(y1, g1_ref[...], be1_ref[...], eps)

    # --- FFN: lin1 -> GELU -> lin2 + residual + LayerNorm2 (4E stays in VMEM)
    hcur = jnp.dot(y1.astype(jnp.bfloat16), w1_ref[...],
                   preferred_element_type=jnp.float32) + b1_ref[...]
    hcur = _gelu_f32(hcur)
    y2 = jnp.dot(hcur.astype(jnp.bfloat16), w2_ref[...],
                 preferred_element_type=jnp.float32) + b2_ref[...]
    y2 = y2 + y1
    y2 = _ln_f32(y2, g2_ref[...], be2_ref[...], eps)
    o_ref[0] = y2.astype(o_ref.dtype)


def _head_kernel(x_ref, fg_ref, fb_ref, hg_ref, hb_ref, w_ref, b_ref, o_ref, *, eps):
    # transformer final LayerNorm (row-wise) + head LayerNorm + Linear + Sigmoid
    x = x_ref[...].astype(jnp.float32)
    x = _ln_f32(x, fg_ref[...], fb_ref[...], eps)
    x = _ln_f32(x, hg_ref[...], hb_ref[...], eps)
    y = jnp.dot(x.astype(jnp.bfloat16), w_ref[...],
                preferred_element_type=jnp.float32) + b_ref[...]
    o_ref[...] = jax.nn.sigmoid(y).astype(o_ref.dtype)


# ----------------------------- kernel wrappers -----------------------------

def _bilinear_matrix(in_size, out_size):
    # PyTorch F.interpolate(mode='bilinear', align_corners=False) weights (separable).
    i = np.arange(out_size, dtype=np.float64)
    src = (i + 0.5) * (in_size / out_size) - 0.5
    src = np.clip(src, 0.0, in_size - 1)
    x0 = np.floor(src).astype(np.int64)
    x1 = np.minimum(x0 + 1, in_size - 1)
    w1 = (src - x0).astype(np.float32)
    w0 = 1.0 - w1
    m = np.zeros((out_size, in_size), dtype=np.float32)
    m[np.arange(out_size), x0] += w0
    m[np.arange(out_size), x1] += w1
    return jnp.asarray(m)


def bilinear_resize(x, out_h, out_w):
    """F.interpolate(mode='bilinear', align_corners=False), T slabs per grid step."""
    B, C, H, W = x.shape
    mh = _bilinear_matrix(H, out_h)            # (out_h, H)
    mwt = _bilinear_matrix(W, out_w).T         # (W, out_w)
    n = B * C
    xs = x.reshape(n, H, W).astype(jnp.float32)
    steps = 1 if n < 2 else min(n, max(2, -(-n // 8)))   # >=2 steps for v7x's 2 TCs
    T = -(-n // steps)
    n_pad = T * steps
    if n_pad != n:
        xs = jnp.pad(xs, ((0, n_pad - n), (0, 0), (0, 0)))
    out = pl.pallas_call(
        _resize_kernel,
        out_shape=jax.ShapeDtypeStruct((n_pad, out_h, out_w), jnp.float32),
        grid=(steps,),
        in_specs=[pl.BlockSpec((T, H, W), lambda i: (i, 0, 0)),
                  pl.BlockSpec((out_h, H), lambda i: (0, 0)),
                  pl.BlockSpec((W, out_w), lambda i: (0, 0))],
        out_specs=pl.BlockSpec((T, out_h, out_w), lambda i: (i, 0, 0)),
        compiler_params=_cparams(("parallel",)),
    )(xs, mh, mwt)
    if n_pad != n:
        out = out[:n]
    return out.reshape(B, C, out_h, out_w)


def pallas_linear(x, w, b=None, act="none", out_dtype=jnp.bfloat16):
    """y = act(x @ w + b); x:(M,K), w:(K,N). bf16 MXU inputs, f32 accumulation."""
    M, K = x.shape
    N = w.shape[1]
    if b is None:
        b = jnp.zeros((N,), jnp.float32)
    b2 = b.reshape(1, N).astype(jnp.float32)
    xb = x.astype(jnp.bfloat16)
    wb = w.astype(jnp.bfloat16)
    tm = _pick_row_tile(M)
    tn = _col_tile(N)
    mp = _round_up(M, tm)
    xb = _pad_rows(xb, mp)
    out = pl.pallas_call(
        functools.partial(_linear_kernel, act=act),
        out_shape=jax.ShapeDtypeStruct((mp, N), out_dtype),
        grid=(mp // tm, N // tn),
        in_specs=[pl.BlockSpec((tm, K), lambda i, j: (i, 0)),
                  pl.BlockSpec((K, tn), lambda i, j: (0, j)),
                  pl.BlockSpec((1, tn), lambda i, j: (0, j))],
        out_specs=pl.BlockSpec((tm, tn), lambda i, j: (i, j)),
        compiler_params=_cparams(("parallel", "parallel")),
    )(xb, wb, b2)
    return out[:M] if mp != M else out


def pallas_encoder_layer(x, p, num_heads, eps=_LN_EPS):
    """One fused TransformerEncoderLayer (batch_first, post-norm, gelu) per call."""
    B, S, E = x.shape
    dh = E // num_heads
    F = p['lin1_w'].shape[0]
    scale = float(1.0 / np.sqrt(dh))

    # PyTorch layouts -> kernel layouts: heads moved to LEADING axes so the kernel
    # never slices lanes at dh offsets; attention scale folded into q weight/bias.
    wqkv = p['in_proj_w'].reshape(3, num_heads, dh, E).transpose(0, 1, 3, 2)   # (3,H,E,dh)
    bqkv = p['in_proj_b'].reshape(3, num_heads, 1, dh).astype(jnp.float32)
    qsc = jnp.array([scale, 1.0, 1.0], jnp.float32).reshape(3, 1, 1, 1)
    wqkv = (wqkv * qsc).astype(jnp.bfloat16)
    bqkv = bqkv * qsc
    wo = p['out_proj_w'].T.reshape(num_heads, dh, E).astype(jnp.bfloat16)      # (H,dh,E)
    bo = p['out_proj_b'].reshape(1, E).astype(jnp.float32)
    w1 = p['lin1_w'].T.astype(jnp.bfloat16)                                    # (E,F)
    b1 = p['lin1_b'].reshape(1, F).astype(jnp.float32)
    w2 = p['lin2_w'].T.astype(jnp.bfloat16)                                    # (F,E)
    b2 = p['lin2_b'].reshape(1, E).astype(jnp.float32)
    g1 = p['norm1_g'].reshape(1, E).astype(jnp.float32)
    be1 = p['norm1_b'].reshape(1, E).astype(jnp.float32)
    g2 = p['norm2_g'].reshape(1, E).astype(jnp.float32)
    be2 = p['norm2_b'].reshape(1, E).astype(jnp.float32)

    return pl.pallas_call(
        functools.partial(_encoder_layer_kernel, num_heads=num_heads, eps=eps),
        out_shape=jax.ShapeDtypeStruct((B, S, E), jnp.bfloat16),
        grid=(B,),
        in_specs=[pl.BlockSpec((1, S, E), lambda b: (b, 0, 0)),
                  pl.BlockSpec((3, num_heads, E, dh), lambda b: (0, 0, 0, 0)),
                  pl.BlockSpec((3, num_heads, 1, dh), lambda b: (0, 0, 0, 0)),
                  pl.BlockSpec((num_heads, dh, E), lambda b: (0, 0, 0)),
                  pl.BlockSpec((1, E), lambda b: (0, 0)),
                  pl.BlockSpec((1, E), lambda b: (0, 0)),
                  pl.BlockSpec((1, E), lambda b: (0, 0)),
                  pl.BlockSpec((E, F), lambda b: (0, 0)),
                  pl.BlockSpec((1, F), lambda b: (0, 0)),
                  pl.BlockSpec((F, E), lambda b: (0, 0)),
                  pl.BlockSpec((1, E), lambda b: (0, 0)),
                  pl.BlockSpec((1, E), lambda b: (0, 0)),
                  pl.BlockSpec((1, E), lambda b: (0, 0))],
        out_specs=pl.BlockSpec((1, S, E), lambda b: (b, 0, 0)),
        compiler_params=_cparams(("parallel",)),
    )(x.astype(jnp.bfloat16), wqkv, bqkv, wo, bo,
      g1, be1, w1, b1, w2, b2, g2, be2)


def pallas_head(cls_tokens, fg, fb, hg, hb, w, b, eps=_LN_EPS):
    """fused: final transformer LN + head LN + Linear + Sigmoid on the cls rows."""
    M, E = cls_tokens.shape
    O = w.shape[1]
    tm = _round_up(M, 8)
    xp = _pad_rows(cls_tokens.astype(jnp.bfloat16), tm)
    out = pl.pallas_call(
        functools.partial(_head_kernel, eps=eps),
        out_shape=jax.ShapeDtypeStruct((tm, O), jnp.float32),
        grid=(1,),
        in_specs=[pl.BlockSpec((tm, E), lambda i: (i, 0)),
                  pl.BlockSpec((1, E), lambda i: (0, 0)),
                  pl.BlockSpec((1, E), lambda i: (0, 0)),
                  pl.BlockSpec((1, E), lambda i: (0, 0)),
                  pl.BlockSpec((1, E), lambda i: (0, 0)),
                  pl.BlockSpec((E, O), lambda i: (0, 0)),
                  pl.BlockSpec((1, O), lambda i: (0, 0))],
        out_specs=pl.BlockSpec((tm, O), lambda i: (i, 0)),
        compiler_params=_cparams(("arbitrary",)),
    )(xp, fg.reshape(1, E).astype(jnp.float32), fb.reshape(1, E).astype(jnp.float32),
      hg.reshape(1, E).astype(jnp.float32), hb.reshape(1, E).astype(jnp.float32),
      w.astype(jnp.bfloat16), b.reshape(1, O).astype(jnp.float32))
    return out[:M]


# ----------------------------- model pieces -----------------------------

def patchify(x, P):
    B, C, H, W = x.shape
    nh, nw = H // P, W // P
    x = x.reshape(B, C, nh, P, nw, P)
    x = x.transpose(0, 2, 4, 1, 3, 5)      # (B, nh, nw, C, P, P): matches conv-weight flatten
    return x.reshape(B, nh * nw, C * P * P)


def init_params(key, cfg):
    E, C, P = cfg['emb_dim'], cfg['in_channels'], cfg['patch_size']
    Fdim = int(E * cfg['mlp_ratio'])
    O = cfg['output_dim']
    num_patches = (cfg['image_size'] // P) ** 2
    keys = jax.random.split(key, 8 + cfg['depth'])

    def tn(k, shape, std=0.02):
        # deterministic stand-in for trunc_normal_/kaiming init
        return (std * jax.random.normal(k, shape)).astype(jnp.float32)

    params = {
        'patch_w': tn(keys[0], (E, C * P * P), std=float(np.sqrt(2.0 / (C * P * P)))),
        'patch_b': jnp.zeros((E,), jnp.float32),
        'cls': tn(keys[1], (1, 1, E)),
        'pos': tn(keys[2], (1, 1 + num_patches, E)),
        'final_norm_g': jnp.ones((E,), jnp.float32),
        'final_norm_b': jnp.zeros((E,), jnp.float32),
        'head_norm_g': jnp.ones((E,), jnp.float32),
        'head_norm_b': jnp.zeros((E,), jnp.float32),
        'head_w': tn(keys[3], (O, E)),
        'head_b': jnp.zeros((O,), jnp.float32),
        'layers': [],
    }
    for d in range(cfg['depth']):
        lk = jax.random.split(keys[8 + d], 4)
        params['layers'].append({
            'in_proj_w': tn(lk[0], (3 * E, E)),
            'in_proj_b': jnp.zeros((3 * E,), jnp.float32),
            'out_proj_w': tn(lk[1], (E, E)),
            'out_proj_b': jnp.zeros((E,), jnp.float32),
            'lin1_w': tn(lk[2], (Fdim, E)),
            'lin1_b': jnp.zeros((Fdim,), jnp.float32),
            'lin2_w': tn(lk[3], (E, Fdim)),
            'lin2_b': jnp.zeros((E,), jnp.float32),
            'norm1_g': jnp.ones((E,), jnp.float32),
            'norm1_b': jnp.zeros((E,), jnp.float32),
            'norm2_g': jnp.ones((E,), jnp.float32),
            'norm2_b': jnp.zeros((E,), jnp.float32),
        })
    return params


def forward(params, x, cfg):
    B = x.shape[0]
    S_img, P, E = cfg['image_size'], cfg['patch_size'], cfg['emb_dim']

    x = bilinear_resize(x.astype(jnp.float32), S_img, S_img)      # F.interpolate
    patches = patchify(x, P)                                      # conv(stride=kernel) as matmul
    N = patches.shape[1]
    tokens = pallas_linear(patches.reshape(B * N, -1), params['patch_w'].T,
                           params['patch_b'], out_dtype=jnp.bfloat16)
    tokens = tokens.reshape(B, N, E)

    cls = jnp.broadcast_to(params['cls'], (B, 1, E))
    h = jnp.concatenate([cls, tokens.astype(jnp.float32)], axis=1) + params['pos']
    h = h.astype(jnp.bfloat16)     # bf16 residual stream between layer kernels
    # TODO(synk): pos_drop / attention / FFN dropouts are identity at inference; not implemented.

    for lp in params['layers']:
        h = pallas_encoder_layer(h, lp, cfg['num_heads'])

    # The transformer's final LayerNorm is row-wise and only the cls row feeds the
    # head, so it is applied (fused inside the head kernel) to the cls row only —
    # mathematically identical to normalizing all tokens.
    cls_out = h[:, 0]                                             # (B, E)
    out = pallas_head(cls_out,
                      params['final_norm_g'], params['final_norm_b'],
                      params['head_norm_g'], params['head_norm_b'],
                      params['head_w'].T, params['head_b'])
    return out


if __name__ == "__main__":
    # small config consistent with the module (image divisible by patch, emb % heads == 0)
    cfg = dict(image_size=32, patch_size=8, in_channels=3, emb_dim=64,
               depth=2, num_heads=4, mlp_ratio=4.0, output_dim=16)
    key = jax.random.PRNGKey(0)
    pkey, xkey = jax.random.split(key)
    params = init_params(pkey, cfg)
    x = jax.random.normal(xkey, (2, 3, 16, 16), dtype=jnp.float32)   # NCHW

    fwd = jax.jit(functools.partial(forward, cfg=cfg))
    out = jax.block_until_ready(fwd(params, x))
    assert out.shape == (2, cfg['output_dim'])
    assert bool(jnp.all(jnp.isfinite(out)))
    assert bool(jnp.all((out >= 0.0) & (out <= 1.0)))                # sigmoid range
    print("KERNEL_OK")
</pallas_src>

<mosaic_0001>
module attributes {stable_mosaic.version = 11 : i64} {
  func.func @_resize_kernel(%arg0: i32, %arg1: memref<3x16x16xf32, #tpu.memory_space<vmem>>, %arg2: memref<32x16xf32, #tpu.memory_space<vmem>>, %arg3: memref<16x32xf32, #tpu.memory_space<vmem>>, %arg4: memref<3x32x32xf32, #tpu.memory_space<vmem>>) attributes {dimension_semantics = [#tpu.dimension_semantics<parallel>], iteration_bounds = array<i64: 2>, scalar_prefetch = 0 : i64, scratch_operands = 0 : i64, tpu.core_type = #tpu.core_type<tc>, window_params = [{transform_indices = @transform_0, window_bounds = array<i64: 3, 16, 16>}, {pipeline_mode = #tpu.pipeline_mode<synchronous>, transform_indices = @transform_1, window_bounds = array<i64: 32, 16>}, {pipeline_mode = #tpu.pipeline_mode<synchronous>, transform_indices = @transform_2, window_bounds = array<i64: 16, 32>}, {transform_indices = @transform_3, window_bounds = array<i64: 3, 32, 32>}]} {
    %c0 = arith.constant 0 : index
    %c0_0 = arith.constant 0 : index
    %0 = vector.load %arg2[%c0, %c0_0] : memref<32x16xf32, #tpu.memory_space<vmem>>, vector<32x16xf32>
    %c0_1 = arith.constant 0 : index
    %c0_2 = arith.constant 0 : index
    %1 = vector.load %arg3[%c0_1, %c0_2] : memref<16x32xf32, #tpu.memory_space<vmem>>, vector<16x32xf32>
    %c0_3 = arith.constant 0 : index
    %c0_4 = arith.constant 0 : index
    %c0_5 = arith.constant 0 : index
    %2 = vector.load %arg1[%c0_3, %c0_4, %c0_5] : memref<3x16x16xf32, #tpu.memory_space<vmem>>, vector<1x16x16xf32>
    %3 = vector.shape_cast %2 : vector<1x16x16xf32> to vector<16x16xf32>
    %cst = arith.constant dense<0.000000e+00> : vector<32x16xf32>
    %4 = tpu.matmul %0, %3, %cst {dimension_numbers = #tpu.dot_dimension_numbers<[1], [0], [0], [1], [0, 0, 1, 1], [], []>} : vector<32x16xf32>, vector<16x16xf32>, vector<32x16xf32> -> vector<32x16xf32>
    %cst_6 = arith.constant dense<0.000000e+00> : vector<32x32xf32>
    %5 = tpu.matmul %4, %1, %cst_6 {dimension_numbers = #tpu.dot_dimension_numbers<[1], [0], [0], [1], [0, 0, 1, 1], [], []>} : vector<32x16xf32>, vector<16x32xf32>, vector<32x32xf32> -> vector<32x32xf32>
    %c0_7 = arith.constant 0 : index
    %c0_8 = arith.constant 0 : index
    %c0_9 = arith.constant 0 : index
    %6 = vector.load %arg4[%c0_7, %c0_8, %c0_9] : memref<3x32x32xf32, #tpu.memory_space<vmem>>, vector<1x32x32xf32>
    %7 = vector.shape_cast %6 : vector<1x32x32xf32> to vector<32x32xf32>
    %8 = vector.shape_cast %5 : vector<32x32xf32> to vector<1x32x32xf32>
    tpu.vector_store %arg4[%c0_7, %c0_8, %c0_9], %8 {strides = array<i32>} : memref<3x32x32xf32, #tpu.memory_space<vmem>>, vector<1x32x32xf32>,
    %c1 = arith.constant 1 : index
    %c0_10 = arith.constant 0 : index
    %c0_11 = arith.constant 0 : index
    %9 = vector.load %arg1[%c1, %c0_10, %c0_11] : memref<3x16x16xf32, #tpu.memory_space<vmem>>, vector<1x16x16xf32>
    %10 = vector.shape_cast %9 : vector<1x16x16xf32> to vector<16x16xf32>
    %cst_12 = arith.constant dense<0.000000e+00> : vector<32x16xf32>
    %11 = tpu.matmul %0, %10, %cst_12 {dimension_numbers = #tpu.dot_dimension_numbers<[1], [0], [0], [1], [0, 0, 1, 1], [], []>} : vector<32x16xf32>, vector<16x16xf32>, vector<32x16xf32> -> vector<32x16xf32>
    %cst_13 = arith.constant dense<0.000000e+00> : vector<32x32xf32>
    %12 = tpu.matmul %11, %1, %cst_13 {dimension_numbers = #tpu.dot_dimension_numbers<[1], [0], [0], [1], [0, 0, 1, 1], [], []>} : vector<32x16xf32>, vector<16x32xf32>, vector<32x32xf32> -> vector<32x32xf32>
    %c1_14 = arith.constant 1 : index
    %c0_15 = arith.constant 0 : index
    %c0_16 = arith.constant 0 : index
    %13 = vector.load %arg4[%c1_14, %c0_15, %c0_16] : memref<3x32x32xf32, #tpu.memory_space<vmem>>, vector<1x32x32xf32>
    %14 = vector.shape_cast %13 : vector<1x32x32xf32> to vector<32x32xf32>
    %15 = vector.shape_cast %12 : vector<32x32xf32> to vector<1x32x32xf32>
    tpu.vector_store %arg4[%c1_14, %c0_15, %c0_16], %15 {strides = array<i32>} : memref<3x32x32xf32, #tpu.memory_space<vmem>>, vector<1x32x32xf32>,
    %c2 = arith.constant 2 : index
    %c0_17 = arith.constant 0 : index
    %c0_18 = arith.constant 0 : index
    %16 = vector.load %arg1[%c2, %c0_17, %c0_18] : memref<3x16x16xf32, #tpu.memory_space<vmem>>, vector<1x16x16xf32>
    %17 = vector.shape_cast %16 : vector<1x16x16xf32> to vector<16x16xf32>
    %cst_19 = arith.constant dense<0.000000e+00> : vector<32x16xf32>
    %18 = tpu.matmul %0, %17, %cst_19 {dimension_numbers = #tpu.dot_dimension_numbers<[1], [0], [0], [1], [0, 0, 1, 1], [], []>} : vector<32x16xf32>, vector<16x16xf32>, vector<32x16xf32> -> vector<32x16xf32>
    %cst_20 = arith.constant dense<0.000000e+00> : vector<32x32xf32>
    %19 = tpu.matmul %18, %1, %cst_20 {dimension_numbers = #tpu.dot_dimension_numbers<[1], [0], [0], [1], [0, 0, 1, 1], [], []>} : vector<32x16xf32>, vector<16x32xf32>, vector<32x32xf32> -> vector<32x32xf32>
    %c2_21 = arith.constant 2 : index
    %c0_22 = arith.constant 0 : index
    %c0_23 = arith.constant 0 : index
    %20 = vector.load %arg4[%c2_21, %c0_22, %c0_23] : memref<3x32x32xf32, #tpu.memory_space<vmem>>, vector<1x32x32xf32>
    %21 = vector.shape_cast %20 : vector<1x32x32xf32> to vector<32x32xf32>
    %22 = vector.shape_cast %19 : vector<32x32xf32> to vector<1x32x32xf32>
    tpu.vector_store %arg4[%c2_21, %c0_22, %c0_23], %22 {strides = array<i32>} : memref<3x32x32xf32, #tpu.memory_space<vmem>>, vector<1x32x32xf32>,
    return
  }
  func.func @transform_0(%arg0: i32) -> (i32, i32, i32) {
    %c0_i32 = arith.constant 0 : i32
    %c0_i32_0 = arith.constant 0 : i32
    %c0_i32_1 = arith.constant 0 : i32
    return %arg0, %c0_i32, %c0_i32_0 : i32, i32, i32
  }
  func.func @transform_1(%arg0: i32) -> (i32, i32) {
    %c0_i32 = arith.constant 0 : i32
    %c0_i32_0 = arith.constant 0 : i32
    %c0_i32_1 = arith.constant 0 : i32
    return %c0_i32, %c0_i32_0 : i32, i32
  }
  func.func @transform_2(%arg0: i32) -> (i32, i32) {
    %c0_i32 = arith.constant 0 : i32
    %c0_i32_0 = arith.constant 0 : i32
    %c0_i32_1 = arith.constant 0 : i32
    return %c0_i32, %c0_i32_0 : i32, i32
  }
  func.func @transform_3(%arg0: i32) -> (i32, i32, i32) {
    %c0_i32 = arith.constant 0 : i32
    %c0_i32_0 = arith.constant 0 : i32
    %c0_i32_1 = arith.constant 0 : i32
    return %arg0, %c0_i32, %c0_i32_0 : i32, i32, i32
  }
}

module attributes {stable_mosaic.version = 11 : i64} {
  func.func @_linear_kernel(%arg0: i32, %arg1: i32, %arg2: memref<16x192xbf16, #tpu.memory_space<vmem>>, %arg3: memref<192x64xbf16, #tpu.memory_space<vmem>>, %arg4: memref<1x64xf32, #tpu.memory_space<vmem>>, %arg5: memref<16x64xbf16, #tpu.memory_space<vmem>>) attributes {dimension_semantics = [#tpu.dimension_semantics<parallel>, #tpu.dimension_semantics<parallel>], iteration_bounds = array<i64: 2, 1>, scalar_prefetch = 0 : i64, scratch_operands = 0 : i64, tpu.core_type = #tpu.core_type<tc>, window_params = [{transform_indices = @transform_0, window_bounds = array<i64: 16, 192>}, {transform_indices = @transform_1, window_bounds = array<i64: 192, 64>}, {transform_indices = @transform_2, window_bounds = array<i64: 1, 64>}, {transform_indices = @transform_3, window_bounds = array<i64: 16, 64>}]} {
    %c0 = arith.constant 0 : index
    %c0_0 = arith.constant 0 : index
    %0 = vector.load %arg2[%c0, %c0_0] : memref<16x192xbf16, #tpu.memory_space<vmem>>, vector<16x192xbf16>
    %c0_1 = arith.constant 0 : index
    %c0_2 = arith.constant 0 : index
    %1 = vector.load %arg3[%c0_1, %c0_2] : memref<192x64xbf16, #tpu.memory_space<vmem>>, vector<192x64xbf16>
    %cst = arith.constant dense<0.000000e+00> : vector<16x64xf32>
    %2 = tpu.matmul %0, %1, %cst {dimension_numbers = #tpu.dot_dimension_numbers<[1], [0], [0], [1], [0, 0, 1, 1], [], []>} : vector<16x192xbf16>, vector<192x64xbf16>, vector<16x64xf32> -> vector<16x64xf32>
    %c0_3 = arith.constant 0 : index
    %c0_4 = arith.constant 0 : index
    %3 = vector.load %arg4[%c0_3, %c0_4] : memref<1x64xf32, #tpu.memory_space<vmem>>, vector<1x64xf32>
    %4 = vector.broadcast %3 : vector<1x64xf32> to vector<16x64xf32>
    %5 = arith.addf %2, %4 : vector<16x64xf32>
    %6 = arith.truncf %5 : vector<16x64xf32> to vector<16x64xbf16>
    %c0_5 = arith.constant 0 : index
    %c0_6 = arith.constant 0 : index
    %7 = vector.load %arg5[%c0_5, %c0_6] : memref<16x64xbf16, #tpu.memory_space<vmem>>, vector<16x64xbf16>
    tpu.vector_store %arg5[%c0_5, %c0_6], %6 {strides = array<i32>} : memref<16x64xbf16, #tpu.memory_space<vmem>>, vector<16x64xbf16>,
    return
  }
  func.func @transform_0(%arg0: i32, %arg1: i32) -> (i32, i32) {
    %c0_i32 = arith.constant 0 : i32
    %c0_i32_0 = arith.constant 0 : i32
    return %arg0, %c0_i32 : i32, i32
  }
  func.func @transform_1(%arg0: i32, %arg1: i32) -> (i32, i32) {
    %c0_i32 = arith.constant 0 : i32
    %c0_i32_0 = arith.constant 0 : i32
    return %c0_i32, %arg1 : i32, i32
  }
  func.func @transform_2(%arg0: i32, %arg1: i32) -> (i32, i32) {
    %c0_i32 = arith.constant 0 : i32
    %c0_i32_0 = arith.constant 0 : i32
    return %c0_i32, %arg1 : i32, i32
  }
  func.func @transform_3(%arg0: i32, %arg1: i32) -> (i32, i32) {
    %c0_i32 = arith.constant 0 : i32
    return %arg0, %arg1 : i32, i32
  }
}

module attributes {stable_mosaic.version = 11 : i64} {
  func.func @_encoder_layer_kernel(%arg0: i32, %arg1: memref<1x17x64xbf16, #tpu.memory_space<vmem>>, %arg2: memref<3x4x64x16xbf16, #tpu.memory_space<vmem>>, %arg3: memref<3x4x1x16xf32, #tpu.memory_space<vmem>>, %arg4: memref<4x16x64xbf16, #tpu.memory_space<vmem>>, %arg5: memref<1x64xf32, #tpu.memory_space<vmem>>, %arg6: memref<1x64xf32, #tpu.memory_space<vmem>>, %arg7: memref<1x64xf32, #tpu.memory_space<vmem>>, %arg8: memref<64x256xbf16, #tpu.memory_space<vmem>>, %arg9: memref<1x256xf32, #tpu.memory_space<vmem>>, %arg10: memref<256x64xbf16, #tpu.memory_space<vmem>>, %arg11: memref<1x64xf32, #tpu.memory_space<vmem>>, %arg12: memref<1x64xf32, #tpu.memory_space<vmem>>, %arg13: memref<1x64xf32, #tpu.memory_space<vmem>>, %arg14: memref<1x17x64xbf16, #tpu.memory_space<vmem>>) attributes {dimension_semantics = [#tpu.dimension_semantics<parallel>], iteration_bounds = array<i64: 2>, scalar_prefetch = 0 : i64, scratch_operands = 0 : i64, tpu.core_type = #tpu.core_type<tc>, window_params = [{transform_indices = @transform_0, window_bounds = array<i64: 1, 17, 64>}, {pipeline_mode = #tpu.pipeline_mode<synchronous>, transform_indices = @transform_1, window_bounds = array<i64: 3, 4, 64, 16>}, {pipeline_mode = #tpu.pipeline_mode<synchronous>, transform_indices = @transform_2, window_bounds = array<i64: 3, 4, 1, 16>}, {pipeline_mode = #tpu.pipeline_mode<synchronous>, transform_indices = @transform_3, window_bounds = array<i64: 4, 16, 64>}, {pipeline_mode = #tpu.pipeline_mode<synchronous>, transform_indices = @transform_4, window_bounds = array<i64: 1, 64>}, {pipeline_mode = #tpu.pipeline_mode<synchronous>, transform_indices = @transform_5, window_bounds = array<i64: 1, 64>}, {pipeline_mode = #tpu.pipeline_mode<synchronous>, transform_indices = @transform_6, window_bounds = array<i64: 1, 64>}, {pipeline_mode = #tpu.pipeline_mode<synchronous>, transform_indices = @transform_7, window_bounds = array<i64: 64, 256>}, {pipeline_mode = #tpu.pipeline_mode<synchronous>, transform_indices = @transform_8, window_bounds = array<i64: 1, 256>}, {pipeline_mode = #tpu.pipeline_mode<synchronous>, transform_indices = @transform_9, window_bounds = array<i64: 256, 64>}, {pipeline_mode = #tpu.pipeline_mode<synchronous>, transform_indices = @transform_10, window_bounds = array<i64: 1, 64>}, {pipeline_mode = #tpu.pipeline_mode<synchronous>, transform_indices = @transform_11, window_bounds = array<i64: 1, 64>}, {pipeline_mode = #tpu.pipeline_mode<synchronous>, transform_indices = @transform_12, window_bounds = array<i64: 1, 64>}, {transform_indices = @transform_13, window_bounds = array<i64: 1, 17, 64>}]} {
    %c0 = arith.constant 0 : index
    %c0_0 = arith.constant 0 : index
    %c0_1 = arith.constant 0 : index
    %0 = vector.load %arg1[%c0, %c0_0, %c0_1] : memref<1x17x64xbf16, #tpu.memory_space<vmem>>, vector<1x17x64xbf16>
    %1 = vector.shape_cast %0 : vector<1x17x64xbf16> to vector<17x64xbf16>
    %2 = arith.extf %1 : vector<17x64xbf16> to vector<17x64xf32>
    %cst = arith.constant 0.000000e+00 : f32
    %3 = vector.broadcast %cst : f32 to vector<17x64xf32>
    %c0_2 = arith.constant 0 : index
    %c0_3 = arith.constant 0 : index
    %c0_4 = arith.constant 0 : index
    %c0_5 = arith.constant 0 : index
    %4 = vector.load %arg2[%c0_2, %c0_3, %c0_4, %c0_5] : memref<3x4x64x16xbf16, #tpu.memory_space<vmem>>, vector<1x1x64x16xbf16>
    %5 = vector.shape_cast %4 : vector<1x1x64x16xbf16> to vector<64x16xbf16>
    %cst_6 = arith.constant dense<0.000000e+00> : vector<17x16xf32>
    %6 = tpu.matmul %1, %5, %cst_6 {dimension_numbers = #tpu.dot_dimension_numbers<[1], [0], [0], [1], [0, 0, 1, 1], [], []>} : vector<17x64xbf16>, vector<64x16xbf16>, vector<17x16xf32> -> vector<17x16xf32>
    %c0_7 = arith.constant 0 : index
    %c0_8 = arith.constant 0 : index
    %c0_9 = arith.constant 0 : index
    %c0_10 = arith.constant 0 : index
    %7 = vector.load %arg3[%c0_7, %c0_8, %c0_9, %c0_10] : memref<3x4x1x16xf32, #tpu.memory_space<vmem>>, vector<1x1x1x16xf32>
    %8 = vector.shape_cast %7 : vector<1x1x1x16xf32> to vector<1x16xf32>
    %9 = vector.broadcast %8 : vector<1x16xf32> to vector<17x16xf32>
    %10 = arith.addf %6, %9 : vector<17x16xf32>
    %c1 = arith.constant 1 : index
    %c0_11 = arith.constant 0 : index
    %c0_12 = arith.constant 0 : index
    %c0_13 = arith.constant 0 : index
    %11 = vector.load %arg2[%c1, %c0_11, %c0_12, %c0_13] : memref<3x4x64x16xbf16, #tpu.memory_space<vmem>>, vector<1x1x64x16xbf16>
    %12 = vector.shape_cast %11 : vector<1x1x64x16xbf16> to vector<64x16xbf16>
    %cst_14 = arith.constant dense<0.000000e+00> : vector<17x16xf32>
    %13 = tpu.matmul %1, %12, %cst_14 {dimension_numbers = #tpu.dot_dimension_numbers<[1], [0], [0], [1], [0, 0, 1, 1], [], []>} : vector<17x64xbf16>, vector<64x16xbf16>, vector<17x16xf32> -> vector<17x16xf32>
    %c1_15 = arith.constant 1 : index
    %c0_16 = arith.constant 0 : index
    %c0_17 = arith.constant 0 : index
    %c0_18 = arith.constant 0 : index
    %14 = vector.load %arg3[%c1_15, %c0_16, %c0_17, %c0_18] : memref<3x4x1x16xf32, #tpu.memory_space<vmem>>, vector<1x1x1x16xf32>
    %15 = vector.shape_cast %14 : vector<1x1x1x16xf32> to vector<1x16xf32>
    %16 = vector.broadcast %15 : vector<1x16xf32> to vector<17x16xf32>
    %17 = arith.addf %13, %16 : vector<17x16xf32>
    %c2 = arith.constant 2 : index
    %c0_19 = arith.constant 0 : index
    %c0_20 = arith.constant 0 : index
    %c0_21 = arith.constant 0 : index
    %18 = vector.load %arg2[%c2, %c0_19, %c0_20, %c0_21] : memref<3x4x64x16xbf16, #tpu.memory_space<vmem>>, vector<1x1x64x16xbf16>
    %19 = vector.shape_cast %18 : vector<1x1x64x16xbf16> to vector<64x16xbf16>
    %cst_22 = arith.constant dense<0.000000e+00> : vector<17x16xf32>
    %20 = tpu.matmul %1, %19, %cst_22 {dimension_numbers = #tpu.dot_dimension_numbers<[1], [0], [0], [1], [0, 0, 1, 1], [], []>} : vector<17x64xbf16>, vector<64x16xbf16>, vector<17x16xf32> -> vector<17x16xf32>
    %c2_23 = arith.constant 2 : index
    %c0_24 = arith.constant 0 : index
    %c0_25 = arith.constant 0 : index
    %c0_26 = arith.constant 0 : index
    %21 = vector.load %arg3[%c2_23, %c0_24, %c0_25, %c0_26] : memref<3x4x1x16xf32, #tpu.memory_space<vmem>>, vector<1x1x1x16xf32>
    %22 = vector.shape_cast %21 : vector<1x1x1x16xf32> to vector<1x16xf32>
    %23 = vector.broadcast %22 : vector<1x16xf32> to vector<17x16xf32>
    %24 = arith.addf %20, %23 : vector<17x16xf32>
    %25 = arith.truncf %10 : vector<17x16xf32> to vector<17x16xbf16>
    %26 = arith.truncf %17 : vector<17x16xf32> to vector<17x16xbf16>
    %cst_27 = arith.constant dense<0.000000e+00> : vector<17x17xf32>
    %27 = tpu.matmul %25, %26, %cst_27 {dimension_numbers = #tpu.dot_dimension_numbers<[1], [1], [0], [0], [0, 0, 1, 0], [], []>} : vector<17x16xbf16>, vector<17x16xbf16>, vector<17x17xf32> -> vector<17x17xf32>
    %cst_28 = arith.constant dense<0xFF800000> : vector<17xf32>
    %28 = vector.multi_reduction <maximumf>, %27, %cst_28 [1] : vector<17x17xf32> to vector<17xf32>
    %29 = vector.shape_cast %28 : vector<17xf32> to vector<17x1xf32>
    %30 = vector.broadcast %29 : vector<17x1xf32> to vector<17x17xf32>
    %31 = arith.subf %27, %30 : vector<17x17xf32>
    %32 = math.exp %31 : vector<17x17xf32>
    %cst_29 = arith.constant dense<0.000000e+00> : vector<17xf32>
    %33 = vector.multi_reduction <add>, %32, %cst_29 [1] : vector<17x17xf32> to vector<17xf32>
    %34 = vector.shape_cast %33 : vector<17xf32> to vector<17x1xf32>
    %35 = arith.truncf %32 : vector<17x17xf32> to vector<17x17xbf16>
    %36 = arith.truncf %24 : vector<17x16xf32> to vector<17x16xbf16>
    %cst_30 = arith.constant dense<0.000000e+00> : vector<17x16xf32>
    %37 = tpu.matmul %35, %36, %cst_30 {dimension_numbers = #tpu.dot_dimension_numbers<[1], [0], [0], [1], [0, 0, 1, 1], [], []>} : vector<17x17xbf16>, vector<17x16xbf16>, vector<17x16xf32> -> vector<17x16xf32>
    %cst_31 = arith.constant 1.000000e+00 : f32
    %38 = vector.broadcast %cst_31 : f32 to vector<17x1xf32>
    %39 = arith.divf %38, %34 : vector<17x1xf32>
    %40 = vector.broadcast %39 : vector<17x1xf32> to vector<17x16xf32>
    %41 = arith.mulf %37, %40 : vector<17x16xf32>
    %42 = arith.truncf %41 : vector<17x16xf32> to vector<17x16xbf16>
    %c0_32 = arith.constant 0 : index
    %c0_33 = arith.constant 0 : index
    %c0_34 = arith.constant 0 : index
    %43 = vector.load %arg4[%c0_32, %c0_33, %c0_34] : memref<4x16x64xbf16, #tpu.memory_space<vmem>>, vector<1x16x64xbf16>
    %44 = vector.shape_cast %43 : vector<1x16x64xbf16> to vector<16x64xbf16>
    %cst_35 = arith.constant dense<0.000000e+00> : vector<17x64xf32>
    %45 = tpu.matmul %42, %44, %cst_35 {dimension_numbers = #tpu.dot_dimension_numbers<[1], [0], [0], [1], [0, 0, 1, 1], [], []>} : vector<17x16xbf16>, vector<16x64xbf16>, vector<17x64xf32> -> vector<17x64xf32>
    %46 = arith.addf %3, %45 : vector<17x64xf32>
    %c0_36 = arith.constant 0 : index
    %c1_37 = arith.constant 1 : index
    %c0_38 = arith.constant 0 : index
    %c0_39 = arith.constant 0 : index
    %47 = vector.load %arg2[%c0_36, %c1_37, %c0_38, %c0_39] : memref<3x4x64x16xbf16, #tpu.memory_space<vmem>>, vector<1x1x64x16xbf16>
    %48 = vector.shape_cast %47 : vector<1x1x64x16xbf16> to vector<64x16xbf16>
    %cst_40 = arith.constant dense<0.000000e+00> : vector<17x16xf32>
    %49 = tpu.matmul %1, %48, %cst_40 {dimension_numbers = #tpu.dot_dimension_numbers<[1], [0], [0], [1], [0, 0, 1, 1], [], []>} : vector<17x64xbf16>, vector<64x16xbf16>, vector<17x16xf32> -> vector<17x16xf32>
    %c0_41 = arith.constant 0 : index
    %c1_42 = arith.constant 1 : index
    %c0_43 = arith.constant 0 : index
    %c0_44 = arith.constant 0 : index
    %50 = vector.load %arg3[%c0_41, %c1_42, %c0_43, %c0_44] : memref<3x4x1x16xf32, #tpu.memory_space<vmem>>, vector<1x1x1x16xf32>
    %51 = vector.shape_cast %50 : vector<1x1x1x16xf32> to vector<1x16xf32>
    %52 = vector.broadcast %51 : vector<1x16xf32> to vector<17x16xf32>
    %53 = arith.addf %49, %52 : vector<17x16xf32>
    %c1_45 = arith.constant 1 : index
    %c1_46 = arith.constant 1 : index
    %c0_47 = arith.constant 0 : index
    %c0_48 = arith.constant 0 : index
    %54 = vector.load %arg2[%c1_45, %c1_46, %c0_47, %c0_48] : memref<3x4x64x16xbf16, #tpu.memory_space<vmem>>, vector<1x1x64x16xbf16>
    %55 = vector.shape_cast %54 : vector<1x1x64x16xbf16> to vector<64x16xbf16>
    %cst_49 = arith.constant dense<0.000000e+00> : vector<17x16xf32>
    %56 = tpu.matmul %1, %55, %cst_49 {dimension_numbers = #tpu.dot_dimension_numbers<[1], [0], [0], [1], [0, 0, 1, 1], [], []>} : vector<17x64xbf16>, vector<64x16xbf16>, vector<17x16xf32> -> vector<17x16xf32>
    %c1_50 = arith.constant 1 : index
    %c1_51 = arith.constant 1 : index
    %c0_52 = arith.constant 0 : index
    %c0_53 = arith.constant 0 : index
    %57 = vector.load %arg3[%c1_50, %c1_51, %c0_52, %c0_53] : memref<3x4x1x16xf32, #tpu.memory_space<vmem>>, vector<1x1x1x16xf32>
    %58 = vector.shape_cast %57 : vector<1x1x1x16xf32> to vector<1x16xf32>
    %59 = vector.broadcast %58 : vector<1x16xf32> to vector<17x16xf32>
    %60 = arith.addf %56, %59 : vector<17x16xf32>
    %c2_54 = arith.constant 2 : index
    %c1_55 = arith.constant 1 : index
    %c0_56 = arith.constant 0 : index
    %c0_57 = arith.constant 0 : index
    %61 = vector.load %arg2[%c2_54, %c1_55, %c0_56, %c0_57] : memref<3x4x64x16xbf16, #tpu.memory_space<vmem>>, vector<1x1x64x16xbf16>
    %62 = vector.shape_cast %61 : vector<1x1x64x16xbf16> to vector<64x16xbf16>
    %cst_58 = arith.constant dense<0.000000e+00> : vector<17x16xf32>
    %63 = tpu.matmul %1, %62, %cst_58 {dimension_numbers = #tpu.dot_dimension_numbers<[1], [0], [0], [1], [0, 0, 1, 1], [], []>} : vector<17x64xbf16>, vector<64x16xbf16>, vector<17x16xf32> -> vector<17x16xf32>
    %c2_59 = arith.constant 2 : index
    %c1_60 = arith.constant 1 : index
    %c0_61 = arith.constant 0 : index
    %c0_62 = arith.constant 0 : index
    %64 = vector.load %arg3[%c2_59, %c1_60, %c0_61, %c0_62] : memref<3x4x1x16xf32, #tpu.memory_space<vmem>>, vector<1x1x1x16xf32>
    %65 = vector.shape_cast %64 : vector<1x1x1x16xf32> to vector<1x16xf32>
    %66 = vector.broadcast %65 : vector<1x16xf32> to vector<17x16xf32>
    %67 = arith.addf %63, %66 : vector<17x16xf32>
    %68 = arith.truncf %53 : vector<17x16xf32> to vector<17x16xbf16>
    %69 = arith.truncf %60 : vector<17x16xf32> to vector<17x16xbf16>
    %cst_63 = arith.constant dense<0.000000e+00> : vector<17x17xf32>
    %70 = tpu.matmul %68, %69, %cst_63 {dimension_numbers = #tpu.dot_dimension_numbers<[1], [1], [0], [0], [0, 0, 1, 0], [], []>} : vector<17x16xbf16>, vector<17x16xbf16>, vector<17x17xf32> -> vector<17x17xf32>
    %cst_64 = arith.constant dense<0xFF800000> : vector<17xf32>
    %71 = vector.multi_reduction <maximumf>, %70, %cst_64 [1] : vector<17x17xf32> to vector<17xf32>
    %72 = vector.shape_cast %71 : vector<17xf32> to vector<17x1xf32>
    %73 = vector.broadcast %72 : vector<17x1xf32> to vector<17x17xf32>
    %74 = arith.subf %70, %73 : vector<17x17xf32>
    %75 = math.exp %74 : vector<17x17xf32>
    %cst_65 = arith.constant dense<0.000000e+00> : vector<17xf32>
    %76 = vector.multi_reduction <add>, %75, %cst_65 [1] : vector<17x17xf32> to vector<17xf32>
    %77 = vector.shape_cast %76 : vector<17xf32> to vector<17x1xf32>
    %78 = arith.truncf %75 : vector<17x17xf32> to vector<17x17xbf16>
    %79 = arith.truncf %67 : vector<17x16xf32> to vector<17x16xbf16>
    %cst_66 = arith.constant dense<0.000000e+00> : vector<17x16xf32>
    %80 = tpu.matmul %78, %79, %cst_66 {dimension_numbers = #tpu.dot_dimension_numbers<[1], [0], [0], [1], [0, 0, 1, 1], [], []>} : vector<17x17xbf16>, vector<17x16xbf16>, vector<17x16xf32> -> vector<17x16xf32>
    %cst_67 = arith.constant 1.000000e+00 : f32
    %81 = vector.broadcast %cst_67 : f32 to vector<17x1xf32>
    %82 = arith.divf %81, %77 : vector<17x1xf32>
    %83 = vector.broadcast %82 : vector<17x1xf32> to vector<17x16xf32>
    %84 = arith.mulf %80, %83 : vector<17x16xf32>
    %85 = arith.truncf %84 : vector<17x16xf32> to vector<17x16xbf16>
    %c1_68 = arith.constant 1 : index
    %c0_69 = arith.constant 0 : index
    %c0_70 = arith.constant 0 : index
    %86 = vector.load %arg4[%c1_68, %c0_69, %c0_70] : memref<4x16x64xbf16, #tpu.memory_space<vmem>>, vector<1x16x64xbf16>
    %87 = vector.shape_cast %86 : vector<1x16x64xbf16> to vector<16x64xbf16>
    %cst_71 = arith.constant dense<0.000000e+00> : vector<17x64xf32>
    %88 = tpu.matmul %85, %87, %cst_71 {dimension_numbers = #tpu.dot_dimension_numbers<[1], [0], [0], [1], [0, 0, 1, 1], [], []>} : vector<17x16xbf16>, vector<16x64xbf16>, vector<17x64xf32> -> vector<17x64xf32>
    %89 = arith.addf %46, %88 : vector<17x64xf32>
    %c0_72 = arith.constant 0 : index
    %c2_73 = arith.constant 2 : index
    %c0_74 = arith.constant 0 : index
    %c0_75 = arith.constant 0 : index
    %90 = vector.load %arg2[%c0_72, %c2_73, %c0_74, %c0_75] : memref<3x4x64x16xbf16, #tpu.memory_space<vmem>>, vector<1x1x64x16xbf16>
    %91 = vector.shape_cast %90 : vector<1x1x64x16xbf16> to vector<64x16xbf16>
    %cst_76 = arith.constant dense<0.000000e+00> : vector<17x16xf32>
    %92 = tpu.matmul %1, %91, %cst_76 {dimension_numbers = #tpu.dot_dimension_numbers<[1], [0], [0], [1], [0, 0, 1, 1], [], []>} : vector<17x64xbf16>, vector<64x16xbf16>, vector<17x16xf32> -> vector<17x16xf32>
    %c0_77 = arith.constant 0 : index
    %c2_78 = arith.constant 2 : index
    %c0_79 = arith.constant 0 : index
    %c0_80 = arith.constant 0 : index
    %93 = vector.load %arg3[%c0_77, %c2_78, %c0_79, %c0_80] : memref<3x4x1x16xf32, #tpu.memory_space<vmem>>, vector<1x1x1x16xf32>
    %94 = vector.shape_cast %93 : vector<1x1x1x16xf32> to vector<1x16xf32>
    %95 = vector.broadcast %94 : vector<1x16xf32> to vector<17x16xf32>
    %96 = arith.addf %92, %95 : vector<17x16xf32>
    %c1_81 = arith.constant 1 : index
    %c2_82 = arith.constant 2 : index
    %c0_83 = arith.constant 0 : index
    %c0_84 = arith.constant 0 : index
    %97 = vector.load %arg2[%c1_81, %c2_82, %c0_83, %c0_84] : memref<3x4x64x16xbf16, #tpu.memory_space<vmem>>, vector<1x1x64x16xbf16>
    %98 = vector.shape_cast %97 : vector<1x1x64x16xbf16> to vector<64x16xbf16>
    %cst_85 = arith.constant dense<0.000000e+00> : vector<17x16xf32>
    %99 = tpu.matmul %1, %98, %cst_85 {dimension_numbers = #tpu.dot_dimension_numbers<[1], [0], [0], [1], [0, 0, 1, 1], [], []>} : vector<17x64xbf16>, vector<64x16xbf16>, vector<17x16xf32> -> vector<17x16xf32>
    %c1_86 = arith.constant 1 : index
    %c2_87 = arith.constant 2 : index
    %c0_88 = arith.constant 0 : index
    %c0_89 = arith.constant 0 : index
    %100 = vector.load %arg3[%c1_86, %c2_87, %c0_88, %c0_89] : memref<3x4x1x16xf32, #tpu.memory_space<vmem>>, vector<1x1x1x16xf32>
    %101 = vector.shape_cast %100 : vector<1x1x1x16xf32> to vector<1x16xf32>
    %102 = vector.broadcast %101 : vector<1x16xf32> to vector<17x16xf32>
    %103 = arith.addf %99, %102 : vector<17x16xf32>
    %c2_90 = arith.constant 2 : index
    %c2_91 = arith.constant 2 : index
    %c0_92 = arith.constant 0 : index
    %c0_93 = arith.constant 0 : index
    %104 = vector.load %arg2[%c2_90, %c2_91, %c0_92, %c0_93] : memref<3x4x64x16xbf16, #tpu.memory_space<vmem>>, vector<1x1x64x16xbf16>
    %105 = vector.shape_cast %104 : vector<1x1x64x16xbf16> to vector<64x16xbf16>
    %cst_94 = arith.constant dense<0.000000e+00> : vector<17x16xf32>
    %106 = tpu.matmul %1, %105, %cst_94 {dimension_numbers = #tpu.dot_dimension_numbers<[1], [0], [0], [1], [0, 0, 1, 1], [], []>} : vector<17x64xbf16>, vector<64x16xbf16>, vector<17x16xf32> -> vector<17x16xf32>
    %c2_95 = arith.constant 2 : index
    %c2_96 = arith.constant 2 : index
    %c0_97 = arith.constant 0 : index
    %c0_98 = arith.constant 0 : index
    %107 = vector.load %arg3[%c2_95, %c2_96, %c0_97, %c0_98] : memref<3x4x1x16xf32, #tpu.memory_space<vmem>>, vector<1x1x1x16xf32>
    %108 = vector.shape_cast %107 : vector<1x1x1x16xf32> to vector<1x16xf32>
    %109 = vector.broadcast %108 : vector<1x16xf32> to vector<17x16xf32>
    %110 = arith.addf %106, %109 : vector<17x16xf32>
    %111 = arith.truncf %96 : vector<17x16xf32> to vector<17x16xbf16>
    %112 = arith.truncf %103 : vector<17x16xf32> to vector<17x16xbf16>
    %cst_99 = arith.constant dense<0.000000e+00> : vector<17x17xf32>
    %113 = tpu.matmul %111, %112, %cst_99 {dimension_numbers = #tpu.dot_dimension_numbers<[1], [1], [0], [0], [0, 0, 1, 0], [], []>} : vector<17x16xbf16>, vector<17x16xbf16>, vector<17x17xf32> -> vector<17x17xf32>
    %cst_100 = arith.constant dense<0xFF800000> : vector<17xf32>
    %114 = vector.multi_reduction <maximumf>, %113, %cst_100 [1] : vector<17x17xf32> to vector<17xf32>
    %115 = vector.shape_cast %114 : vector<17xf32> to vector<17x1xf32>
    %116 = vector.broadcast %115 : vector<17x1xf32> to vector<17x17xf32>
    %117 = arith.subf %113, %116 : vector<17x17xf32>
    %118 = math.exp %117 : vector<17x17xf32>
    %cst_101 = arith.constant dense<0.000000e+00> : vector<17xf32>
    %119 = vector.multi_reduction <add>, %118, %cst_101 [1] : vector<17x17xf32> to vector<17xf32>
    %120 = vector.shape_cast %119 : vector<17xf32> to vector<17x1xf32>
    %121 = arith.truncf %118 : vector<17x17xf32> to vector<17x17xbf16>
    %122 = arith.truncf %110 : vector<17x16xf32> to vector<17x16xbf16>
    %cst_102 = arith.constant dense<0.000000e+00> : vector<17x16xf32>
    %123 = tpu.matmul %121, %122, %cst_102 {dimension_numbers = #tpu.dot_dimension_numbers<[1], [0], [0], [1], [0, 0, 1, 1], [], []>} : vector<17x17xbf16>, vector<17x16xbf16>, vector<17x16xf32> -> vector<17x16xf32>
    %cst_103 = arith.constant 1.000000e+00 : f32
    %124 = vector.broadcast %cst_103 : f32 to vector<17x1xf32>
    %125 = arith.divf %124, %120 : vector<17x1xf32>
    %126 = vector.broadcast %125 : vector<17x1xf32> to vector<17x16xf32>
    %127 = arith.mulf %123, %126 : vector<17x16xf32>
    %128 = arith.truncf %127 : vector<17x16xf32> to vector<17x16xbf16>
    %c2_104 = arith.constant 2 : index
    %c0_105 = arith.constant 0 : index
    %c0_106 = arith.constant 0 : index
    %129 = vector.load %arg4[%c2_104, %c0_105, %c0_106] : memref<4x16x64xbf16, #tpu.memory_space<vmem>>, vector<1x16x64xbf16>
    %130 = vector.shape_cast %129 : vector<1x16x64xbf16> to vector<16x64xbf16>
    %cst_107 = arith.constant dense<0.000000e+00> : vector<17x64xf32>
    %131 = tpu.matmul %128, %130, %cst_107 {dimension_numbers = #tpu.dot_dimension_numbers<[1], [0], [0], [1], [0, 0, 1, 1], [], []>} : vector<17x16xbf16>, vector<16x64xbf16>, vector<17x64xf32> -> vector<17x64xf32>
    %132 = arith.addf %89, %131 : vector<17x64xf32>
    %c0_108 = arith.constant 0 : index
    %c3 = arith.constant 3 : index
    %c0_109 = arith.constant 0 : index
    %c0_110 = arith.constant 0 : index
    %133 = vector.load %arg2[%c0_108, %c3, %c0_109, %c0_110] : memref<3x4x64x16xbf16, #tpu.memory_space<vmem>>, vector<1x1x64x16xbf16>
    %134 = vector.shape_cast %133 : vector<1x1x64x16xbf16> to vector<64x16xbf16>
    %cst_111 = arith.constant dense<0.000000e+00> : vector<17x16xf32>
    %135 = tpu.matmul %1, %134, %cst_111 {dimension_numbers = #tpu.dot_dimension_numbers<[1], [0], [0], [1], [0, 0, 1, 1], [], []>} : vector<17x64xbf16>, vector<64x16xbf16>, vector<17x16xf32> -> vector<17x16xf32>
    %c0_112 = arith.constant 0 : index
    %c3_113 = arith.constant 3 : index
    %c0_114 = arith.constant 0 : index
    %c0_115 = arith.constant 0 : index
    %136 = vector.load %arg3[%c0_112, %c3_113, %c0_114, %c0_115] : memref<3x4x1x16xf32, #tpu.memory_space<vmem>>, vector<1x1x1x16xf32>
    %137 = vector.shape_cast %136 : vector<1x1x1x16xf32> to vector<1x16xf32>
    %138 = vector.broadcast %137 : vector<1x16xf32> to vector<17x16xf32>
    %139 = arith.addf %135, %138 : vector<17x16xf32>
    %c1_116 = arith.constant 1 : index
    %c3_117 = arith.constant 3 : index
    %c0_118 = arith.constant 0 : index
    %c0_119 = arith.constant 0 : index
    %140 = vector.load %arg2[%c1_116, %c3_117, %c0_118, %c0_119] : memref<3x4x64x16xbf16, #tpu.memory_space<vmem>>, vector<1x1x64x16xbf16>
    %141 = vector.shape_cast %140 : vector<1x1x64x16xbf16> to vector<64x16xbf16>
    %cst_120 = arith.constant dense<0.000000e+00> : vector<17x16xf32>
    %142 = tpu.matmul %1, %141, %cst_120 {dimension_numbers = #tpu.dot_dimension_numbers<[1], [0], [0], [1], [0, 0, 1, 1], [], []>} : vector<17x64xbf16>, vector<64x16xbf16>, vector<17x16xf32> -> vector<17x16xf32>
    %c1_121 = arith.constant 1 : index
    %c3_122 = arith.constant 3 : index
    %c0_123 = arith.constant 0 : index
    %c0_124 = arith.constant 0 : index
    %143 = vector.load %arg3[%c1_121, %c3_122, %c0_123, %c0_124] : memref<3x4x1x16xf32, #tpu.memory_space<vmem>>, vector<1x1x1x16xf32>
    %144 = vector.shape_cast %143 : vector<1x1x1x16xf32> to vector<1x16xf32>
    %145 = vector.broadcast %144 : vector<1x16xf32> to vector<17x16xf32>
    %146 = arith.addf %142, %145 : vector<17x16xf32>
    %c2_125 = arith.constant 2 : index
    %c3_126 = arith.constant 3 : index
    %c0_127 = arith.constant 0 : index
    %c0_128 = arith.constant 0 : index
    %147 = vector.load %arg2[%c2_125, %c3_126, %c0_127, %c0_128] : memref<3x4x64x16xbf16, #tpu.memory_space<vmem>>, vector<1x1x64x16xbf16>
    %148 = vector.shape_cast %147 : vector<1x1x64x16xbf16> to vector<64x16xbf16>
    %cst_129 = arith.constant dense<0.000000e+00> : vector<17x16xf32>
    %149 = tpu.matmul %1, %148, %cst_129 {dimension_numbers = #tpu.dot_dimension_numbers<[1], [0], [0], [1], [0, 0, 1, 1], [], []>} : vector<17x64xbf16>, vector<64x16xbf16>, vector<17x16xf32> -> vector<17x16xf32>
    %c2_130 = arith.constant 2 : index
    %c3_131 = arith.constant 3 : index
    %c0_132 = arith.constant 0 : index
    %c0_133 = arith.constant 0 : index
    %150 = vector.load %arg3[%c2_130, %c3_131, %c0_132, %c0_133] : memref<3x4x1x16xf32, #tpu.memory_space<vmem>>, vector<1x1x1x16xf32>
    %151 = vector.shape_cast %150 : vector<1x1x1x16xf32> to vector<1x16xf32>
    %152 = vector.broadcast %151 : vector<1x16xf32> to vector<17x16xf32>
    %153 = arith.addf %149, %152 : vector<17x16xf32>
    %154 = arith.truncf %139 : vector<17x16xf32> to vector<17x16xbf16>
    %155 = arith.truncf %146 : vector<17x16xf32> to vector<17x16xbf16>
    %cst_134 = arith.constant dense<0.000000e+00> : vector<17x17xf32>
    %156 = tpu.matmul %154, %155, %cst_134 {dimension_numbers = #tpu.dot_dimension_numbers<[1], [1], [0], [0], [0, 0, 1, 0], [], []>} : vector<17x16xbf16>, vector<17x16xbf16>, vector<17x17xf32> -> vector<17x17xf32>
    %cst_135 = arith.constant dense<0xFF800000> : vector<17xf32>
    %157 = vector.multi_reduction <maximumf>, %156, %cst_135 [1] : vector<17x17xf32> to vector<17xf32>
    %158 = vector.shape_cast %157 : vector<17xf32> to vector<17x1xf32>
    %159 = vector.broadcast %158 : vector<17x1xf32> to vector<17x17xf32>
    %160 = arith.subf %156, %159 : vector<17x17xf32>
    %161 = math.exp %160 : vector<17x17xf32>
    %cst_136 = arith.constant dense<0.000000e+00> : vector<17xf32>
    %162 = vector.multi_reduction <add>, %161, %cst_136 [1] : vector<17x17xf32> to vector<17xf32>
    %163 = vector.shape_cast %162 : vector<17xf32> to vector<17x1xf32>
    %164 = arith.truncf %161 : vector<17x17xf32> to vector<17x17xbf16>
    %165 = arith.truncf %153 : vector<17x16xf32> to vector<17x16xbf16>
    %cst_137 = arith.constant dense<0.000000e+00> : vector<17x16xf32>
    %166 = tpu.matmul %164, %165, %cst_137 {dimension_numbers = #tpu.dot_dimension_numbers<[1], [0], [0], [1], [0, 0, 1, 1], [], []>} : vector<17x17xbf16>, vector<17x16xbf16>, vector<17x16xf32> -> vector<17x16xf32>
    %cst_138 = arith.constant 1.000000e+00 : f32
    %167 = vector.broadcast %cst_138 : f32 to vector<17x1xf32>
    %168 = arith.divf %167, %163 : vector<17x1xf32>
    %169 = vector.broadcast %168 : vector<17x1xf32> to vector<17x16xf32>
    %170 = arith.mulf %166, %169 : vector<17x16xf32>
    %171 = arith.truncf %170 : vector<17x16xf32> to vector<17x16xbf16>
    %c3_139 = arith.constant 3 : index
    %c0_140 = arith.constant 0 : index
    %c0_141 = arith.constant 0 : index
    %172 = vector.load %arg4[%c3_139, %c0_140, %c0_141] : memref<4x16x64xbf16, #tpu.memory_space<vmem>>, vector<1x16x64xbf16>
    %173 = vector.shape_cast %172 : vector<1x16x64xbf16> to vector<16x64xbf16>
    %cst_142 = arith.constant dense<0.000000e+00> : vector<17x64xf32>
    %174 = tpu.matmul %171, %173, %cst_142 {dimension_numbers = #tpu.dot_dimension_numbers<[1], [0], [0], [1], [0, 0, 1, 1], [], []>} : vector<17x16xbf16>, vector<16x64xbf16>, vector<17x64xf32> -> vector<17x64xf32>
    %175 = arith.addf %132, %174 : vector<17x64xf32>
    %c0_143 = arith.constant 0 : index
    %c0_144 = arith.constant 0 : index
    %176 = vector.load %arg5[%c0_143, %c0_144] : memref<1x64xf32, #tpu.memory_space<vmem>>, vector<1x64xf32>
    %177 = vector.broadcast %176 : vector<1x64xf32> to vector<17x64xf32>
    %178 = arith.addf %175, %177 : vector<17x64xf32>
    %179 = arith.addf %178, %2 : vector<17x64xf32>
    %c0_145 = arith.constant 0 : index
    %c0_146 = arith.constant 0 : index
    %180 = vector.load %arg6[%c0_145, %c0_146] : memref<1x64xf32, #tpu.memory_space<vmem>>, vector<1x64xf32>
    %c0_147 = arith.constant 0 : index
    %c0_148 = arith.constant 0 : index
    %181 = vector.load %arg7[%c0_147, %c0_148] : memref<1x64xf32, #tpu.memory_space<vmem>>, vector<1x64xf32>
    %cst_149 = arith.constant dense<0.000000e+00> : vector<17xf32>
    %182 = vector.multi_reduction <add>, %179, %cst_149 [1] : vector<17x64xf32> to vector<17xf32>
    %183 = vector.shape_cast %182 : vector<17xf32> to vector<17x1xf32>
    %cst_150 = arith.constant 6.400000e+01 : f32
    %184 = vector.broadcast %cst_150 : f32 to vector<17x1xf32>
    %185 = arith.divf %183, %184 : vector<17x1xf32>
    %186 = vector.broadcast %185 : vector<17x1xf32> to vector<17x64xf32>
    %187 = arith.subf %179, %186 : vector<17x64xf32>
    %188 = arith.mulf %187, %187 : vector<17x64xf32>
    %cst_151 = arith.constant dense<0.000000e+00> : vector<17xf32>
    %189 = vector.multi_reduction <add>, %188, %cst_151 [1] : vector<17x64xf32> to vector<17xf32>
    %190 = vector.shape_cast %189 : vector<17xf32> to vector<17x1xf32>
    %cst_152 = arith.constant 6.400000e+01 : f32
    %191 = vector.broadcast %cst_152 : f32 to vector<17x1xf32>
    %192 = arith.divf %190, %191 : vector<17x1xf32>
    %193 = vector.broadcast %185 : vector<17x1xf32> to vector<17x64xf32>
    %194 = arith.subf %179, %193 : vector<17x64xf32>
    %cst_153 = arith.constant 9.99999974E-6 : f32
    %195 = vector.broadcast %cst_153 : f32 to vector<17x1xf32>
    %196 = arith.addf %192, %195 : vector<17x1xf32>
    %197 = math.rsqrt %196 : vector<17x1xf32>
    %198 = vector.broadcast %197 : vector<17x1xf32> to vector<17x64xf32>
    %199 = arith.mulf %194, %198 : vector<17x64xf32>
    %200 = vector.broadcast %180 : vector<1x64xf32> to vector<17x64xf32>
    %201 = arith.mulf %199, %200 : vector<17x64xf32>
    %202 = vector.broadcast %181 : vector<1x64xf32> to vector<17x64xf32>
    %203 = arith.addf %201, %202 : vector<17x64xf32>
    %204 = arith.truncf %203 : vector<17x64xf32> to vector<17x64xbf16>
    %c0_154 = arith.constant 0 : index
    %c0_155 = arith.constant 0 : index
    %205 = vector.load %arg8[%c0_154, %c0_155] : memref<64x256xbf16, #tpu.memory_space<vmem>>, vector<64x256xbf16>
    %cst_156 = arith.constant dense<0.000000e+00> : vector<17x256xf32>
    %206 = tpu.matmul %204, %205, %cst_156 {dimension_numbers = #tpu.dot_dimension_numbers<[1], [0], [0], [1], [0, 0, 1, 1], [], []>} : vector<17x64xbf16>, vector<64x256xbf16>, vector<17x256xf32> -> vector<17x256xf32>
    %c0_157 = arith.constant 0 : index
    %c0_158 = arith.constant 0 : index
    %207 = vector.load %arg9[%c0_157, %c0_158] : memref<1x256xf32, #tpu.memory_space<vmem>>, vector<1x256xf32>
    %208 = vector.broadcast %207 : vector<1x256xf32> to vector<17x256xf32>
    %209 = arith.addf %206, %208 : vector<17x256xf32>
    %cst_159 = arith.constant 5.000000e-01 : f32
    %210 = vector.broadcast %cst_159 : f32 to vector<17x256xf32>
    %211 = arith.mulf %210, %209 : vector<17x256xf32>
    %cst_160 = arith.constant 0.707106769 : f32
    %212 = vector.broadcast %cst_160 : f32 to vector<17x256xf32>
    %213 = arith.mulf %209, %212 : vector<17x256xf32>
    %214 = math.erf %213 : vector<17x256xf32>
    %cst_161 = arith.constant 1.000000e+00 : f32
    %215 = vector.broadcast %cst_161 : f32 to vector<17x256xf32>
    %216 = arith.addf %215, %214 : vector<17x256xf32>
    %217 = arith.mulf %211, %216 : vector<17x256xf32>
    %218 = arith.truncf %217 : vector<17x256xf32> to vector<17x256xbf16>
    %c0_162 = arith.constant 0 : index
    %c0_163 = arith.constant 0 : index
    %219 = vector.load %arg10[%c0_162, %c0_163] : memref<256x64xbf16, #tpu.memory_space<vmem>>, vector<256x64xbf16>
    %cst_164 = arith.constant dense<0.000000e+00> : vector<17x64xf32>
    %220 = tpu.matmul %218, %219, %cst_164 {dimension_numbers = #tpu.dot_dimension_numbers<[1], [0], [0], [1], [0, 0, 1, 1], [], []>} : vector<17x256xbf16>, vector<256x64xbf16>, vector<17x64xf32> -> vector<17x64xf32>
    %c0_165 = arith.constant 0 : index
    %c0_166 = arith.constant 0 : index
    %221 = vector.load %arg11[%c0_165, %c0_166] : memref<1x64xf32, #tpu.memory_space<vmem>>, vector<1x64xf32>
    %222 = vector.broadcast %221 : vector<1x64xf32> to vector<17x64xf32>
    %223 = arith.addf %220, %222 : vector<17x64xf32>
    %224 = arith.addf %223, %203 : vector<17x64xf32>
    %c0_167 = arith.constant 0 : index
    %c0_168 = arith.constant 0 : index
    %225 = vector.load %arg12[%c0_167, %c0_168] : memref<1x64xf32, #tpu.memory_space<vmem>>, vector<1x64xf32>
    %c0_169 = arith.constant 0 : index
    %c0_170 = arith.constant 0 : index
    %226 = vector.load %arg13[%c0_169, %c0_170] : memref<1x64xf32, #tpu.memory_space<vmem>>, vector<1x64xf32>
    %cst_171 = arith.constant dense<0.000000e+00> : vector<17xf32>
    %227 = vector.multi_reduction <add>, %224, %cst_171 [1] : vector<17x64xf32> to vector<17xf32>
    %228 = vector.shape_cast %227 : vector<17xf32> to vector<17x1xf32>
    %cst_172 = arith.constant 6.400000e+01 : f32
    %229 = vector.broadcast %cst_172 : f32 to vector<17x1xf32>
    %230 = arith.divf %228, %229 : vector<17x1xf32>
    %231 = vector.broadcast %230 : vector<17x1xf32> to vector<17x64xf32>
    %232 = arith.subf %224, %231 : vector<17x64xf32>
    %233 = arith.mulf %232, %232 : vector<17x64xf32>
    %cst_173 = arith.constant dense<0.000000e+00> : vector<17xf32>
    %234 = vector.multi_reduction <add>, %233, %cst_173 [1] : vector<17x64xf32> to vector<17xf32>
    %235 = vector.shape_cast %234 : vector<17xf32> to vector<17x1xf32>
    %cst_174 = arith.constant 6.400000e+01 : f32
    %236 = vector.broadcast %cst_174 : f32 to vector<17x1xf32>
    %237 = arith.divf %235, %236 : vector<17x1xf32>
    %238 = vector.broadcast %230 : vector<17x1xf32> to vector<17x64xf32>
    %239 = arith.subf %224, %238 : vector<17x64xf32>
    %cst_175 = arith.constant 9.99999974E-6 : f32
    %240 = vector.broadcast %cst_175 : f32 to vector<17x1xf32>
    %241 = arith.addf %237, %240 : vector<17x1xf32>
    %242 = math.rsqrt %241 : vector<17x1xf32>
    %243 = vector.broadcast %242 : vector<17x1xf32> to vector<17x64xf32>
    %244 = arith.mulf %239, %243 : vector<17x64xf32>
    %245 = vector.broadcast %225 : vector<1x64xf32> to vector<17x64xf32>
    %246 = arith.mulf %244, %245 : vector<17x64xf32>
    %247 = vector.broadcast %226 : vector<1x64xf32> to vector<17x64xf32>
    %248 = arith.addf %246, %247 : vector<17x64xf32>
    %249 = arith.truncf %248 : vector<17x64xf32> to vector<17x64xbf16>
    %c0_176 = arith.constant 0 : index
    %c0_177 = arith.constant 0 : index
    %c0_178 = arith.constant 0 : index
    %250 = vector.load %arg14[%c0_176, %c0_177, %c0_178] : memref<1x17x64xbf16, #tpu.memory_space<vmem>>, vector<1x17x64xbf16>
    %251 = vector.shape_cast %250 : vector<1x17x64xbf16> to vector<17x64xbf16>
    %252 = vector.shape_cast %249 : vector<17x64xbf16> to vector<1x17x64xbf16>
    tpu.vector_store %arg14[%c0_176, %c0_177, %c0_178], %252 {strides = array<i32>} : memref<1x17x64xbf16, #tpu.memory_space<vmem>>, vector<1x17x64xbf16>,
    return
  }
  func.func @transform_0(%arg0: i32) -> (i32, i32, i32) {
    %c0_i32 = arith.constant 0 : i32
    %c0_i32_0 = arith.constant 0 : i32
    %c0_i32_1 = arith.constant 0 : i32
    return %arg0, %c0_i32, %c0_i32_0 : i32, i32, i32
  }
  func.func @transform_1(%arg0: i32) -> (i32, i32, i32, i32) {
    %c0_i32 = arith.constant 0 : i32
    %c0_i32_0 = arith.constant 0 : i32
    %c0_i32_1 = arith.constant 0 : i32
    %c0_i32_2 = arith.constant 0 : i32
    %c0_i32_3 = arith.constant 0 : i32
    return %c0_i32, %c0_i32_0, %c0_i32_1, %c0_i32_2 : i32, i32, i32, i32
  }
  func.func @transform_2(%arg0: i32) -> (i32, i32, i32, i32) {
    %c0_i32 = arith.constant 0 : i32
    %c0_i32_0 = arith.constant 0 : i32
    %c0_i32_1 = arith.constant 0 : i32
    %c0_i32_2 = arith.constant 0 : i32
    %c0_i32_3 = arith.constant 0 : i32
    return %c0_i32, %c0_i32_0, %c0_i32_1, %c0_i32_2 : i32, i32, i32, i32
  }
  func.func @transform_3(%arg0: i32) -> (i32, i32, i32) {
    %c0_i32 = arith.constant 0 : i32
    %c0_i32_0 = arith.constant 0 : i32
    %c0_i32_1 = arith.constant 0 : i32
    %c0_i32_2 = arith.constant 0 : i32
    return %c0_i32, %c0_i32_0, %c0_i32_1 : i32, i32, i32
  }
  func.func @transform_4(%arg0: i32) -> (i32, i32) {
    %c0_i32 = arith.constant 0 : i32
    %c0_i32_0 = arith.constant 0 : i32
    %c0_i32_1 = arith.constant 0 : i32
    return %c0_i32, %c0_i32_0 : i32, i32
  }
  func.func @transform_5(%arg0: i32) -> (i32, i32) {
    %c0_i32 = arith.constant 0 : i32
    %c0_i32_0 = arith.constant 0 : i32
    %c0_i32_1 = arith.constant 0 : i32
    return %c0_i32, %c0_i32_0 : i32, i32
  }
  func.func @transform_6(%arg0: i32) -> (i32, i32) {
    %c0_i32 = arith.constant 0 : i32
    %c0_i32_0 = arith.constant 0 : i32
    %c0_i32_1 = arith.constant 0 : i32
    return %c0_i32, %c0_i32_0 : i32, i32
  }
  func.func @transform_7(%arg0: i32) -> (i32, i32) {
    %c0_i32 = arith.constant 0 : i32
    %c0_i32_0 = arith.constant 0 : i32
    %c0_i32_1 = arith.constant 0 : i32
    return %c0_i32, %c0_i32_0 : i32, i32
  }
  func.func @transform_8(%arg0: i32) -> (i32, i32) {
    %c0_i32 = arith.constant 0 : i32
    %c0_i32_0 = arith.constant 0 : i32
    %c0_i32_1 = arith.constant 0 : i32
    return %c0_i32, %c0_i32_0 : i32, i32
  }
  func.func @transform_9(%arg0: i32) -> (i32, i32) {
    %c0_i32 = arith.constant 0 : i32
    %c0_i32_0 = arith.constant 0 : i32
    %c0_i32_1 = arith.constant 0 : i32
    return %c0_i32, %c0_i32_0 : i32, i32
  }
  func.func @transform_10(%arg0: i32) -> (i32, i32) {
    %c0_i32 = arith.constant 0 : i32
    %c0_i32_0 = arith.constant 0 : i32
    %c0_i32_1 = arith.constant 0 : i32
    return %c0_i32, %c0_i32_0 : i32, i32
  }
  func.func @transform_11(%arg0: i32) -> (i32, i32) {
    %c0_i32 = arith.constant 0 : i32
    %c0_i32_0 = arith.constant 0 : i32
    %c0_i32_1 = arith.constant 0 : i32
    return %c0_i32, %c0_i32_0 : i32, i32
  }
  func.func @transform_12(%arg0: i32) -> (i32, i32) {
    %c0_i32 = arith.constant 0 : i32
    %c0_i32_0 = arith.constant 0 : i32
    %c0_i32_1 = arith.constant 0 : i32
    return %c0_i32, %c0_i32_0 : i32, i32
  }
  func.func @transform_13(%arg0: i32) -> (i32, i32, i32) {
    %c0_i32 = arith.constant 0 : i32
    %c0_i32_0 = arith.constant 0 : i32
    %c0_i32_1 = arith.constant 0 : i32
    return %arg0, %c0_i32, %c0_i32_0 : i32, i32, i32
  }
}

module attributes {stable_mosaic.version = 11 : i64} {
  func.func @_head_kernel(%arg0: i32, %arg1: memref<8x64xbf16, #tpu.memory_space<vmem>>, %arg2: memref<1x64xf32, #tpu.memory_space<vmem>>, %arg3: memref<1x64xf32, #tpu.memory_space<vmem>>, %arg4: memref<1x64xf32, #tpu.memory_space<vmem>>, %arg5: memref<1x64xf32, #tpu.memory_space<vmem>>, %arg6: memref<64x16xbf16, #tpu.memory_space<vmem>>, %arg7: memref<1x16xf32, #tpu.memory_space<vmem>>, %arg8: memref<8x16xf32, #tpu.memory_space<vmem>>) attributes {dimension_semantics = [#tpu.dimension_semantics<arbitrary>], iteration_bounds = array<i64: 1>, scalar_prefetch = 0 : i64, scratch_operands = 0 : i64, tpu.core_type = #tpu.core_type<tc>, window_params = [{transform_indices = @transform_0, window_bounds = array<i64: 8, 64>}, {pipeline_mode = #tpu.pipeline_mode<synchronous>, transform_indices = @transform_1, window_bounds = array<i64: 1, 64>}, {pipeline_mode = #tpu.pipeline_mode<synchronous>, transform_indices = @transform_2, window_bounds = array<i64: 1, 64>}, {pipeline_mode = #tpu.pipeline_mode<synchronous>, transform_indices = @transform_3, window_bounds = array<i64: 1, 64>}, {pipeline_mode = #tpu.pipeline_mode<synchronous>, transform_indices = @transform_4, window_bounds = array<i64: 1, 64>}, {pipeline_mode = #tpu.pipeline_mode<synchronous>, transform_indices = @transform_5, window_bounds = array<i64: 64, 16>}, {pipeline_mode = #tpu.pipeline_mode<synchronous>, transform_indices = @transform_6, window_bounds = array<i64: 1, 16>}, {transform_indices = @transform_7, window_bounds = array<i64: 8, 16>}]} {
    %c0 = arith.constant 0 : index
    %c0_0 = arith.constant 0 : index
    %0 = vector.load %arg1[%c0, %c0_0] : memref<8x64xbf16, #tpu.memory_space<vmem>>, vector<8x64xbf16>
    %1 = arith.extf %0 : vector<8x64xbf16> to vector<8x64xf32>
    %c0_1 = arith.constant 0 : index
    %c0_2 = arith.constant 0 : index
    %2 = vector.load %arg2[%c0_1, %c0_2] : memref<1x64xf32, #tpu.memory_space<vmem>>, vector<1x64xf32>
    %c0_3 = arith.constant 0 : index
    %c0_4 = arith.constant 0 : index
    %3 = vector.load %arg3[%c0_3, %c0_4] : memref<1x64xf32, #tpu.memory_space<vmem>>, vector<1x64xf32>
    %cst = arith.constant dense<0.000000e+00> : vector<8xf32>
    %4 = vector.multi_reduction <add>, %1, %cst [1] : vector<8x64xf32> to vector<8xf32>
    %5 = vector.shape_cast %4 : vector<8xf32> to vector<8x1xf32>
    %cst_5 = arith.constant 6.400000e+01 : f32
    %6 = vector.broadcast %cst_5 : f32 to vector<8x1xf32>
    %7 = arith.divf %5, %6 : vector<8x1xf32>
    %8 = vector.broadcast %7 : vector<8x1xf32> to vector<8x64xf32>
    %9 = arith.subf %1, %8 : vector<8x64xf32>
    %10 = arith.mulf %9, %9 : vector<8x64xf32>
    %cst_6 = arith.constant dense<0.000000e+00> : vector<8xf32>
    %11 = vector.multi_reduction <add>, %10, %cst_6 [1] : vector<8x64xf32> to vector<8xf32>
    %12 = vector.shape_cast %11 : vector<8xf32> to vector<8x1xf32>
    %cst_7 = arith.constant 6.400000e+01 : f32
    %13 = vector.broadcast %cst_7 : f32 to vector<8x1xf32>
    %14 = arith.divf %12, %13 : vector<8x1xf32>
    %15 = vector.broadcast %7 : vector<8x1xf32> to vector<8x64xf32>
    %16 = arith.subf %1, %15 : vector<8x64xf32>
    %cst_8 = arith.constant 9.99999974E-6 : f32
    %17 = vector.broadcast %cst_8 : f32 to vector<8x1xf32>
    %18 = arith.addf %14, %17 : vector<8x1xf32>
    %19 = math.rsqrt %18 : vector<8x1xf32>
    %20 = vector.broadcast %19 : vector<8x1xf32> to vector<8x64xf32>
    %21 = arith.mulf %16, %20 : vector<8x64xf32>
    %22 = vector.broadcast %2 : vector<1x64xf32> to vector<8x64xf32>
    %23 = arith.mulf %21, %22 : vector<8x64xf32>
    %24 = vector.broadcast %3 : vector<1x64xf32> to vector<8x64xf32>
    %25 = arith.addf %23, %24 : vector<8x64xf32>
    %c0_9 = arith.constant 0 : index
    %c0_10 = arith.constant 0 : index
    %26 = vector.load %arg4[%c0_9, %c0_10] : memref<1x64xf32, #tpu.memory_space<vmem>>, vector<1x64xf32>
    %c0_11 = arith.constant 0 : index
    %c0_12 = arith.constant 0 : index
    %27 = vector.load %arg5[%c0_11, %c0_12] : memref<1x64xf32, #tpu.memory_space<vmem>>, vector<1x64xf32>
    %cst_13 = arith.constant dense<0.000000e+00> : vector<8xf32>
    %28 = vector.multi_reduction <add>, %25, %cst_13 [1] : vector<8x64xf32> to vector<8xf32>
    %29 = vector.shape_cast %28 : vector<8xf32> to vector<8x1xf32>
    %cst_14 = arith.constant 6.400000e+01 : f32
    %30 = vector.broadcast %cst_14 : f32 to vector<8x1xf32>
    %31 = arith.divf %29, %30 : vector<8x1xf32>
    %32 = vector.broadcast %31 : vector<8x1xf32> to vector<8x64xf32>
    %33 = arith.subf %25, %32 : vector<8x64xf32>
    %34 = arith.mulf %33, %33 : vector<8x64xf32>
    %cst_15 = arith.constant dense<0.000000e+00> : vector<8xf32>
    %35 = vector.multi_reduction <add>, %34, %cst_15 [1] : vector<8x64xf32> to vector<8xf32>
    %36 = vector.shape_cast %35 : vector<8xf32> to vector<8x1xf32>
    %cst_16 = arith.constant 6.400000e+01 : f32
    %37 = vector.broadcast %cst_16 : f32 to vector<8x1xf32>
    %38 = arith.divf %36, %37 : vector<8x1xf32>
    %39 = vector.broadcast %31 : vector<8x1xf32> to vector<8x64xf32>
    %40 = arith.subf %25, %39 : vector<8x64xf32>
    %cst_17 = arith.constant 9.99999974E-6 : f32
    %41 = vector.broadcast %cst_17 : f32 to vector<8x1xf32>
    %42 = arith.addf %38, %41 : vector<8x1xf32>
    %43 = math.rsqrt %42 : vector<8x1xf32>
    %44 = vector.broadcast %43 : vector<8x1xf32> to vector<8x64xf32>
    %45 = arith.mulf %40, %44 : vector<8x64xf32>
    %46 = vector.broadcast %26 : vector<1x64xf32> to vector<8x64xf32>
    %47 = arith.mulf %45, %46 : vector<8x64xf32>
    %48 = vector.broadcast %27 : vector<1x64xf32> to vector<8x64xf32>
    %49 = arith.addf %47, %48 : vector<8x64xf32>
    %50 = arith.truncf %49 : vector<8x64xf32> to vector<8x64xbf16>
    %c0_18 = arith.constant 0 : index
    %c0_19 = arith.constant 0 : index
    %51 = vector.load %arg6[%c0_18, %c0_19] : memref<64x16xbf16, #tpu.memory_space<vmem>>, vector<64x16xbf16>
    %cst_20 = arith.constant dense<0.000000e+00> : vector<8x16xf32>
    %52 = tpu.matmul %50, %51, %cst_20 {dimension_numbers = #tpu.dot_dimension_numbers<[1], [0], [0], [1], [0, 0, 1, 1], [], []>} : vector<8x64xbf16>, vector<64x16xbf16>, vector<8x16xf32> -> vector<8x16xf32>
    %c0_21 = arith.constant 0 : index
    %c0_22 = arith.constant 0 : index
    %53 = vector.load %arg7[%c0_21, %c0_22] : memref<1x16xf32, #tpu.memory_space<vmem>>, vector<1x16xf32>
    %54 = vector.broadcast %53 : vector<1x16xf32> to vector<8x16xf32>
    %55 = arith.addf %52, %54 : vector<8x16xf32>
    %56 = arith.negf %55 : vector<8x16xf32>
    %57 = math.exp %56 : vector<8x16xf32>
    %cst_23 = arith.constant 1.000000e+00 : f32
    %58 = vector.broadcast %cst_23 : f32 to vector<8x16xf32>
    %59 = arith.addf %58, %57 : vector<8x16xf32>
    %60 = arith.divf %58, %59 : vector<8x16xf32>
    %c0_24 = arith.constant 0 : index
    %c0_25 = arith.constant 0 : index
    %61 = vector.load %arg8[%c0_24, %c0_25] : memref<8x16xf32, #tpu.memory_space<vmem>>, vector<8x16xf32>
    tpu.vector_store %arg8[%c0_24, %c0_25], %60 {strides = array<i32>} : memref<8x16xf32, #tpu.memory_space<vmem>>, vector<8x16xf32>,
    return
  }
  func.func @transform_0(%arg0: i32) -> (i32, i32) {
    %c0_i32 = arith.constant 0 : i32
    %c0_i32_0 = arith.constant 0 : i32
    return %arg0, %c0_i32 : i32, i32
  }
  func.func @transform_1(%arg0: i32) -> (i32, i32) {
    %c0_i32 = arith.constant 0 : i32
    %c0_i32_0 = arith.constant 0 : i32
    %c0_i32_1 = arith.constant 0 : i32
    return %c0_i32, %c0_i32_0 : i32, i32
  }
  func.func @transform_2(%arg0: i32) -> (i32, i32) {
    %c0_i32 = arith.constant 0 : i32
    %c0_i32_0 = arith.constant 0 : i32
    %c0_i32_1 = arith.constant 0 : i32
    return %c0_i32, %c0_i32_0 : i32, i32
  }
  func.func @transform_3(%arg0: i32) -> (i32, i32) {
    %c0_i32 = arith.constant 0 : i32
    %c0_i32_0 = arith.constant 0 : i32
    %c0_i32_1 = arith.constant 0 : i32
    return %c0_i32, %c0_i32_0 : i32, i32
  }
  func.func @transform_4(%arg0: i32) -> (i32, i32) {
    %c0_i32 = arith.constant 0 : i32
    %c0_i32_0 = arith.constant 0 : i32
    %c0_i32_1 = arith.constant 0 : i32
    return %c0_i32, %c0_i32_0 : i32, i32
  }
  func.func @transform_5(%arg0: i32) -> (i32, i32) {
    %c0_i32 = arith.constant 0 : i32
    %c0_i32_0 = arith.constant 0 : i32
    %c0_i32_1 = arith.constant 0 : i32
    return %c0_i32, %c0_i32_0 : i32, i32
  }
  func.func @transform_6(%arg0: i32) -> (i32, i32) {
    %c0_i32 = arith.constant 0 : i32
    %c0_i32_0 = arith.constant 0 : i32
    %c0_i32_1 = arith.constant 0 : i32
    return %c0_i32, %c0_i32_0 : i32, i32
  }
  func.func @transform_7(%arg0: i32) -> (i32, i32) {
    %c0_i32 = arith.constant 0 : i32
    %c0_i32_0 = arith.constant 0 : i32
    return %arg0, %c0_i32 : i32, i32
  }
}

</mosaic_0001>

<bundles_post_ra>
// kernel: forward.5
= control target key start
LH: loop header
LB: loop body
LE: loop exit
PB: predicated region body
PF: predicated region fallthrough
CT: control target
= control target key end

     0   :  { %s1030_s12 = smov 0   ;;  %s1105_s0 = inlined_call_operand.vmem [shape: f32[6,16,16], index: 0, kind: input, shape index: {}]   ;;  %s1106_s1 = inlined_call_operand.vmem [shape: f32[32,16], index: 1, kind: input, shape index: {}]   ;;  %s1107_s2 = inlined_call_operand.vmem [shape: f32[16,32], index: 2, kind: input, shape index: {}]   ;;  %s1108_s3 = inlined_call_operand.vmem [shape: f32[6,32,32], index: 3, kind: output, shape index: {}]  }
   0x1 LB: > { %s825_s13 = sadd.s32 4294967295, %s1008_s12   ;;  %p829_p0 = scmp.ge.s32.totalorder %s1008_s12, 1  ;;  %s1008_s12 = sphi %s1030_s12, %s13_s12  }
   0x2   : > { %p139_p1 = scmp.lt.s32.totalorder %s1008_s12, 3 }
   0x4   : > { %p140_p2 = pnand %p829_p0, %p139_p1 }
   0x5   : > { %s165_s14 = smul.u32 (!%p140_p2), 3, %s825_s13  ;;  %v179_v0 = vld [vmem:[%s1106_s1] sm:$0xff] (!%p140_p2)  ;;  %vm187_vm0 = vcmask (!%p140_p2), 130048   ;;  %v184_v2 = vld [vmem:[%s1107_s2 + $0x8] sm:$0xff] (!%p140_p2)  ;;  %v181_v13 = vld [vmem:[%s1106_s1 + $0x10] sm:$0xff] (!%p140_p2)  ;;  %vm382_vm1 = vcmask (!%p140_p2), 261120  }
   0x6   : > { %143 = sbr.rel (%p140_p2) target bundleno = 471 (0x1d7), region = 32  ;;  %914 = vmatprep.mubr.msk.f32.mxu0 (!%p140_p2), %vm187_vm0, %v179_v0  ;;  %v183_v1 = vld [vmem:[%s1107_s2] sm:$0xff] (!%p140_p2)  ;;  %v180_v12 = vld [vmem:[%s1106_s1 + $0x8] sm:$0xff] (!%p140_p2)  ;;  %v182_v15 = vld [vmem:[%s1106_s1 + $0x18] sm:$0xff] (!%p140_p2) }
   0x7   : > { %p166_p3 = scmp.lt.s32.totalorder (!%p140_p2), %s165_s14, 5  ;;  %v974_v3 = vpack.c.bf16 (!%p140_p2), %v184_v2, %v183_v1 }
   0x9   : > { %975 = vmatprep.subr.bf16.mxu1 (!%p140_p2), %v974_v3 }
   0xa   : > { %977 = vmatpush3.bf16.msra.mxu1 (!%p140_p2), %v974_v3 }
   0xb   : > { %983 = vmatprep.subr.bf16.mxu1 (!%p140_p2), %v974_v3 }
   0xd   : > { %s1110_s14 = smov (!%p166_p3, %s165_s14), 5 }
   0xe   : > { %s872_s21 = sshll.u32 %s1110_s14, 4  ;;  %s873_s4 = sshll.u32 %s1110_s14, 5 }
   0xf   : > { %s170_s24 = scalar_lea.vmem %s1105_s0, %s872_s21  ;;  %s177_s7 = scalar_lea.vmem %s1108_s3, %s873_s4 }
  0x10   : > { %v185_v4 = vld [vmem:[%s170_s24] sm:$0xff]  ;;  %v186_v5 = vld [vmem:[%s170_s24 + $0x8] sm:$0xff]  ;;  %v842_v6 = vld [vmem:[%s170_s24 + $0x10] sm:$0xff] }
  0x11   : > { %v970_v7 = vpack.c.bf16 %v186_v5, %v185_v4  ;;  %v843_v8 = vld [vmem:[%s170_s24 + $0x18] sm:$0xff]  ;;  %v856_v10 = vld [vmem:[%s170_s24 + $0x20] sm:$0xff]  ;;  %v857_v11 = vld [vmem:[%s170_s24 + $0x28] sm:$0xff] }
  0x12   : > { %v978_v9 = vpack.c.bf16 %v843_v8, %v842_v6  ;;  %v986_v14 = vpack.c.bf16 %v857_v11, %v856_v10 }
  0x13   : > { %971 = vmatprep.subr.bf16.mxu0 %v970_v7 }
  0x14   : > { %973 = vmatpush3.bf16.msra.mxu0 %v970_v7 }
  0x15   : > { %979 = vmatprep.subr.bf16.mxu0 %v978_v9 }
  0x17   : > { %915 = vmatmul.mubr.msk.f32.vlgmr.msra.gmra.mrb[0].mxu0 %vm187_vm0, %v180_v12 }
  0x18   : > { %981 = vmatpush3.bf16.msra.mxu0 %v978_v9  ;;  %917 = vmatprep.mubr.msk.f32.mxu0 %vm187_vm0, %v181_v13 }
  0x19   : > { %987 = vmatprep.subr.bf16.mxu0 %v986_v14 }
  0x1b   : > { %918 = vmatmul.mubr.msk.f32.gmra.mrb[2].mxu0 %vm187_vm0, %v182_v15 }
  0x1c   : > { %934 = vmatprep.mubr.msk.f32.mxu0 %vm187_vm0, %v179_v0 }
  0x1f   : > { %935 = vmatmul.mubr.msk.f32.vlgmr.msra.gmra.mrb[4].mxu0 %vm187_vm0, %v180_v12 }
  0x20   : > { %989 = vmatpush3.bf16.msra.mxu0 %v986_v14  ;;  %937 = vmatprep.mubr.msk.f32.mxu0 %vm187_vm0, %v181_v13 }
  0x23   : > { %938 = vmatmul.mubr.msk.f32.gmra.mrb[6].mxu0 %vm187_vm0, %v182_v15 }
  0x24   : > { %954 = vmatprep.mubr.msk.f32.mxu0 %vm187_vm0, %v179_v0 }
  0x27   : > { %955 = vmatmul.mubr.msk.f32.vlgmr.msra.gmra.mrb[8].mxu0 %vm187_vm0, %v180_v12 }
  0x28   : > { %957 = vmatprep.mubr.msk.f32.mxu0 %vm187_vm0, %v181_v13 }
  0x2b   : > { %958 = vmatmul.mubr.msk.f32.gmra.mrb[10].mxu0 %vm187_vm0, %v182_v15 }
  0xea   : > { %v916_v16 = vpop.f32.mrb[0].mxu0 }
  0xeb   : > { %v266_v17 = vpop.f32.mrb[1].mxu0 }
  0xec   : > { %924 = vmatprep.mubr.msk.f32.mxu1 %vm187_vm0, %v266_v17 }
  0xed   : > { %925 = vmatmul.mubr.msk.f32.vlgmr.msra.gmra.mrb[0].mxu1 %vm187_vm0, %v916_v16 }
  0xee   : > { %v919_v18 = vpop.f32.mrb[2].mxu0  ;;  %985 = vmatpush3.bf16.msra.mxu1 %v974_v3 }
  0xef   : > { %v276_v19 = vpop.f32.mrb[3].mxu0  ;;  %991 = vmatprep.subr.bf16.mxu1 %v974_v3 }
  0xf0   : > { %927 = vmatprep.mubr.msk.f32.mxu1 %vm187_vm0, %v276_v19 }
  0xf1   : > { %928 = vmatmul.mubr.msk.f32.gmra.mrb[2].mxu1 %vm187_vm0, %v919_v18 }
  0xf2   : > { %v936_v20 = vpop.f32.mrb[4].mxu0 }
  0xf3   : > { %v456_v21 = vpop.f32.mrb[5].mxu0 }
  0xf4   : > { %944 = vmatprep.mubr.msk.f32.mxu1 %vm187_vm0, %v456_v21 }
  0xf5   : > { %945 = vmatmul.mubr.msk.f32.vlgmr.msra.gmra.mrb[4].mxu1 %vm187_vm0, %v936_v20 }
  0xf6   : > { %v939_v22 = vpop.f32.mrb[6].mxu0  ;;  %993 = vmatpush3.bf16.msra.mxu1 %v974_v3 }
  0xf7   : > { %v466_v23 = vpop.f32.mrb[7].mxu0 }
  0xf8   : > { %947 = vmatprep.mubr.msk.f32.mxu1 %vm187_vm0, %v466_v23 }
  0xf9   : > { %948 = vmatmul.mubr.msk.f32.gmra.mrb[6].mxu1 %vm187_vm0, %v939_v22 }
  0xfa   : > { %v956_v24 = vpop.f32.mrb[8].mxu0 }
  0xfb   : > { %v646_v25 = vpop.f32.mrb[9].mxu0 }
  0xfc   : > { %964 = vmatprep.mubr.msk.f32.mxu1 %vm187_vm0, %v646_v25 }
  0xfd   : > { %965 = vmatmul.mubr.msk.f32.vlgmr.msra.gmra.mrb[8].mxu1 %vm187_vm0, %v956_v24 }
  0xfe   : > { %v959_v26 = vpop.f32.mrb[10].mxu0 }
  0xff   : > { %v656_v27 = vpop.f32.mrb[11].mxu0 }
 0x100   : > { %967 = vmatprep.mubr.msk.f32.mxu1 %vm187_vm0, %v656_v27 }
 0x101   : > { %968 = vmatmul.mubr.msk.f32.gmra.mrb[10].mxu1 %vm187_vm0, %v959_v26 }
 0x1c0   : > { %v926_v28 = vpop.f32.mrb[0].mxu1 }
 0x1c1   : > { %384 = vst.msk [vmem:[%s177_s7 + $0x8] sm:$0xff] %vm382_vm1, %v926_v28  ;;  %v363_v29 = vpop.f32.mrb[1].mxu1 }
 0x1c2   : > { %383 = vst.msk [vmem:[%s177_s7] sm:$0xff] %vm382_vm1, %v363_v29 }
 0x1c4   : > { %v929_v30 = vpop.f32.mrb[2].mxu1 }
 0x1c5   : > { %386 = vst.msk [vmem:[%s177_s7 + $0x18] sm:$0xff] %vm382_vm1, %v929_v30  ;;  %v373_v31 = vpop.f32.mrb[3].mxu1 }
 0x1c6   : > { %385 = vst.msk [vmem:[%s177_s7 + $0x10] sm:$0xff] %vm382_vm1, %v373_v31 }
 0x1c8   : > { %v946_v32 = vpop.f32.mrb[4].mxu1 }
 0x1c9   : > { %853 = vst.msk [vmem:[%s177_s7 + $0x28] sm:$0xff] %vm382_vm1, %v946_v32  ;;  %v553_v33 = vpop.f32.mrb[5].mxu1 }
 0x1ca   : > { %852 = vst.msk [vmem:[%s177_s7 + $0x20] sm:$0xff] %vm382_vm1, %v553_v33 }
 0x1cc   : > { %v949_v34 = vpop.f32.mrb[6].mxu1 }
 0x1cd   : > { %855 = vst.msk [vmem:[%s177_s7 + $0x38] sm:$0xff] %vm382_vm1, %v949_v34  ;;  %v563_v35 = vpop.f32.mrb[7].mxu1 }
 0x1ce   : > { %854 = vst.msk [vmem:[%s177_s7 + $0x30] sm:$0xff] %vm382_vm1, %v563_v35 }
 0x1d0   : > { %v966_v36 = vpop.f32.mrb[8].mxu1 }
 0x1d1   : > { %867 = vst.msk [vmem:[%s177_s7 + $0x48] sm:$0xff] %vm382_vm1, %v966_v36  ;;  %v743_v37 = vpop.f32.mrb[9].mxu1 }
 0x1d2   : > { %866 = vst.msk [vmem:[%s177_s7 + $0x40] sm:$0xff] %vm382_vm1, %v743_v37 }
 0x1d4   : > { %v969_v38 = vpop.f32.mrb[10].mxu1 }
 0x1d5   : > { %869 = vst.msk [vmem:[%s177_s7 + $0x58] sm:$0xff] %vm382_vm1, %v969_v38  ;;  %v753_v39 = vpop.f32.mrb[11].mxu1 }
 0x1d6   : > { %868 = vst.msk [vmem:[%s177_s7 + $0x50] sm:$0xff] %vm382_vm1, %v753_v39 }
 0x1d7 PF: > { %s13_s12 = sadd.s32 1, %s1008_s12  }
 0x1d8   : > { %p10_p4 = scmp.ge.s32.totalorder %s13_s12, 4  }
 0x1da   :  { %12 = sbr.rel (!%p10_p4) target bundleno = 1 (0x1), region = 66 }

// kernel: forward.6
= control target key start
LH: loop header
LB: loop body
LE: loop exit
PB: predicated region body
PF: predicated region fallthrough
CT: control target
= control target key end

     0   :  { %s621_s12 = smov 0   ;;  %s623_s13 = smov 0   ;;  %s697_s0 = inlined_call_operand.vmem [shape: bf16[32,192], index: 0, kind: input, shape index: {}]   ;;  %s698_s1 = inlined_call_operand.vmem [shape: bf16[192,64], index: 1, kind: input, shape index: {}]   ;;  %s699_s2 = inlined_call_operand.vmem [shape: f32[1,64], index: 2, kind: input, shape index: {}]   ;;  %s700_s3 = inlined_call_operand.vmem [shape: bf16[32,64], index: 3, kind: output, shape index: {}]  }
   0x1   :  { %s625_s14 = smov 0  }
   0x2 LB: > { %s25_s15 = sadd.s32 1, %s594_s13  ;;  %p507_p0 = scmp.ge.s32.totalorder %s598_s14, 1  ;;  %s598_s14 = sphi %s625_s14, %s13_s14   ;;  %s594_s13 = sphi %s623_s13, %s702_s13   ;;  %s590_s12 = sphi %s621_s12, %s701_s12  }
   0x3   : > { %p27_p1 = scmp.ge.s32.totalorder %s25_s15, 2  ;;  %p170_p2 = scmp.lt.s32.totalorder %s598_s14, 3 }
   0x5   : > { %s704_s15 = smov (%p27_p1, %s25_s15), 0  ;;  %p171_p3 = pnand %p507_p0, %p170_p2 }
   0x6   : > { %v561_v0 = vld [vmem:[%s698_s1] sm:$0xff] (!%p171_p3)   ;;  %v600_v1 = vmov (!%p171_p3), 0   ;;  %s508_s18 = sshll.u32 (!%p171_p3), %s590_s12, 1  ;;  %v562_v2 = vld [vmem:[%s698_s1 + $0x8] sm:$0xff] (!%p171_p3)   ;;  %v563_v3 = vld [vmem:[%s698_s1 + $0x10] sm:$0xff] (!%p171_p3)   ;;  %vm343_vm0 = vcmask (!%p171_p3), 523264  }
   0x7   : > { %174 = sbr.rel (%p171_p3) target bundleno = 274 (0x112), region = 32  ;;  %347 = vmatprep.subr.bf16.mxu0 (!%p171_p3), %v600_v1  ;;  %p206_p4 = scmp.lt.s32.totalorder (!%p171_p3), %s508_s18, 3  ;;  %v564_v4 = vld [vmem:[%s698_s1 + $0x18] sm:$0xff] (!%p171_p3)   ;;  %v565_v6 = vld [vmem:[%s698_s1 + $0x20] sm:$0xff] (!%p171_p3)   ;;  %v566_v7 = vld [vmem:[%s698_s1 + $0x28] sm:$0xff] (!%p171_p3)   ;;  %vm396_vm1 = vcmask (!%p171_p3), 519168  }
   0x8   : > { %348 = vmatpush1.bf16.msra.mxu0 (!%p171_p3), %v561_v0  ;;  %v567_v8 = vld [vmem:[%s698_s1 + $0x30] sm:$0xff] (!%p171_p3)   ;;  %v568_v9 = vld [vmem:[%s698_s1 + $0x38] sm:$0xff] (!%p171_p3)   ;;  %v569_v10 = vld [vmem:[%s698_s1 + $0x40] sm:$0xff] (!%p171_p3)  }
   0x9   : > { %349 = vmatprep.subr.bf16.mxu0 (!%p171_p3), %v600_v1  ;;  %v570_v11 = vld [vmem:[%s698_s1 + $0x48] sm:$0xff] (!%p171_p3)   ;;  %v571_v12 = vld [vmem:[%s698_s1 + $0x50] sm:$0xff] (!%p171_p3)   ;;  %v572_v13 = vld [vmem:[%s698_s1 + $0x58] sm:$0xff] (!%p171_p3)  }
   0xa   : > { %v513_v15 = vld [vmem:[%s699_s2] ss:$0 sm:$0xff] (!%p171_p3) }
   0xc   : > { %350 = vmatpush1.bf16.msra.mxu0 (!%p171_p3), %v562_v2 }
   0xd   : > { %351 = vmatprep.subr.bf16.mxu0 (!%p171_p3), %v600_v1 }
   0xe   : > { %s706_s18 = smov (!%p206_p4, %s508_s18), 3 }
   0xf   : > { %s533_s23 = sshll.u32 %s706_s18, 3  ;;  %s512_s24 = sshll.u32 %s706_s18, 2 }
  0x10   : > { %352 = vmatpush1.bf16.msra.mxu0 %v563_v3  ;;  %s210_s28 = scalar_lea.vmem %s697_s0, %s533_s23  ;;  %s226_s27 = scalar_lea.vmem %s700_s3, %s512_s24 }
  0x11   : > { %353 = vmatprep.subr.bf16.mxu0 %v600_v1  ;;  %v575_v5 = vld [vmem:[%s210_s28 + $0x4] ss:$8 sps:$4 sm:$0xff]   ;;  %v573_v14 = vld [vmem:[%s210_s28] ss:$8 sps:$4 sm:$0xff]  }
  0x12   : > { %528 = vmatprep.mubr.msk.bf16.mxu0 %vm343_vm0, %v575_v5 }
  0x14   : > { %354 = vmatpush1.bf16.msra.mxu0 %v564_v4 }
  0x15   : > { %355 = vmatprep.subr.bf16.mxu0 %v600_v1 }
  0x18   : > { %356 = vmatpush1.bf16.msra.mxu0 %v565_v6 }
  0x19   : > { %357 = vmatprep.subr.bf16.mxu0 %v600_v1 }
  0x1c   : > { %358 = vmatpush1.bf16.msra.mxu0 %v566_v7 }
  0x1d   : > { %359 = vmatprep.subr.bf16.mxu0 %v600_v1 }
  0x20   : > { %360 = vmatpush1.bf16.msra.mxu0 %v567_v8 }
  0x21   : > { %361 = vmatprep.subr.bf16.mxu0 %v600_v1 }
  0x24   : > { %362 = vmatpush1.bf16.msra.mxu0 %v568_v9 }
  0x25   : > { %363 = vmatprep.subr.bf16.mxu0 %v600_v1 }
  0x28   : > { %364 = vmatpush1.bf16.msra.mxu0 %v569_v10 }
  0x29   : > { %365 = vmatprep.subr.bf16.mxu0 %v600_v1 }
  0x2c   : > { %366 = vmatpush1.bf16.msra.mxu0 %v570_v11 }
  0x2d   : > { %367 = vmatprep.subr.bf16.mxu0 %v600_v1 }
  0x30   : > { %368 = vmatpush1.bf16.msra.mxu0 %v571_v12 }
  0x31   : > { %369 = vmatprep.subr.bf16.mxu0 %v600_v1 }
  0x34   : > { %370 = vmatpush1.bf16.msra.mxu0 %v572_v13 }
  0x37   : > { %380 = vmatmul.mubr.bf16.vlgmr.msra.gmra.mrb[0].mxu0 %v573_v14 }
 0x10a   : > { %v381_v16 = vpop.f32.mrb[0].mxu0 }
 0x10b   : > { %v382_v17 = vadd.f32 %v513_v15, %v381_v16  ;;  %v383_v18 = vpop.f32.mrb[1].mxu0 }
 0x10c   : > { %v384_v19 = vpop.f32.mrb[2].mxu0 }
 0x10d   : > { %v534_v20 = vpack.c.bf16 %v382_v17, %v382_v17  ;;  %v385_v21 = vadd.f32 %v513_v15, %v384_v19  ;;  %v386_v22 = vpop.f32.mrb[3].mxu0 }
 0x10f   : > { %397 = vst.msk [vmem:[%s226_s27] sm:$0xf] %vm396_vm1, %v534_v20  ;;  %v535_v23 = vpack.c.bf16 %v385_v21, %v385_v21 }
 0x111   : > { %398 = vst.msk [vmem:[%s226_s27 + $0x4] sm:$0xf] %vm396_vm1, %v535_v23 }
 0x112 PF: > { %s13_s14 = sadd.s32 1, %s598_s14   ;;  %s701_s12 = smov %s594_s13 }
 0x113   : > { %p10_p5 = scmp.ge.s32.totalorder %s13_s14, 4   ;;  %s702_s13 = smov %s704_s15 }
 0x115   :  { %12 = sbr.rel (!%p10_p5) target bundleno = 2 (0x2), region = 68 }

// kernel: forward.9
= control target key start
LH: loop header
LB: loop body
LE: loop exit
PB: predicated region body
PF: predicated region fallthrough
CT: control target
= control target key end

     0   :  { %vm31_vm0 = vcmask 523264   ;;  %v226_v24 = vmov 0.0   ;;  %vm227_vm1 = vmmov 0   ;;  %vm178_vm2 = vcmask 130048   ;;  %s306_s0 = inlined_call_operand.vmem [shape: bf16[8,64], index: 0, kind: input, shape index: {}]   ;;  %s307_s1 = inlined_call_operand.vmem [shape: f32[1,64], index: 1, kind: input, shape index: {}]   ;;  %s308_s2 = inlined_call_operand.vmem [shape: f32[1,64], index: 2, kind: input, shape index: {}]   ;;  %s309_s5 = inlined_call_operand.vmem [shape: bf16[64,16], index: 5, kind: input, shape index: {}]   ;;  %s310_s3 = inlined_call_operand.vmem [shape: f32[1,64], index: 3, kind: input, shape index: {}]   ;;  %s311_s4 = inlined_call_operand.vmem [shape: f32[1,64], index: 4, kind: input, shape index: {}]   ;;  %s312_s6 = inlined_call_operand.vmem [shape: f32[1,16], index: 6, kind: input, shape index: {}]   ;;  %s313_s7 = inlined_call_operand.vmem [shape: f32[8,16], index: 7, kind: output, shape index: {}]  }
   0x1   :  { %v27_v0 = vld [vmem:[%s306_s0] sm:$0xf]  ;;  %200 = vmatprep.subr.bf16.mxu0 %v226_v24  ;;  %v215_v25 = vld [vmem:[%s309_s5 + $0x8] sm:$0xff]   ;;  %v216_v26 = vld [vmem:[%s309_s5 + $0x10] sm:$0xff]   ;;  %208 = vmatprep.mubr.msk.bf16.mxu0 %vm227_vm1, %v226_v24 }
   0x2   :  { %v28_v1 = vunpack.c.l.bf16 %v27_v0  ;;  %v184_v12 = vld [vmem:[%s307_s1] ss:$0 sm:$0xff]  ;;  %v217_v27 = vld [vmem:[%s309_s5 + $0x18] sm:$0xff]  }
   0x3   :  { %v185_v14 = vld [vmem:[%s308_s2] ss:$0 sm:$0xff] }
   0x4   :  { %v32_v2 = vsel %vm31_vm0, %v28_v1, 0.0  ;;  %v214_v23 = vld [vmem:[%s309_s5] sm:$0xff]  }
   0x5   :  { %33 = vadd.xlane.f32.xlu0 %v32_v2  ;;  %201 = vmatpush3.bf16.msra.mxu0 %v214_v23  ;;  %v186_v32 = vld [vmem:[%s310_s3] ss:$0 sm:$0xff] }
   0x6   :  { %202 = vmatprep.subr.bf16.mxu0 %v226_v24  ;;  %v187_v34 = vld [vmem:[%s311_s4] ss:$0 sm:$0xff] }
   0x7   :  { %v188_v38 = vld [vmem:[%s312_s6] ss:$0 sm:$0xff] }
   0x9   :  { %203 = vmatpush3.bf16.msra.mxu0 %v215_v25 }
   0xa   :  { %204 = vmatprep.subr.bf16.mxu0 %v226_v24 }
   0xd   :  { %205 = vmatpush3.bf16.msra.mxu0 %v216_v26 }
   0xe   :  { %206 = vmatprep.subr.bf16.mxu0 %v226_v24 }
  0x11   :  { %207 = vmatpush3.bf16.msra.mxu0 %v217_v27 }
  0x92   :  { %v34_v3 = vpop.xlane.xlu0 %33 }
  0x93   :  { %v36_v4 = vmul.f32 0.015625, %v34_v3 }
  0x95   :  { %v37_v5 = vsub.f32 %v28_v1, %v36_v4 }
  0x97   :  { %v38_v6 = vmul.f32 %v37_v5, %v37_v5 }
  0x99   :  { %v39_v7 = vsel %vm31_vm0, %v38_v6, 0.0 }
  0x9a   :  { %40 = vadd.xlane.f32.xlu0 %v39_v7 }
 0x127   :  { %v41_v8 = vpop.xlane.xlu0 %40 }
 0x128   :  { %v42_v9 = vmul.f32 0.015625, %v41_v8 }
 0x12a   :  { %v43_v10 = vadd.f32 1e-05, %v42_v9 }
 0x12c   :  { %218 = vrsqrt.f32 %v43_v10 }
 0x136   :  { %v219_v11 = vpop.eup %218 }
 0x137   :  { %v45_v13 = vmul.f32 %v219_v11, %v37_v5 }
 0x139   :  { %v52_v15 = vmul.f32 %v184_v12, %v45_v13 }
 0x13b   :  { %v59_v16 = vadd.f32 %v185_v14, %v52_v15 }
 0x13d   :  { %v62_v17 = vsel %vm31_vm0, %v59_v16, 0.0 }
 0x13e   :  { %63 = vadd.xlane.f32.xlu1 %v62_v17 }
 0x1cb   :  { %v64_v18 = vpop.xlane.xlu1 %63 }
 0x1cc   :  { %v65_v19 = vmul.f32 0.015625, %v64_v18 }
 0x1ce   :  { %v66_v20 = vsub.f32 %v59_v16, %v65_v19 }
 0x1d0   :  { %v67_v21 = vmul.f32 %v66_v20, %v66_v20 }
 0x1d2   :  { %v68_v22 = vsel %vm31_vm0, %v67_v21, 0.0 }
 0x1d3   :  { %69 = vadd.xlane.f32.xlu1 %v68_v22 }
 0x260   :  { %v70_v28 = vpop.xlane.xlu1 %69 }
 0x261   :  { %v71_v29 = vmul.f32 0.015625, %v70_v28 }
 0x263   :  { %v72_v30 = vadd.f32 1e-05, %v71_v29 }
 0x265   :  { %220 = vrsqrt.f32 %v72_v30 }
 0x26f   :  { %v221_v31 = vpop.eup %220 }
 0x270   :  { %v74_v33 = vmul.f32 %v221_v31, %v66_v20 }
 0x272   :  { %v81_v35 = vmul.f32 %v186_v32, %v74_v33 }
 0x274   :  { %v88_v36 = vadd.f32 %v187_v34, %v81_v35 }
 0x276   :  { %v89_v37 = vpack.c.bf16 %v88_v36, %v88_v36 }
 0x278   :  { %209 = vmatmul.mubr.msk.bf16.vlgmr.msra.gmra.mrb[0].mxu0 %vm31_vm0, %v89_v37 }
 0x34b   :  { %v166_v39 = vpop.f32.mrb[0].mxu0 }
 0x34c   :  { %v167_v40 = vadd.f32 %v188_v38, %v166_v39  ;;  %v210_v41 = vpop.f32.mrb[1].mxu0 }
 0x34d   :  { %v169_v42 = vpop.f32.mrb[2].mxu0 }
 0x34e   :  { %v194_v43 = vmul.f32 -1.442695, %v167_v40  ;;  %v211_v44 = vpop.f32.mrb[3].mxu0 }
 0x350   :  { %222 = vpow2.f32 %v194_v43 }
 0x35a   :  { %v223_v45 = vpop.eup %222 }
 0x35b   :  { %v175_v46 = vadd.f32 1.0, %v223_v45 }
 0x35d   :  { %224 = vrcp.f32 %v175_v46 }
 0x367   :  { %v225_v47 = vpop.eup %224 }
 0x368   :  { %179 = vst.msk [vmem:[%s313_s7] sm:$0xff] %vm178_vm2, %v225_v47 }

// kernel: forward.7
= control target key start
LH: loop header
LB: loop body
LE: loop exit
PB: predicated region body
PF: predicated region fallthrough
CT: control target
= control target key end

     0   :  { %s3889_s25 = smov 0   ;;  %s4399_s0 = inlined_call_operand.vmem [shape: bf16[2,17,64], index: 0, kind: input, shape index: {}]   ;;  %s4400_s1 = inlined_call_operand.vmem [shape: bf16[3,4,64,16], index: 1, kind: input, shape index: {}]   ;;  %s4401_s2 = inlined_call_operand.vmem [shape: f32[3,4,1,16], index: 2, kind: input, shape index: {}]   ;;  %s4402_s3 = inlined_call_operand.vmem [shape: bf16[4,16,64], index: 3, kind: input, shape index: {}]   ;;  %s4403_s4 = inlined_call_operand.vmem [shape: f32[1,64], index: 4, kind: input, shape index: {}]   ;;  %s4404_s5 = inlined_call_operand.vmem [shape: f32[1,64], index: 5, kind: input, shape index: {}]   ;;  %s4405_s6 = inlined_call_operand.vmem [shape: f32[1,64], index: 6, kind: input, shape index: {}]   ;;  %s4406_s7 = inlined_call_operand.vmem [shape: bf16[64,256], index: 7, kind: input, shape index: {}]   ;;  %s4407_s8 = inlined_call_operand.vmem [shape: f32[1,256], index: 8, kind: input, shape index: {}]   ;;  %s4408_s9 = inlined_call_operand.vmem [shape: bf16[256,64], index: 9, kind: input, shape index: {}]   ;;  %s4409_s10 = inlined_call_operand.vmem [shape: f32[1,64], index: 10, kind: input, shape index: {}]   ;;  %s4410_s11 = inlined_call_operand.vmem [shape: f32[1,64], index: 11, kind: input, shape index: {}]   ;;  %s4411_s12 = inlined_call_operand.vmem [shape: f32[1,64], index: 12, kind: input, shape index: {}]   ;;  %s4412_s13 = inlined_call_operand.vmem [shape: bf16[2,17,64], index: 13, kind: output, shape index: {}]  }
   0x1 LB: > { %s2993_s26 = sadd.s32 4294967295, %s3816_s25   ;;  %p2997_p0 = scmp.ge.s32.totalorder %s3816_s25, 1  ;;  %s3816_s25 = sphi %s3889_s25, %s23_s25  }
   0x2   : > { %p387_p1 = scmp.lt.s32.totalorder %s3816_s25, 3 }
   0x4   : > { %p388_p2 = pnand %p2997_p0, %p387_p1 }
   0x5   : > { %v3653_v0 = vld [vmem:[%s4400_s1 + $0x80] sm:$0xff] (!%p388_p2)   ;;  %p431_p3 = scmp.lt.s32.totalorder (!%p388_p2), %s2993_s26, 1  ;;  %v3654_v1 = vld [vmem:[%s4400_s1 + $0x88] sm:$0xff] (!%p388_p2)   ;;  %v3655_v3 = vld [vmem:[%s4400_s1 + $0x90] sm:$0xff] (!%p388_p2)   ;;  %vm495_vm0 = vcmask (!%p388_p2), 523264   ;;  %vm732_vm1 = vcmask (!%p388_p2), 130048  }
   0x6   : > { %391 = sbr.rel (%p388_p2) target bundleno = 4484 (0x1184), region = 72  ;;  %3415 = vmatprep.subr.bf16.mxu1 (!%p388_p2), %v3653_v0  ;;  %v3656_v2 = vld [vmem:[%s4400_s1] sm:$0xff] (!%p388_p2)   ;;  %v3659_v4 = vld [vmem:[%s4400_s1 + $0x8] sm:$0xff] (!%p388_p2)   ;;  %v3661_v6 = vld [vmem:[%s4400_s1 + $0x10] sm:$0xff] (!%p388_p2)   ;;  %vm800_vm2 = vcmask (!%p388_p2), 131072   ;;  %vm793_vm3 = vcmask (!%p388_p2), 138240  }
   0x7   : > { %3416 = vmatpush3.bf16.msra.mxu1 (!%p388_p2), %v3653_v0  ;;  %3403 = vmatprep.subr.bf16.mxu0 (!%p388_p2), %v3656_v2  ;;  %v3657_v7 = vld [vmem:[%s4400_s1 + $0x98] sm:$0xff] (!%p388_p2)   ;;  %v3663_v11 = vld [vmem:[%s4400_s1 + $0x100] sm:$0xff] (!%p388_p2)   ;;  %v3664_v12 = vld [vmem:[%s4400_s1 + $0x108] sm:$0xff] (!%p388_p2)   ;;  %vm832_vm4 = vcmask (!%p388_p2), 1040384   ;;  %v3818_v51 = vmov (!%p388_p2), 0   ;;  %vm2465_vm5 = vcmask (!%p388_p2), 516096  }
   0x8   : > { %3417 = vmatprep.subr.bf16.mxu1 (!%p388_p2), %v3654_v1  ;;  %3404 = vmatpush3.bf16.msra.mxu0 (!%p388_p2), %v3656_v2  ;;  %v3662_v9 = vld [vmem:[%s4400_s1 + $0x18] sm:$0xff] (!%p388_p2)   ;;  %v3665_v13 = vld [vmem:[%s4400_s1 + $0x110] sm:$0xff] (!%p388_p2)   ;;  %v3018_v16 = vld [vmem:[%s4401_s2 + $0x4] ss:$0 sm:$0xff] (!%p388_p2)  ;;  %v3982_v52 = vsel (!%p388_p2), %vm832_vm4, 65535, %v3818_v51  ;;  %vm2929_vm6 = vcmask (!%p388_p2), 519168  }
   0x9   : > { %3405 = vmatprep.subr.bf16.mxu0 (!%p388_p2), %v3659_v4  ;;  %v3666_v14 = vld [vmem:[%s4400_s1 + $0x118] sm:$0xff] (!%p388_p2)   ;;  %v3000_v19 = vld [vmem:[%s4401_s2] ss:$0 sm:$0xff] (!%p388_p2)  ;;  %v3034_v47 = vld [vmem:[%s4401_s2 + $0x8] ss:$0 sm:$0xff] (!%p388_p2) }
   0xa   : > { %v3667_v57 = vld [vmem:[%s4400_s1 + $0xa0] sm:$0xff] (!%p388_p2)   ;;  %v3672_v59 = vld [vmem:[%s4400_s1 + $0x28] sm:$0xff] (!%p388_p2)   ;;  %v3673_v60 = vld [vmem:[%s4400_s1 + $0x30] sm:$0xff] (!%p388_p2)   ;;  %vm2933_vm7 = vsmask.f32 (!%p388_p2), 256 }
   0xb   : > { %3418 = vmatpush3.bf16.msra.mxu1 (!%p388_p2), %v3654_v1  ;;  %v3670_v58 = vld [vmem:[%s4400_s1 + $0x20] sm:$0xff] (!%p388_p2)   ;;  %v3674_v61 = vld [vmem:[%s4400_s1 + $0x38] sm:$0xff] (!%p388_p2)   ;;  %vm2934_vm8 = vmand (!%p388_p2), %vm2465_vm5, %vm2933_vm7 }
   0xc   : > { %3419 = vmatprep.subr.bf16.mxu1 (!%p388_p2), %v3655_v3  ;;  %3406 = vmatpush3.bf16.msra.mxu0 (!%p388_p2), %v3659_v4 }
   0xd   : > { %s4414_s26 = smov (!%p431_p3, %s2993_s26), 1  ;;  %3407 = vmatprep.subr.bf16.mxu0 %v3661_v6 }
   0xe   : > { %s3643_s18 = smul.u32 12, %s4414_s26 }
   0xf   : > { %3420 = vmatpush3.bf16.msra.mxu1 %v3655_v3 }
  0x10   : > { %s3920_s23 = scalar_lea.vmem %s4399_s0, %s3643_s18  ;;  %3421 = vmatprep.subr.bf16.mxu1 %v3657_v7  ;;  %3408 = vmatpush3.bf16.msra.mxu0 %v3661_v6  ;;  %s440_s17 = scalar_lea.vmem %s4412_s13, %s3643_s18 }
  0x11   : > { %v3923_v5 = vld [vmem:[%s3920_s23] sm:$0xff]   ;;  %v444_v8 = vld [vmem:[%s3920_s23 + $0x8] sm:$0x1]  ;;  %3409 = vmatprep.subr.bf16.mxu0 %v3662_v9 }
  0x12   : > { %3423 = vmatprep.mubr.msk.bf16.mxu1 %vm495_vm0, %v3923_v5  ;;  %3411 = vmatprep.mubr.msk.bf16.mxu0 %vm495_vm0, %v3923_v5  ;;  %v3939_v10 = vcombine.low %v444_v8, %v444_v8 }
  0x13   : > { %3422 = vmatpush3.bf16.msra.mxu1 %v3657_v7 }
  0x14   : > { %3410 = vmatpush3.bf16.msra.mxu0 %v3662_v9 }
  0x15   : > { %3427 = vmatprep.subr.bf16.mxu0 %v3663_v11 }
  0x16   : > { %3424 = vmatmul.mubr.msk.bf16.vlgmr.msra.gmra.mrb[0].mxu1 %vm495_vm0, %v3939_v10 }
  0x17   : > { %3412 = vmatmul.mubr.msk.bf16.vlgmr.msra.gmra.mrb[0].mxu0 %vm495_vm0, %v3939_v10 }
  0x18   : > { %3435 = vmatprep.mubr.msk.bf16.mxu0 %vm495_vm0, %v3923_v5  ;;  %3428 = vmatpush3.bf16.msra.mxu0 %v3663_v11 }
  0x19   : > { %3429 = vmatprep.subr.bf16.mxu0 %v3664_v12 }
  0x1c   : > { %3430 = vmatpush3.bf16.msra.mxu0 %v3664_v12 }
  0x1d   : > { %3431 = vmatprep.subr.bf16.mxu0 %v3665_v13 }
  0x20   : > { %3432 = vmatpush3.bf16.msra.mxu0 %v3665_v13 }
  0x21   : > { %3433 = vmatprep.subr.bf16.mxu0 %v3666_v14 }
  0x24   : > { %3434 = vmatpush3.bf16.msra.mxu0 %v3666_v14  ;;  %v3668_v14 = vld [vmem:[%s4400_s1 + $0xa8] sm:$0xff]  }
  0x27   : > { %3436 = vmatmul.mubr.msk.bf16.vlgmr.msra.gmra.mrb[4].mxu0 %vm495_vm0, %v3939_v10 }
  0xe9   : > { %v3425_v15 = vpop.f32.mrb[0].mxu1 }
  0xea   : > { %v625_v17 = vpop.f32.mrb[1].mxu1  ;;  %v3413_v21 = vpop.f32.mrb[0].mxu0  ;;  %v634_v22 = vadd.f32 %v3425_v15, %v3018_v16  ;;  %v3669_v15 = vld [vmem:[%s4400_s1 + $0xb0] sm:$0xff]  }
  0xeb   : > { %v3426_v18 = vpop.f32.mrb[2].mxu1  ;;  %v626_v23 = vadd.f32 %v3018_v16, %v625_v17  ;;  %v536_v25 = vpop.f32.mrb[1].mxu0  ;;  %v545_v35 = vadd.f32 %v3413_v21, %v3000_v19  ;;  %v3054_v17 = vld [vmem:[%s4401_s2 + $0x1] ss:$0 sm:$0xff] }
  0xec   : > { %v628_v20 = vpop.f32.mrb[3].mxu1  ;;  %v537_v26 = vadd.f32 %v3000_v19, %v536_v25  ;;  %v3414_v27 = vpop.f32.mrb[2].mxu0  ;;  %v731_v31 = vpack.c.bf16 %v634_v22, %v634_v22 }
  0xed   : > { %v629_v24 = vadd.f32 %v3018_v16, %v628_v20  ;;  %v539_v29 = vpop.f32.mrb[3].mxu0  ;;  %v729_v36 = vpack.c.bf16 %v545_v35, %v545_v35  ;;  %v3671_v16 = vld [vmem:[%s4400_s1 + $0xb8] sm:$0xff]   ;;  %v3676_v27 = vld [vmem:[%s4400_s1 + $0x128] sm:$0xff]   ;;  %v3070_v35 = vld [vmem:[%s4401_s2 + $0x5] ss:$0 sm:$0xff] }
  0xee   : > { %v540_v30 = vadd.f32 %v3000_v19, %v539_v29  ;;  %v743_v34 = vsel %vm732_vm1, %v731_v31, 0  ;;  %v3678_v29 = vld [vmem:[%s4400_s1 + $0x138] sm:$0xff]  }
  0xef   : > { %v730_v28 = vpack.c.bf16 %v629_v24, %v626_v23 }
  0xf0   : > { %v728_v33 = vpack.c.bf16 %v540_v30, %v537_v26  ;;  %v3675_v26 = vld [vmem:[%s4400_s1 + $0x120] sm:$0xff]  }
  0xf1   : > { %3635 = vmatprep.subr.msk.bf16.mxu1 %vm732_vm1, %v730_v28  ;;  %v740_v32 = vsel %vm732_vm1, %v730_v28, 0  ;;  %v3677_v28 = vld [vmem:[%s4400_s1 + $0x130] sm:$0xff]  }
  0xf2   : > { %3440 = vmatpush3.bf16.xpose.msra.mxu1 %v740_v32  ;;  %3443 = vmatprep.mubr.msk.bf16.mxu1 %vm732_vm1, %v728_v33 }
  0xf3   : > { %3636 = vmatprep.subr.msk.bf16.mxu1 %vm732_vm1, %v731_v31 }
  0xfa   : > { %3442 = vmatpush3.bf16.xpose.msra.mxu1 %v743_v34  ;;  %v3437_v44 = vpop.f32.mrb[4].mxu0 }
  0xfb   : > { %v714_v45 = vpop.f32.mrb[5].mxu0  ;;  %v723_v49 = vadd.f32 %v3437_v44, %v3034_v47  ;;  %3455 = vmatprep.subr.bf16.mxu1 %v3670_v58 }
  0xfc   : > { %v3438_v46 = vpop.f32.mrb[6].mxu0  ;;  %v715_v50 = vadd.f32 %v3034_v47, %v714_v45 }
  0xfd   : > { %v717_v48 = vpop.f32.mrb[7].mxu0  ;;  %v825_v54 = vpack.c.bf16 %v723_v49, %v723_v49 }
  0xfe   : > { %v718_v53 = vadd.f32 %v3034_v47, %v717_v48 }
  0xff   : > { %v836_v56 = vand.u32 %v3982_v52, %v825_v54 }
 0x100   : > { %v824_v55 = vpack.c.bf16 %v718_v53, %v715_v50 }
 0x101   : > { %3444 = vmatmul.mubr.msk.bf16.vlgmr.msra.gmra.mrb[4].mxu1 %vm732_vm1, %v729_v36 }
 0x102   : > { %3463 = vmatprep.mubr.msk.bf16.mxu1 %vm495_vm0, %v3923_v5  ;;  %3447 = vmatprep.subr.bf16.mxu0 %v824_v55 }
 0x103   : > { %3448 = vmatpush3.bf16.msra.mxu0 %v824_v55  ;;  %3456 = vmatpush3.bf16.msra.mxu1 %v3670_v58 }
 0x104   : > { %3449 = vmatprep.subr.bf16.mxu0 %v836_v56  ;;  %3457 = vmatprep.subr.bf16.mxu1 %v3672_v59 }
 0x107   : > { %3450 = vmatpush3.bf16.msra.mxu0 %v836_v56  ;;  %3458 = vmatpush3.bf16.msra.mxu1 %v3672_v59 }
 0x108   : > { %3467 = vmatprep.subr.bf16.mxu0 %v3667_v57  ;;  %3459 = vmatprep.subr.bf16.mxu1 %v3673_v60 }
 0x10b   : > { %3460 = vmatpush3.bf16.msra.mxu1 %v3673_v60 }
 0x10c   : > { %3461 = vmatprep.subr.bf16.mxu1 %v3674_v61 }
 0x10f   : > { %3462 = vmatpush3.bf16.msra.mxu1 %v3674_v61 }
 0x110   : > { %3479 = vmatprep.subr.bf16.mxu1 %v3675_v26 }
 0x112   : > { %3464 = vmatmul.mubr.msk.bf16.vlgmr.msra.gmra.mrb[8].mxu1 %vm495_vm0, %v3939_v10 }
 0x113   : > { %3487 = vmatprep.mubr.msk.bf16.mxu1 %vm495_vm0, %v3923_v5  ;;  %3480 = vmatpush3.bf16.msra.mxu1 %v3675_v26 }
 0x114   : > { %3481 = vmatprep.subr.bf16.mxu1 %v3676_v27 }
 0x117   : > { %3482 = vmatpush3.bf16.msra.mxu1 %v3676_v27 }
 0x118   : > { %3483 = vmatprep.subr.bf16.mxu1 %v3677_v28 }
 0x11b   : > { %3484 = vmatpush3.bf16.msra.mxu1 %v3677_v28 }
 0x11c   : > { %3485 = vmatprep.subr.bf16.mxu1 %v3678_v29 }
 0x11f   : > { %3486 = vmatpush3.bf16.msra.mxu1 %v3678_v29 }
 0x122   : > { %3488 = vmatmul.mubr.msk.bf16.vlgmr.msra.gmra.mrb[12].mxu1 %vm495_vm0, %v3939_v10 }
 0x1d4   : > { %v3445_v37 = vpop.f32.mrb[4].mxu1 }
 0x1d5   : > { %v779_v38 = vpop.f32.mrb[5].mxu1  ;;  %v801_v39 = vsel %vm800_vm2, %v3445_v37, -inf }
 0x1d6   : > { %802 = vmax.xlane.f32.xlu1 %v801_v39  ;;  %v3446_v40 = vpop.f32.mrb[6].mxu1  ;;  %v794_v41 = vsel %vm793_vm3, %v779_v38, -inf }
 0x1d7   : > { %795 = vmax.xlane.f32.xlu0 %v794_v41  ;;  %v782_v42 = vpop.f32.mrb[7].mxu1 }
 0x1d8   : > { %v797_v43 = vsel %vm793_vm3, %v782_v42, -inf }
 0x1db   : > { %798 = vmax.xlane.f32.xlu0 %v797_v43 }
 0x1e5   : > { %v3465_v18 = vpop.f32.mrb[8].mxu1 }
 0x1e6   : > { %v983_v19 = vadd.f32 %v3465_v18, %v3054_v17  ;;  %v974_v20 = vpop.f32.mrb[9].mxu1 }
 0x1e7   : > { %v975_v21 = vadd.f32 %v3054_v17, %v974_v20  ;;  %v3466_v22 = vpop.f32.mrb[10].mxu1 }
 0x1e8   : > { %v977_v23 = vpop.f32.mrb[11].mxu1  ;;  %v1167_v46 = vpack.c.bf16 %v983_v19, %v983_v19 }
 0x1e9   : > { %v978_v24 = vadd.f32 %v3054_v17, %v977_v23 }
 0x1eb   : > { %v1166_v25 = vpack.c.bf16 %v978_v24, %v975_v21 }
 0x1f5   : > { %v3489_v47 = vpop.f32.mrb[12].mxu1 }
 0x1f6   : > { %v1152_v48 = vpop.f32.mrb[13].mxu1 }
 0x1f7   : > { %v3490_v49 = vpop.f32.mrb[14].mxu1 }
 0x263   : > { %v803_v62 = vpop.xlane.xlu1 %802 }
 0x264   : > { %v806_v63 = vsub.f32 %v3445_v37, %v803_v62  ;;  %v796_v0 = vpop.xlane.xlu0 %795  ;;  %v3086_v62 = vld [vmem:[%s4401_s2 + $0x9] ss:$0 sm:$0xff] }
 0x265   : > { %v804_v1 = vsub.f32 %v779_v38, %v796_v0 }
 0x266   : > { %v811_v2 = vmul.f32 1.442695, %v806_v63  ;;  %v1161_v63 = vadd.f32 %v3489_v47, %v3086_v62 }
 0x267   : > { %v807_v3 = vmul.f32 1.442695, %v804_v1  ;;  %v1153_v1 = vadd.f32 %v3086_v62, %v1152_v48 }
 0x268   : > { %v799_v4 = vpop.xlane.xlu0 %798  ;;  %3736 = vpow2.f32 %v811_v2  ;;  %v1260_v0 = vpack.c.bf16 %v1161_v63, %v1161_v63  ;;  %v1155_v2 = vpop.f32.mrb[15].mxu1 }
 0x269   : > { %v805_v6 = vsub.f32 %v782_v42, %v799_v4  ;;  %3738 = vpow2.f32 %v807_v3  ;;  %v1156_v3 = vadd.f32 %v3086_v62, %v1155_v2  ;;  %v3688_v2 = vld [vmem:[%s4400_s1 + $0x58] sm:$0xff]  }
 0x26a   : > { %v1268_v4 = vand.u32 %v1260_v0, %v3982_v52  ;;  %v3686_v0 = vld [vmem:[%s4400_s1 + $0x48] sm:$0xff]  }
 0x26b   : > { %v809_v7 = vmul.f32 1.442695, %v805_v6  ;;  %v1259_v6 = vpack.c.bf16 %v1156_v3, %v1153_v1  ;;  %v3687_v1 = vld [vmem:[%s4400_s1 + $0x50] sm:$0xff]   ;;  %v3130_v3 = vld [vmem:[%s4401_s2 + $0x6] ss:$0 sm:$0xff] }
 0x26d   : > { %3740 = vpow2.f32 %v809_v7  ;;  %v3679_v7 = vld [vmem:[%s4402_s3] sm:$0xff]  }
 0x26e   : > { %3513 = vmatprep.subr.bf16.mxu1 %v3679_v7 }
 0x26f   : > { %3514 = vmatpush3.bf16.msra.mxu1 %v3679_v7 }
 0x272   : > { %v4004_v8 = vpop.eup %3736 }
 0x273   : > { %v4006_v9 = vpop.eup %3738  ;;  %v823_v13 = vpack.c.bf16 %v4004_v8, %v4004_v8  ;;  %v819_v61 = vsel %vm800_vm2, %v4004_v8, 0.0 }
 0x274   : > { %v813_v59 = vsel %vm793_vm3, %v4006_v9, 0.0 }
 0x277   : > { %v4008_v11 = vpop.eup %3740 }
 0x278   : > { %v822_v12 = vpack.c.bf16 %v4008_v11, %v4006_v9  ;;  %v816_v60 = vsel %vm793_vm3, %v4008_v11, 0.0 }
 0x27a   : > { %3451 = vmatprep.mubr.msk.bf16.mxu0 %vm793_vm3, %v822_v12 }
 0x27b   : > { %3452 = vmatmul.mubr.msk.bf16.vlgmr.msra.gmra.mrb[8].mxu0 %vm793_vm3, %v823_v13 }
 0x27c   : > { %3468 = vmatpush3.bf16.msra.mxu0 %v3667_v57  ;;  %3475 = vmatprep.mubr.msk.bf16.mxu0 %vm495_vm0, %v3923_v5 }
 0x27d   : > { %3469 = vmatprep.subr.bf16.mxu0 %v3668_v14 }
 0x280   : > { %3470 = vmatpush3.bf16.msra.mxu0 %v3668_v14 }
 0x281   : > { %3471 = vmatprep.subr.bf16.mxu0 %v3669_v15 }
 0x284   : > { %3472 = vmatpush3.bf16.msra.mxu0 %v3669_v15 }
 0x285   : > { %3473 = vmatprep.subr.bf16.mxu0 %v3671_v16 }
 0x288   : > { %3474 = vmatpush3.bf16.msra.mxu0 %v3671_v16 }
 0x28b   : > { %3476 = vmatmul.mubr.msk.bf16.vlgmr.msra.gmra.mrb[12].mxu0 %vm495_vm0, %v3939_v10 }
 0x28c   : > { %3495 = vmatprep.mubr.msk.bf16.mxu0 %vm732_vm1, %v1166_v25 }
 0x34e   : > { %v4047_v30 = vpop.f32.mrb[8].mxu0 }
 0x34f   : > { %v4049_v31 = vpop.f32.mrb[9].mxu0 }
 0x350   : > { %v3454_v32 = vpop.f32.mrb[10].mxu0 }
 0x351   : > { %v4051_v33 = vpop.f32.mrb[11].mxu0 }
 0x35e   : > { %v3477_v34 = vpop.f32.mrb[12].mxu0 }
 0x35f   : > { %v1063_v36 = vpop.f32.mrb[13].mxu0  ;;  %v1072_v39 = vadd.f32 %v3477_v34, %v3070_v35 }
 0x360   : > { %v3478_v37 = vpop.f32.mrb[14].mxu0  ;;  %v1064_v40 = vadd.f32 %v3070_v35, %v1063_v36 }
 0x361   : > { %v1066_v38 = vpop.f32.mrb[15].mxu0  ;;  %v1169_v43 = vpack.c.bf16 %v1072_v39, %v1072_v39 }
 0x362   : > { %v1067_v41 = vadd.f32 %v3070_v35, %v1066_v38 }
 0x363   : > { %v1180_v45 = vsel %vm732_vm1, %v1169_v43, 0 }
 0x364   : > { %v1168_v42 = vpack.c.bf16 %v1067_v41, %v1064_v40  ;;  %v3680_v40 = vld [vmem:[%s4400_s1 + $0xc0] sm:$0xff]   ;;  %v3684_v41 = vld [vmem:[%s4402_s3 + $0x8] sm:$0xff]  }
 0x365   : > { %3531 = vmatprep.subr.bf16.mxu1 %v3680_v40 }
 0x366   : > { %3637 = vmatprep.subr.msk.bf16.mxu0 %vm732_vm1, %v1168_v42  ;;  %v1177_v44 = vsel %vm732_vm1, %v1168_v42, 0  ;;  %v3685_v42 = vld [vmem:[%s4400_s1 + $0x40] sm:$0xff]  }
 0x367   : > { %3492 = vmatpush3.bf16.xpose.msra.mxu0 %v1177_v44 }
 0x368   : > { %3638 = vmatprep.subr.msk.bf16.mxu0 %vm732_vm1, %v1169_v43 }
 0x36f   : > { %3494 = vmatpush3.bf16.xpose.msra.mxu0 %v1180_v45 }
 0x370   : > { %3499 = vmatprep.subr.bf16.mxu0 %v1259_v6 }
 0x376   : > { %3496 = vmatmul.mubr.msk.bf16.vlgmr.msra.gmra.mrb[16].mxu0 %vm732_vm1, %v1167_v46 }
 0x377   : > { %3500 = vmatpush3.bf16.msra.mxu0 %v1259_v6 }
 0x378   : > { %3501 = vmatprep.subr.bf16.mxu0 %v1268_v4 }
 0x37b   : > { %3502 = vmatpush3.bf16.msra.mxu0 %v1268_v4 }
 0x37c   : > { %3507 = vmatprep.subr.bf16.mxu0 %v3684_v41 }
 0x449   : > { %v3497_v50 = vpop.f32.mrb[16].mxu0 }
 0x44a   : > { %v1216_v53 = vpop.f32.mrb[17].mxu0  ;;  %v1236_v58 = vsel %vm800_vm2, %v3497_v50, -inf }
 0x44b   : > { %v3498_v54 = vpop.f32.mrb[18].mxu0  ;;  %v1230_v55 = vsel %vm793_vm3, %v1216_v53, -inf }
 0x44c   : > { %1231 = vmax.xlane.f32.xlu1 %v1230_v55  ;;  %v1219_v56 = vpop.f32.mrb[19].mxu0 }
 0x44d   : > { %v1233_v57 = vsel %vm793_vm3, %v1219_v56, -inf }
 0x44e   : > { %1234 = vmax.xlane.f32.xlu0 %v1233_v57 }
 0x450   : > { %1237 = vmax.xlane.f32.xlu1 %v1236_v58 }
 0x452   : > { %814 = vadd.xlane.f32.xlu0 %v813_v59 }
 0x454   : > { %817 = vadd.xlane.f32.xlu1 %v816_v60 }
 0x456   : > { %820 = vadd.xlane.f32.xlu0 %v819_v61 }
 0x4d9   : > { %v1232_v8 = vpop.xlane.xlu1 %1231 }
 0x4da   : > { %v1239_v9 = vsub.f32 %v1216_v53, %v1232_v8 }
 0x4db   : > { %v1235_v11 = vpop.xlane.xlu0 %1234 }
 0x4dc   : > { %v1242_v12 = vmul.f32 1.442695, %v1239_v9  ;;  %v1240_v13 = vsub.f32 %v1219_v56, %v1235_v11 }
 0x4dd   : > { %v1238_v14 = vpop.xlane.xlu1 %1237 }
 0x4de   : > { %3742 = vpow2.f32 %v1242_v12  ;;  %v1244_v15 = vmul.f32 1.442695, %v1240_v13  ;;  %v1241_v16 = vsub.f32 %v3497_v50, %v1238_v14 }
 0x4df   : > { %v815_v17 = vpop.xlane.xlu0 %814 }
 0x4e0   : > { %3744 = vpow2.f32 %v1244_v15  ;;  %v1246_v18 = vmul.f32 1.442695, %v1241_v16 }
 0x4e1   : > { %3746 = vrcp.f32 %v815_v17  ;;  %v818_v19 = vpop.xlane.xlu1 %817  ;;  %v3689_v17 = vld [vmem:[%s4400_s1 + $0x140] sm:$0xff]  }
 0x4e2   : > { %3748 = vpow2.f32 %v1246_v18  ;;  %v3690_v18 = vld [vmem:[%s4400_s1 + $0x148] sm:$0xff]  }
 0x4e3   : > { %3750 = vrcp.f32 %v818_v19  ;;  %v821_v20 = vpop.xlane.xlu0 %820  ;;  %v3691_v19 = vld [vmem:[%s4400_s1 + $0x150] sm:$0xff]  }
 0x4e4   : > { %3752 = vrcp.f32 %v821_v20  ;;  %v3692_v20 = vld [vmem:[%s4400_s1 + $0x158] sm:$0xff]  }
 0x4e8   : > { %v3743_v21 = vpop.eup %3742 }
 0x4e9   : > { %v1248_v22 = vsel %vm793_vm3, %v3743_v21, 0.0 }
 0x4ea   : > { %v3745_v23 = vpop.eup %3744  ;;  %1249 = vadd.xlane.f32.xlu1 %v1248_v22 }
 0x4eb   : > { %v3747_v24 = vpop.eup %3746  ;;  %v1251_v25 = vsel %vm793_vm3, %v3745_v23, 0.0  ;;  %v1257_v26 = vpack.c.bf16 %v3745_v23, %v3743_v21 }
 0x4ec   : > { %v3749_v27 = vpop.eup %3748  ;;  %1252 = vadd.xlane.f32.xlu0 %v1251_v25  ;;  %v892_v35 = vmul.f32 %v3747_v24, %v4049_v31  ;;  %v3681_v31 = vld [vmem:[%s4400_s1 + $0xc8] sm:$0xff]  }
 0x4ed   : > { %v3751_v28 = vpop.eup %3750  ;;  %3503 = vmatprep.mubr.msk.bf16.mxu0 %vm793_vm3, %v1257_v26  ;;  %v1254_v29 = vsel %vm800_vm2, %v3749_v27, 0.0  ;;  %v1258_v32 = vpack.c.bf16 %v3749_v27, %v3749_v27 }
 0x4ee   : > { %v3753_v34 = vpop.eup %3752  ;;  %1255 = vadd.xlane.f32.xlu1 %v1254_v29  ;;  %v893_v36 = vmul.f32 %v3751_v28, %v4051_v33  ;;  %v3683_v33 = vld [vmem:[%s4400_s1 + $0xd8] sm:$0xff]   ;;  %v3114_v29 = vld [vmem:[%s4401_s2 + $0x2] ss:$0 sm:$0xff] }
 0x4ef   : > { %v894_v37 = vmul.f32 %v3753_v34, %v4047_v30  ;;  %3504 = vmatmul.mubr.msk.bf16.vlgmr.msra.gmra.mrb[20].mxu0 %vm793_vm3, %v1258_v32  ;;  %v3682_v30 = vld [vmem:[%s4400_s1 + $0xd0] sm:$0xff]  }
 0x4f0   : > { %v895_v38 = vpack.c.bf16 %v893_v36, %v892_v35  ;;  %3508 = vmatpush3.bf16.msra.mxu0 %v3684_v41 }
 0x4f1   : > { %v896_v39 = vpack.c.bf16 %v894_v37, %v894_v37  ;;  %3519 = vmatprep.subr.bf16.mxu0 %v3685_v42 }
 0x4f2   : > { %3515 = vmatprep.mubr.msk.bf16.mxu1 %vm732_vm1, %v895_v38 }
 0x4f3   : > { %3516 = vmatmul.mubr.msk.bf16.vlgmr.msra.gmra.mrb[16].mxu1 %vm732_vm1, %v896_v39 }
 0x4f4   : > { %3539 = vmatprep.mubr.msk.bf16.mxu1 %vm495_vm0, %v3923_v5  ;;  %3532 = vmatpush3.bf16.msra.mxu1 %v3680_v40 }
 0x4f5   : > { %3533 = vmatprep.subr.bf16.mxu1 %v3681_v31 }
 0x4f8   : > { %3534 = vmatpush3.bf16.msra.mxu1 %v3681_v31 }
 0x4f9   : > { %3535 = vmatprep.subr.bf16.mxu1 %v3682_v30 }
 0x4fc   : > { %3536 = vmatpush3.bf16.msra.mxu1 %v3682_v30 }
 0x4fd   : > { %3537 = vmatprep.subr.bf16.mxu1 %v3683_v33 }
 0x500   : > { %3538 = vmatpush3.bf16.msra.mxu1 %v3683_v33 }
 0x503   : > { %3540 = vmatmul.mubr.msk.bf16.vlgmr.msra.gmra.mrb[20].mxu1 %vm495_vm0, %v3939_v10 }
 0x577   : > { %v1250_v43 = vpop.xlane.xlu1 %1249 }
 0x578   : > { %3754 = vrcp.f32 %v1250_v43 }
 0x579   : > { %v1253_v45 = vpop.xlane.xlu0 %1252 }
 0x57b   : > { %v1256_v44 = vpop.xlane.xlu1 %1255 }
 0x57c   : > { %3756 = vrcp.f32 %v1256_v44 }
 0x57d   : > { %3758 = vrcp.f32 %v1253_v45 }
 0x582   : > { %v3755_v47 = vpop.eup %3754 }
 0x586   : > { %v3757_v49 = vpop.eup %3756 }
 0x587   : > { %v3759_v53 = vpop.eup %3758 }
 0x5c2   : > { %v3505_v46 = vpop.f32.mrb[20].mxu0 }
 0x5c3   : > { %v1304_v48 = vpop.f32.mrb[21].mxu0  ;;  %v1326_v54 = vmul.f32 %v3757_v49, %v3505_v46 }
 0x5c4   : > { %v3506_v50 = vpop.f32.mrb[22].mxu0  ;;  %v1324_v56 = vmul.f32 %v3755_v47, %v1304_v48  ;;  %v3146_v48 = vld [vmem:[%s4401_s2 + $0xa] ss:$0 sm:$0xff] }
 0x5c5   : > { %v1307_v55 = vpop.f32.mrb[23].mxu0  ;;  %v1328_v62 = vpack.c.bf16 %v1326_v54, %v1326_v54 }
 0x5c6   : > { %v1325_v57 = vmul.f32 %v3759_v53, %v1307_v55  ;;  %v3517_v58 = vpop.f32.mrb[16].mxu1 }
 0x5c7   : > { %v1438_v59 = vpop.f32.mrb[17].mxu1 }
 0x5c8   : > { %v1327_v60 = vpack.c.bf16 %v1325_v57, %v1324_v56  ;;  %v3518_v61 = vpop.f32.mrb[18].mxu1 }
 0x5c9   : > { %v1441_v63 = vpop.f32.mrb[19].mxu1 }
 0x5ca   : > { %3509 = vmatprep.mubr.msk.bf16.mxu0 %vm732_vm1, %v1327_v60 }
 0x5cb   : > { %3510 = vmatmul.mubr.msk.bf16.vlgmr.msra.gmra.mrb[24].mxu0 %vm732_vm1, %v1328_v62 }
 0x5cc   : > { %3520 = vmatpush3.bf16.msra.mxu0 %v3685_v42  ;;  %3527 = vmatprep.mubr.msk.bf16.mxu0 %vm495_vm0, %v3923_v5 }
 0x5cd   : > { %3521 = vmatprep.subr.bf16.mxu0 %v3686_v0 }
 0x5d0   : > { %3522 = vmatpush3.bf16.msra.mxu0 %v3686_v0 }
 0x5d1   : > { %3523 = vmatprep.subr.bf16.mxu0 %v3687_v1 }
 0x5d4   : > { %3524 = vmatpush3.bf16.msra.mxu0 %v3687_v1 }
 0x5d5   : > { %3525 = vmatprep.subr.bf16.mxu0 %v3688_v2 }
 0x5d6   : > { %v3541_v4 = vpop.f32.mrb[20].mxu1 }
 0x5d7   : > { %v1616_v6 = vpop.f32.mrb[21].mxu1  ;;  %v1625_v7 = vadd.f32 %v3541_v4, %v3130_v3 }
 0x5d8   : > { %3526 = vmatpush3.bf16.msra.mxu0 %v3688_v2  ;;  %v1617_v8 = vadd.f32 %v3130_v3, %v1616_v6  ;;  %v3542_v9 = vpop.f32.mrb[22].mxu1 }
 0x5d9   : > { %v1619_v11 = vpop.f32.mrb[23].mxu1  ;;  %v1722_v13 = vpack.c.bf16 %v1625_v7, %v1625_v7  ;;  %3543 = vmatprep.subr.bf16.mxu0 %v3689_v17 }
 0x5da   : > { %v1620_v12 = vadd.f32 %v3130_v3, %v1619_v11 }
 0x5db   : > { %3528 = vmatmul.mubr.msk.bf16.vlgmr.msra.gmra.mrb[28].mxu0 %vm495_vm0, %v3939_v10  ;;  %v1733_v16 = vsel %vm732_vm1, %v1722_v13, 0 }
 0x5dc   : > { %3551 = vmatprep.mubr.msk.bf16.mxu0 %vm495_vm0, %v3923_v5  ;;  %v1721_v14 = vpack.c.bf16 %v1620_v12, %v1617_v8  ;;  %3544 = vmatpush3.bf16.msra.mxu0 %v3689_v17  ;;  %v3700_v17 = vld [vmem:[%s4400_s1 + $0x70] sm:$0xff]  }
 0x5dd   : > { %3545 = vmatprep.subr.bf16.mxu0 %v3690_v18 }
 0x5de   : > { %3639 = vmatprep.subr.msk.bf16.mxu1 %vm732_vm1, %v1721_v14  ;;  %v1730_v15 = vsel %vm732_vm1, %v1721_v14, 0  ;;  %v3694_v14 = vld [vmem:[%s4400_s1 + $0xe0] sm:$0xff]  }
 0x5df   : > { %3556 = vmatpush3.bf16.xpose.msra.mxu1 %v1730_v15  ;;  %v3697_v15 = vld [vmem:[%s4400_s1 + $0x60] sm:$0xff]  }
 0x5e0   : > { %3640 = vmatprep.subr.msk.bf16.mxu1 %vm732_vm1, %v1722_v13  ;;  %3546 = vmatpush3.bf16.msra.mxu0 %v3690_v18  ;;  %v3693_v13 = vld [vmem:[%s4402_s3 + $0x10] sm:$0xff]   ;;  %v3701_v18 = vld [vmem:[%s4400_s1 + $0x78] sm:$0xff]  }
 0x5e1   : > { %3547 = vmatprep.subr.bf16.mxu0 %v3691_v19 }
 0x5e4   : > { %3548 = vmatpush3.bf16.msra.mxu0 %v3691_v19 }
 0x5e5   : > { %3549 = vmatprep.subr.bf16.mxu0 %v3692_v20 }
 0x5e7   : > { %3558 = vmatpush3.bf16.xpose.msra.mxu1 %v1733_v16  ;;  %v3699_v16 = vld [vmem:[%s4400_s1 + $0x68] sm:$0xff]  }
 0x5e8   : > { %3550 = vmatpush3.bf16.msra.mxu0 %v3692_v20  ;;  %3571 = vmatprep.subr.bf16.mxu1 %v3693_v13 }
 0x5eb   : > { %3552 = vmatmul.mubr.msk.bf16.vlgmr.msra.gmra.mrb[32].mxu0 %vm495_vm0, %v3939_v10 }
 0x69e   : > { %v3511_v21 = vpop.f32.mrb[24].mxu0 }
 0x69f   : > { %v4147_v22 = vadd.f32 %v3517_v58, %v3511_v21  ;;  %v1378_v23 = vpop.f32.mrb[25].mxu0 }
 0x6a0   : > { %v4149_v24 = vadd.f32 %v1438_v59, %v1378_v23  ;;  %v3512_v25 = vpop.f32.mrb[26].mxu0 }
 0x6a1   : > { %v1381_v26 = vpop.f32.mrb[27].mxu0 }
 0x6a2   : > { %v4151_v27 = vadd.f32 %v1441_v63, %v1381_v26 }
 0x6ae   : > { %v3529_v28 = vpop.f32.mrb[28].mxu0 }
 0x6af   : > { %v1527_v32 = vpop.f32.mrb[29].mxu0  ;;  %v1536_v35 = vadd.f32 %v3529_v28, %v3114_v29 }
 0x6b0   : > { %v3530_v34 = vpop.f32.mrb[30].mxu0  ;;  %v1528_v37 = vadd.f32 %v3114_v29, %v1527_v32 }
 0x6b1   : > { %v1530_v36 = vpop.f32.mrb[31].mxu0  ;;  %v1720_v40 = vpack.c.bf16 %v1536_v35, %v1536_v35 }
 0x6b2   : > { %v1531_v38 = vadd.f32 %v3114_v29, %v1530_v36 }
 0x6b4   : > { %v1719_v39 = vpack.c.bf16 %v1531_v38, %v1528_v37 }
 0x6b6   : > { %3559 = vmatprep.mubr.msk.bf16.mxu1 %vm732_vm1, %v1719_v39 }
 0x6b7   : > { %3560 = vmatmul.mubr.msk.bf16.vlgmr.msra.gmra.mrb[24].mxu1 %vm732_vm1, %v1720_v40  ;;  %v3695_v40 = vld [vmem:[%s4400_s1 + $0xe8] sm:$0xff]  }
 0x6b8   : > { %3572 = vmatpush3.bf16.msra.mxu1 %v3693_v13 }
 0x6b9   : > { %3589 = vmatprep.subr.bf16.mxu1 %v3694_v14 }
 0x6be   : > { %v3553_v31 = vpop.f32.mrb[32].mxu0 }
 0x6bf   : > { %v1705_v30 = vpop.f32.mrb[33].mxu0  ;;  %v1714_v49 = vadd.f32 %v3553_v31, %v3146_v48  ;;  %v3696_v31 = vld [vmem:[%s4400_s1 + $0xf0] sm:$0xff]  }
 0x6c0   : > { %v3554_v33 = vpop.f32.mrb[34].mxu0  ;;  %v1706_v53 = vadd.f32 %v3146_v48, %v1705_v30  ;;  %v3698_v30 = vld [vmem:[%s4400_s1 + $0xf8] sm:$0xff]  }
 0x6c1   : > { %v1813_v50 = vpack.c.bf16 %v1714_v49, %v1714_v49  ;;  %v1708_v54 = vpop.f32.mrb[35].mxu0  ;;  %v3703_v49 = vld [vmem:[%s4400_s1 + $0x168] sm:$0xff]  }
 0x6c2   : > { %v1709_v55 = vadd.f32 %v3146_v48, %v1708_v54  ;;  %v3702_v48 = vld [vmem:[%s4400_s1 + $0x160] sm:$0xff]  }
 0x6c3   : > { %v1821_v56 = vand.u32 %v1813_v50, %v3982_v52  ;;  %v3704_v50 = vld [vmem:[%s4400_s1 + $0x170] sm:$0xff]  }
 0x6c4   : > { %v1812_v57 = vpack.c.bf16 %v1709_v55, %v1706_v53  ;;  %v3705_v53 = vld [vmem:[%s4400_s1 + $0x178] sm:$0xff]  }
 0x6c6   : > { %3563 = vmatprep.subr.bf16.mxu0 %v1812_v57 }
 0x6c7   : > { %3564 = vmatpush3.bf16.msra.mxu0 %v1812_v57 }
 0x6c8   : > { %3565 = vmatprep.subr.bf16.mxu0 %v1821_v56 }
 0x6cb   : > { %3566 = vmatpush3.bf16.msra.mxu0 %v1821_v56 }
 0x6cc   : > { %3577 = vmatprep.subr.bf16.mxu0 %v3697_v15 }
 0x78a   : > { %v3561_v41 = vpop.f32.mrb[24].mxu1 }
 0x78b   : > { %v1769_v42 = vpop.f32.mrb[25].mxu1  ;;  %v1789_v47 = vsel %vm800_vm2, %v3561_v41, -inf }
 0x78c   : > { %v3562_v43 = vpop.f32.mrb[26].mxu1  ;;  %v1783_v44 = vsel %vm793_vm3, %v1769_v42, -inf }
 0x78d   : > { %1784 = vmax.xlane.f32.xlu0 %v1783_v44  ;;  %v1772_v45 = vpop.f32.mrb[27].mxu1 }
 0x78e   : > { %v1786_v46 = vsel %vm793_vm3, %v1772_v45, -inf }
 0x78f   : > { %1787 = vmax.xlane.f32.xlu1 %v1786_v46 }
 0x791   : > { %1790 = vmax.xlane.f32.xlu0 %v1789_v47 }
 0x81a   : > { %v1785_v58 = vpop.xlane.xlu0 %1784 }
 0x81b   : > { %v1792_v59 = vsub.f32 %v1769_v42, %v1785_v58 }
 0x81c   : > { %v1788_v60 = vpop.xlane.xlu1 %1787 }
 0x81d   : > { %v1795_v61 = vmul.f32 1.442695, %v1792_v59  ;;  %v1793_v62 = vsub.f32 %v1772_v45, %v1788_v60 }
 0x81e   : > { %v1791_v63 = vpop.xlane.xlu0 %1790 }
 0x81f   : > { %3760 = vpow2.f32 %v1795_v61  ;;  %v1797_v0 = vmul.f32 1.442695, %v1793_v62  ;;  %v1794_v1 = vsub.f32 %v3561_v41, %v1791_v63  ;;  %v3187_v62 = vld [vmem:[%s4401_s2 + $0x7] ss:$0 sm:$0xff] }
 0x821   : > { %3762 = vpow2.f32 %v1797_v0  ;;  %v1799_v2 = vmul.f32 1.442695, %v1794_v1 }
 0x823   : > { %3764 = vpow2.f32 %v1799_v2 }
 0x829   : > { %v3761_v3 = vpop.eup %3760 }
 0x82a   : > { %v1801_v4 = vsel %vm793_vm3, %v3761_v3, 0.0 }
 0x82b   : > { %v3763_v6 = vpop.eup %3762  ;;  %1802 = vadd.xlane.f32.xlu1 %v1801_v4 }
 0x82c   : > { %v1804_v7 = vsel %vm793_vm3, %v3763_v6, 0.0  ;;  %v1810_v8 = vpack.c.bf16 %v3763_v6, %v3761_v3 }
 0x82d   : > { %v3765_v9 = vpop.eup %3764  ;;  %1805 = vadd.xlane.f32.xlu0 %v1804_v7 }
 0x82e   : > { %3567 = vmatprep.mubr.msk.bf16.mxu0 %vm793_vm3, %v1810_v8  ;;  %v1807_v11 = vsel %vm800_vm2, %v3765_v9, 0.0  ;;  %v1811_v12 = vpack.c.bf16 %v3765_v9, %v3765_v9 }
 0x82f   : > { %1808 = vadd.xlane.f32.xlu1 %v1807_v11 }
 0x830   : > { %3568 = vmatmul.mubr.msk.bf16.vlgmr.msra.gmra.mrb[36].mxu0 %vm793_vm3, %v1811_v12 }
 0x831   : > { %3585 = vmatprep.mubr.msk.bf16.mxu0 %vm495_vm0, %v3923_v5  ;;  %3578 = vmatpush3.bf16.msra.mxu0 %v3697_v15 }
 0x832   : > { %3579 = vmatprep.subr.bf16.mxu0 %v3699_v16 }
 0x835   : > { %3580 = vmatpush3.bf16.msra.mxu0 %v3699_v16 }
 0x836   : > { %3581 = vmatprep.subr.bf16.mxu0 %v3700_v17 }
 0x839   : > { %3582 = vmatpush3.bf16.msra.mxu0 %v3700_v17 }
 0x83a   : > { %3583 = vmatprep.subr.bf16.mxu0 %v3701_v18 }
 0x83d   : > { %3584 = vmatpush3.bf16.msra.mxu0 %v3701_v18  ;;  %v3203_v18 = vld [vmem:[%s4401_s2 + $0xb] ss:$0 sm:$0xff] }
 0x83e   : > { %3601 = vmatprep.subr.bf16.mxu0 %v3702_v48 }
 0x840   : > { %3586 = vmatmul.mubr.msk.bf16.vlgmr.msra.gmra.mrb[40].mxu0 %vm495_vm0, %v3939_v10 }
 0x841   : > { %3609 = vmatprep.mubr.msk.bf16.mxu0 %vm495_vm0, %v3923_v5  ;;  %3602 = vmatpush3.bf16.msra.mxu0 %v3702_v48 }
 0x842   : > { %3603 = vmatprep.subr.bf16.mxu0 %v3703_v49 }
 0x845   : > { %3604 = vmatpush3.bf16.msra.mxu0 %v3703_v49 }
 0x846   : > { %3605 = vmatprep.subr.bf16.mxu0 %v3704_v50 }
 0x849   : > { %3606 = vmatpush3.bf16.msra.mxu0 %v3704_v50 }
 0x84a   : > { %3607 = vmatprep.subr.bf16.mxu0 %v3705_v53 }
 0x84d   : > { %3608 = vmatpush3.bf16.msra.mxu0 %v3705_v53 }
 0x850   : > { %3610 = vmatmul.mubr.msk.bf16.vlgmr.msra.gmra.mrb[44].mxu0 %vm495_vm0, %v3939_v10 }
 0x8b8   : > { %v1803_v19 = vpop.xlane.xlu1 %1802 }
 0x8b9   : > { %3766 = vrcp.f32 %v1803_v19 }
 0x8ba   : > { %v1806_v21 = vpop.xlane.xlu0 %1805 }
 0x8bc   : > { %v1809_v20 = vpop.xlane.xlu1 %1808 }
 0x8bd   : > { %3768 = vrcp.f32 %v1809_v20 }
 0x8be   : > { %3770 = vrcp.f32 %v1806_v21 }
 0x8c3   : > { %v3767_v25 = vpop.eup %3766 }
 0x8c7   : > { %v3769_v28 = vpop.eup %3768 }
 0x8c8   : > { %v3771_v32 = vpop.eup %3770 }
 0x903   : > { %v3569_v23 = vpop.f32.mrb[36].mxu0 }
 0x904   : > { %v1857_v26 = vpop.f32.mrb[37].mxu0  ;;  %v1879_v34 = vmul.f32 %v3769_v28, %v3569_v23 }
 0x905   : > { %v3570_v29 = vpop.f32.mrb[38].mxu0  ;;  %v1877_v36 = vmul.f32 %v3767_v25, %v1857_v26 }
 0x906   : > { %v1860_v35 = vpop.f32.mrb[39].mxu0  ;;  %v1881_v39 = vpack.c.bf16 %v1879_v34, %v1879_v34 }
 0x907   : > { %v1878_v37 = vmul.f32 %v3771_v32, %v1860_v35 }
 0x909   : > { %v1880_v38 = vpack.c.bf16 %v1878_v37, %v1877_v36 }
 0x90b   : > { %3573 = vmatprep.mubr.msk.bf16.mxu1 %vm732_vm1, %v1880_v38 }
 0x90c   : > { %3574 = vmatmul.mubr.msk.bf16.vlgmr.msra.gmra.mrb[28].mxu1 %vm732_vm1, %v1881_v39 }
 0x90d   : > { %3590 = vmatpush3.bf16.msra.mxu1 %v3694_v14  ;;  %3597 = vmatprep.mubr.msk.bf16.mxu1 %vm495_vm0, %v3923_v5  ;;  %v3171_v5 = vld [vmem:[%s4401_s2 + $0x3] ss:$0 sm:$0xff] }
 0x90e   : > { %3591 = vmatprep.subr.bf16.mxu1 %v3695_v40 }
 0x911   : > { %3592 = vmatpush3.bf16.msra.mxu1 %v3695_v40 }
 0x912   : > { %3593 = vmatprep.subr.bf16.mxu1 %v3696_v31 }
 0x913   : > { %v3587_v33 = vpop.f32.mrb[40].mxu0 }
 0x914   : > { %v2032_v41 = vadd.f32 %v3587_v33, %v3171_v5  ;;  %v2023_v42 = vpop.f32.mrb[41].mxu0 }
 0x915   : > { %3594 = vmatpush3.bf16.msra.mxu1 %v3696_v31  ;;  %v2024_v43 = vadd.f32 %v3171_v5, %v2023_v42  ;;  %v3588_v44 = vpop.f32.mrb[42].mxu0 }
 0x916   : > { %3595 = vmatprep.subr.bf16.mxu1 %v3698_v30  ;;  %v2026_v45 = vpop.f32.mrb[43].mxu0  ;;  %v2216_v6 = vpack.c.bf16 %v2032_v41, %v2032_v41  ;;  %v3706_v44 = vld [vmem:[%s4402_s3 + $0x18] sm:$0xff]  }
 0x917   : > { %v2027_v46 = vadd.f32 %v3171_v5, %v2026_v45 }
 0x919   : > { %3596 = vmatpush3.bf16.msra.mxu1 %v3698_v30  ;;  %v2215_v47 = vpack.c.bf16 %v2027_v46, %v2024_v43 }
 0x91c   : > { %3598 = vmatmul.mubr.msk.bf16.vlgmr.msra.gmra.mrb[32].mxu1 %vm495_vm0, %v3939_v10 }
 0x91d   : > { %3617 = vmatprep.mubr.msk.bf16.mxu1 %vm732_vm1, %v2215_v47 }
 0x923   : > { %v3611_v7 = vpop.f32.mrb[44].mxu0 }
 0x924   : > { %v2201_v8 = vpop.f32.mrb[45].mxu0  ;;  %v2210_v19 = vadd.f32 %v3611_v7, %v3203_v18  ;;  %v3809_v7 = vld [vmem:[%s3920_s23 + $0x8] sm:$0x1] }
 0x925   : > { %v3612_v9 = vpop.f32.mrb[46].mxu0  ;;  %v2202_v21 = vadd.f32 %v3203_v18, %v2201_v8  ;;  %v447_v8 = vunpack.c.l.bf16 %v3809_v7 }
 0x926   : > { %v2309_v20 = vpack.c.bf16 %v2210_v19, %v2210_v19  ;;  %v2204_v23 = vpop.f32.mrb[47].mxu0 }
 0x927   : > { %v2205_v25 = vadd.f32 %v3203_v18, %v2204_v23 }
 0x928   : > { %v2317_v26 = vand.u32 %v2309_v20, %v3982_v52 }
 0x929   : > { %v2308_v28 = vpack.c.bf16 %v2205_v25, %v2202_v21 }
 0x92b   : > { %3621 = vmatprep.subr.bf16.mxu0 %v2308_v28 }
 0x92c   : > { %3622 = vmatpush3.bf16.msra.mxu0 %v2308_v28 }
 0x92d   : > { %3623 = vmatprep.subr.bf16.mxu0 %v2317_v26 }
 0x930   : > { %3624 = vmatpush3.bf16.msra.mxu0 %v2317_v26 }
 0x9df   : > { %v3575_v54 = vpop.f32.mrb[28].mxu1 }
 0x9e0   : > { %v4228_v55 = vadd.f32 %v3575_v54, %v4147_v22  ;;  %v1931_v56 = vpop.f32.mrb[29].mxu1 }
 0x9e1   : > { %v4231_v57 = vadd.f32 %v1931_v56, %v4149_v24  ;;  %v3576_v58 = vpop.f32.mrb[30].mxu1 }
 0x9e2   : > { %v1934_v59 = vpop.f32.mrb[31].mxu1 }
 0x9e3   : > { %v4234_v60 = vadd.f32 %v1934_v59, %v4151_v27 }
 0x9ef   : > { %v3599_v61 = vpop.f32.mrb[32].mxu1 }
 0x9f0   : > { %v2112_v63 = vpop.f32.mrb[33].mxu1  ;;  %v2121_v1 = vadd.f32 %v3599_v61, %v3187_v62 }
 0x9f1   : > { %v3600_v10 = vpop.f32.mrb[34].mxu1  ;;  %v2113_v22 = vadd.f32 %v3187_v62, %v2112_v63 }
 0x9f2   : > { %v2115_v0 = vpop.f32.mrb[35].mxu1  ;;  %v2218_v4 = vpack.c.bf16 %v2121_v1, %v2121_v1 }
 0x9f3   : > { %v2116_v2 = vadd.f32 %v3187_v62, %v2115_v0 }
 0x9f4   : > { %v2229_v27 = vsel %vm732_vm1, %v2218_v4, 0 }
 0x9f5   : > { %v2217_v3 = vpack.c.bf16 %v2116_v2, %v2113_v22  ;;  %v3219_v22 = vld [vmem:[%s4403_s4] ss:$0 sm:$0xff] }
 0x9f7   : > { %3641 = vmatprep.subr.msk.bf16.mxu1 %vm732_vm1, %v2217_v3  ;;  %v2226_v24 = vsel %vm732_vm1, %v2217_v3, 0 }
 0x9f8   : > { %3614 = vmatpush3.bf16.xpose.msra.mxu1 %v2226_v24  ;;  %v3808_v24 = vld [vmem:[%s3920_s23] sm:$0xff]  }
 0x9f9   : > { %3642 = vmatprep.subr.msk.bf16.mxu1 %vm732_vm1, %v2218_v4 }
 0xa00   : > { %3616 = vmatpush3.bf16.xpose.msra.mxu1 %v2229_v27  ;;  %v445_v27 = vunpack.c.l.bf16 %v3808_v24 }
 0xa01   : > { %3629 = vmatprep.subr.bf16.mxu1 %v3706_v44 }
 0xa07   : > { %3618 = vmatmul.mubr.msk.bf16.vlgmr.msra.gmra.mrb[36].mxu1 %vm732_vm1, %v2216_v6 }
 0xa08   : > { %3630 = vmatpush3.bf16.msra.mxu1 %v3706_v44  ;;  %v3721_v44 = vld [vmem:[%s4408_s9 + $0x48] sm:$0xff]  }
 0xada   : > { %v3619_v11 = vpop.f32.mrb[36].mxu1 }
 0xadb   : > { %v2265_v12 = vpop.f32.mrb[37].mxu1  ;;  %v2285_v17 = vsel %vm800_vm2, %v3619_v11, -inf }
 0xadc   : > { %v3620_v13 = vpop.f32.mrb[38].mxu1  ;;  %v2279_v14 = vsel %vm793_vm3, %v2265_v12, -inf }
 0xadd   : > { %2280 = vmax.xlane.f32.xlu0 %v2279_v14  ;;  %v2268_v15 = vpop.f32.mrb[39].mxu1  ;;  %v446_v13 = vunpack.c.h.bf16 %v3808_v24 }
 0xade   : > { %v2282_v16 = vsel %vm793_vm3, %v2268_v15, -inf }
 0xadf   : > { %2283 = vmax.xlane.f32.xlu1 %v2282_v16 }
 0xae1   : > { %2286 = vmax.xlane.f32.xlu0 %v2285_v17 }
 0xb6a   : > { %v2281_v29 = vpop.xlane.xlu0 %2280 }
 0xb6b   : > { %v2288_v32 = vsub.f32 %v2265_v12, %v2281_v29 }
 0xb6c   : > { %v2284_v34 = vpop.xlane.xlu1 %2283 }
 0xb6d   : > { %v2291_v35 = vmul.f32 1.442695, %v2288_v32  ;;  %v2289_v36 = vsub.f32 %v2268_v15, %v2284_v34 }
 0xb6e   : > { %v2287_v37 = vpop.xlane.xlu0 %2286 }
 0xb6f   : > { %3772 = vpow2.f32 %v2291_v35  ;;  %v2293_v38 = vmul.f32 1.442695, %v2289_v36  ;;  %v2290_v39 = vsub.f32 %v3619_v11, %v2287_v37 }
 0xb71   : > { %3774 = vpow2.f32 %v2293_v38  ;;  %v2295_v40 = vmul.f32 1.442695, %v2290_v39  ;;  %v3709_v39 = vld [vmem:[%s4406_s7 + $0x4] ss:$8 sps:$4 sm:$0xff]  }
 0xb72   : > { %2586 = vmatprep.subr.bf16.mxu0 %v3709_v39 }
 0xb73   : > { %3776 = vpow2.f32 %v2295_v40  ;;  %v3707_v40 = vld [vmem:[%s4406_s7] ss:$8 sps:$4 sm:$0xff]  }
 0xb79   : > { %v3773_v31 = vpop.eup %3772 }
 0xb7a   : > { %v2297_v52 = vsel %vm793_vm3, %v3773_v31, 0.0 }
 0xb7b   : > { %v3775_v30 = vpop.eup %3774  ;;  %2298 = vadd.xlane.f32.xlu1 %v2297_v52  ;;  %v3710_v52 = vld [vmem:[%s4406_s7 + $0x10] ss:$8 sps:$4 sm:$0xff]  }
 0xb7c   : > { %v2300_v5 = vsel %vm793_vm3, %v3775_v30, 0.0  ;;  %v2306_v33 = vpack.c.bf16 %v3775_v30, %v3773_v31  ;;  %v3712_v31 = vld [vmem:[%s4406_s7 + $0x14] ss:$8 sps:$4 sm:$0xff]   ;;  %v3715_v30 = vld [vmem:[%s4406_s7 + $0x24] ss:$8 sps:$4 sm:$0xff]  }
 0xb7d   : > { %v3777_v41 = vpop.eup %3776  ;;  %2301 = vadd.xlane.f32.xlu0 %v2300_v5  ;;  %v3713_v5 = vld [vmem:[%s4406_s7 + $0x20] ss:$8 sps:$4 sm:$0xff]  }
 0xb7e   : > { %3625 = vmatprep.mubr.msk.bf16.mxu0 %vm793_vm3, %v2306_v33  ;;  %v2303_v42 = vsel %vm800_vm2, %v3777_v41, 0.0  ;;  %v2307_v43 = vpack.c.bf16 %v3777_v41, %v3777_v41  ;;  %v3716_v33 = vld [vmem:[%s4406_s7 + $0x30] ss:$8 sps:$4 sm:$0xff]   ;;  %v3718_v41 = vld [vmem:[%s4406_s7 + $0x34] ss:$8 sps:$4 sm:$0xff]  }
 0xb7f   : > { %2304 = vadd.xlane.f32.xlu1 %v2303_v42  ;;  %v3719_v42 = vld [vmem:[%s4408_s9 + $0x40] sm:$0xff]  }
 0xb80   : > { %3626 = vmatmul.mubr.msk.bf16.vlgmr.msra.gmra.mrb[48].mxu0 %vm793_vm3, %v2307_v43  ;;  %v3720_v43 = vld [vmem:[%s4408_s9] sm:$0xff]   ;;  %3375 = vmatprep.subr.bf16.mxu1 %v3719_v42 }
 0xb81   : > { %2618 = vmatprep.mubr.bf16.mxu0 %v3818_v51  ;;  %2587 = vmatpush1.bf16.msra.mxu0 %v3707_v40 }
 0xb82   : > { %2588 = vmatprep.subr.bf16.mxu0 %v3712_v31 }
 0xb85   : > { %2589 = vmatpush1.bf16.msra.mxu0 %v3710_v52 }
 0xb86   : > { %2590 = vmatprep.subr.bf16.mxu0 %v3715_v30 }
 0xb89   : > { %2591 = vmatpush1.bf16.msra.mxu0 %v3713_v5 }
 0xb8a   : > { %2592 = vmatprep.subr.bf16.mxu0 %v3718_v41 }
 0xb8d   : > { %2593 = vmatpush1.bf16.msra.mxu0 %v3716_v33 }
 0xc08   : > { %v2299_v45 = vpop.xlane.xlu1 %2298 }
 0xc09   : > { %3778 = vrcp.f32 %v2299_v45  ;;  %v3722_v45 = vld [vmem:[%s4408_s9 + $0x8] sm:$0xff]  }
 0xc0a   : > { %v2302_v47 = vpop.xlane.xlu0 %2301 }
 0xc0c   : > { %v2305_v46 = vpop.xlane.xlu1 %2304 }
 0xc0d   : > { %3780 = vrcp.f32 %v2305_v46 }
 0xc0e   : > { %3782 = vrcp.f32 %v2302_v47 }
 0xc13   : > { %v3779_v49 = vpop.eup %3778 }
 0xc17   : > { %v3781_v53 = vpop.eup %3780 }
 0xc18   : > { %v3783_v56 = vpop.eup %3782 }
 0xc53   : > { %v3627_v48 = vpop.f32.mrb[48].mxu0 }
 0xc54   : > { %v2353_v50 = vpop.f32.mrb[49].mxu0  ;;  %v2375_v58 = vmul.f32 %v3781_v53, %v3627_v48 }
 0xc55   : > { %v3628_v54 = vpop.f32.mrb[50].mxu0  ;;  %v2373_v61 = vmul.f32 %v3779_v49, %v2353_v50 }
 0xc56   : > { %v2356_v59 = vpop.f32.mrb[51].mxu0  ;;  %v2377_v10 = vpack.c.bf16 %v2375_v58, %v2375_v58 }
 0xc57   : > { %v2374_v62 = vmul.f32 %v3783_v56, %v2356_v59 }
 0xc59   : > { %v2376_v63 = vpack.c.bf16 %v2374_v62, %v2373_v61  ;;  %v3220_v61 = vld [vmem:[%s4404_s5] ss:$0 sm:$0xff] }
 0xc5b   : > { %3631 = vmatprep.mubr.msk.bf16.mxu1 %vm732_vm1, %v2376_v63 }
 0xc5c   : > { %3632 = vmatmul.mubr.msk.bf16.vlgmr.msra.gmra.mrb[40].mxu1 %vm732_vm1, %v2377_v10 }
 0xc5d   : > { %3376 = vmatpush3.bf16.msra.mxu1 %v3720_v43 }
 0xc5e   : > { %3377 = vmatprep.subr.bf16.mxu1 %v3721_v44 }
 0xc61   : > { %3378 = vmatpush3.bf16.msra.mxu1 %v3722_v45 }
 0xd2f   : > { %v3633_v0 = vpop.f32.mrb[40].mxu1 }
 0xd30   : > { %v2443_v1 = vadd.f32 %v3633_v0, %v4228_v55  ;;  %v2427_v2 = vpop.f32.mrb[41].mxu1 }
 0xd31   : > { %v2441_v3 = vadd.f32 %v2427_v2, %v4231_v57  ;;  %v3634_v4 = vpop.f32.mrb[42].mxu1 }
 0xd32   : > { %v2430_v6 = vpop.f32.mrb[43].mxu1  ;;  %v2453_v9 = vadd.f32 %v3219_v22, %v2443_v1 }
 0xd33   : > { %v2451_v11 = vadd.f32 %v3219_v22, %v2441_v3  ;;  %v2442_v12 = vadd.f32 %v2430_v6, %v4234_v60 }
 0xd34   : > { %v2456_v17 = vadd.f32 %v2453_v9, %v447_v8  ;;  %v3723_v9 = vld [vmem:[%s4408_s9 + $0x50] sm:$0xff]  }
 0xd35   : > { %v2452_v14 = vadd.f32 %v3219_v22, %v2442_v12  ;;  %v2454_v55 = vadd.f32 %v2451_v11, %v445_v27  ;;  %v3221_v22 = vld [vmem:[%s4405_s6] ss:$0 sm:$0xff]  ;;  %v3724_v11 = vld [vmem:[%s4408_s9 + $0x10] sm:$0xff]   ;;  %3379 = vmatprep.subr.bf16.mxu1 %v3723_v9  ;;  %v3726_v12 = vld [vmem:[%s4408_s9 + $0x18] sm:$0xff]  }
 0xd36   : > { %v2466_v18 = vsel %vm2465_vm5, %v2456_v17, 0.0  ;;  %3380 = vmatpush3.bf16.msra.mxu1 %v3724_v11 }
 0xd37   : > { %v2459_v15 = vsel %vm495_vm0, %v2454_v55, 0.0  ;;  %v2455_v16 = vadd.f32 %v2452_v14, %v446_v13  ;;  %v3727_v13 = vld [vmem:[%s4408_s9 + $0x60] sm:$0xff]  }
 0xd38   : > { %2460 = vadd.xlane.f32.xlu0 %v2459_v15  ;;  %v3728_v14 = vld [vmem:[%s4408_s9 + $0x20] sm:$0xff]   ;;  %v3730_v15 = vld [vmem:[%s4408_s9 + $0x28] sm:$0xff]  }
 0xd39   : > { %v2462_v57 = vsel %vm495_vm0, %v2455_v16, 0.0 }
 0xd3a   : > { %2463 = vadd.xlane.f32.xlu1 %v2462_v57  ;;  %v3733_v57 = vld [vmem:[%s4408_s9 + $0x78] sm:$0xff]  }
 0xd3c   : > { %2467 = vadd.xlane.f32.xlu0 %v2466_v18  ;;  %v3734_v18 = vld [vmem:[%s4408_s9 + $0x38] sm:$0xff]  }
 0xdc5   : > { %v2461_v19 = vpop.xlane.xlu0 %2460 }
 0xdc6   : > { %v2470_v20 = vmul.f32 0.015625, %v2461_v19  ;;  %v2530_v19 = vlaneseq }
 0xdc7   : > { %v2464_v21 = vpop.xlane.xlu1 %2463 }
 0xdc8   : > { %v2473_v23 = vsub.f32 %v2454_v55, %v2470_v20  ;;  %v2471_v60 = vmul.f32 0.015625, %v2464_v21  ;;  %v3729_v55 = vld [vmem:[%s4408_s9 + $0x68] sm:$0xff]   ;;  %v2531_v20 = vshrl.u32 %v2530_v19, 7 }
 0xdc9   : > { %v2468_v25 = vpop.xlane.xlu0 %2467 }
 0xdca   : > { %v2474_v26 = vsub.f32 %v2455_v16, %v2471_v60  ;;  %v2472_v28 = vmul.f32 0.015625, %v2468_v25  ;;  %v2476_v29 = vmul.f32 %v2473_v23, %v2473_v23  ;;  %v3731_v16 = vld [vmem:[%s4408_s9 + $0x70] sm:$0xff]   ;;  %v2532_v21 = vsub.s32 0, %v2531_v20 }
 0xdcb   : > { %v2536_v60 = vsub.s32 1, %v2531_v20 }
 0xdcc   : > { %v2475_v32 = vsub.f32 %v2456_v17, %v2472_v28  ;;  %v2479_v34 = vsel %vm495_vm0, %v2476_v29, 0.0  ;;  %v2477_v35 = vmul.f32 %v2474_v26, %v2474_v26  ;;  %v3732_v17 = vld [vmem:[%s4408_s9 + $0x30] sm:$0xff]  }
 0xdcd   : > { %2480 = vadd.xlane.f32.xlu1 %v2479_v34 }
 0xdce   : > { %v2482_v36 = vsel %vm495_vm0, %v2477_v35, 0.0  ;;  %v2478_v37 = vmul.f32 %v2475_v32, %v2475_v32 }
 0xdcf   : > { %2483 = vadd.xlane.f32.xlu0 %v2482_v36 }
 0xdd0   : > { %v2485_v38 = vsel %vm2465_vm5, %v2478_v37, 0.0 }
 0xdd1   : > { %2486 = vadd.xlane.f32.xlu1 %v2485_v38 }
 0xe5a   : > { %v2481_v46 = vpop.xlane.xlu1 %2480 }
 0xe5b   : > { %v2488_v47 = vmul.f32 0.015625, %v2481_v46 }
 0xe5c   : > { %v2484_v48 = vpop.xlane.xlu0 %2483 }
 0xe5d   : > { %v2491_v49 = vadd.f32 1e-05, %v2488_v47  ;;  %v2489_v50 = vmul.f32 0.015625, %v2484_v48 }
 0xe5e   : > { %v2487_v53 = vpop.xlane.xlu1 %2486 }
 0xe5f   : > { %3784 = vrsqrt.f32 %v2491_v49  ;;  %v2492_v54 = vadd.f32 1e-05, %v2489_v50  ;;  %v2490_v56 = vmul.f32 0.015625, %v2487_v53 }
 0xe61   : > { %3786 = vrsqrt.f32 %v2492_v54  ;;  %v2493_v58 = vadd.f32 1e-05, %v2490_v56 }
 0xe63   : > { %3788 = vrsqrt.f32 %v2493_v58 }
 0xe69   : > { %v3785_v59 = vpop.eup %3784 }
 0xe6a   : > { %v2497_v62 = vmul.f32 %v3785_v59, %v2473_v23  ;;  %v2528_v23 = vld [vmem:[%s4407_s8] sm:$0x3] }
 0xe6b   : > { %v3787_v63 = vpop.eup %3786  ;;  %v2533_v25 = vrot.slane %v2528_v23, %v2532_v21 }
 0xe6c   : > { %v2506_v10 = vmul.f32 %v3220_v61, %v2497_v62  ;;  %v2498_v0 = vmul.f32 %v3787_v63, %v2474_v26  ;;  %v2537_v26 = vrot.slane %v2528_v23, %v2536_v60 }
 0xe6d   : > { %v3789_v1 = vpop.eup %3788 }
 0xe6e   : > { %v2507_v2 = vmul.f32 %v3220_v61, %v2498_v0  ;;  %v2499_v3 = vmul.f32 %v3789_v1, %v2475_v32  ;;  %v4318_v4 = vadd.f32 %v3221_v22, %v2506_v10 }
 0xe70   : > { %v4320_v24 = vadd.f32 %v3221_v22, %v2507_v2  ;;  %v2508_v6 = vmul.f32 %v3220_v61, %v2499_v3 }
 0xe72   : > { %v2518_v27 = vpack.c.bf16 %v4320_v24, %v4318_v4  ;;  %v4326_v7 = vadd.f32 %v3221_v22, %v2508_v6 }
 0xe74   : > { %3230 = vmatmul.mubr.msk.bf16.vlgmr.msra.gmra.mrb[52].mxu0 %vm495_vm0, %v2518_v27  ;;  %v2519_v8 = vpack.c.bf16 %v4326_v7, %v4326_v7 }
 0xe75   : > { %2628 = vmatprep.mubr.bf16.mxu0 %v3818_v51  ;;  %v3725_v51 = vld [vmem:[%s4408_s9 + $0x58] sm:$0xff]  }
 0xe76   : > { %3381 = vmatprep.subr.bf16.mxu1 %v3725_v51 }
 0xe77   : > { %3382 = vmatpush3.bf16.msra.mxu1 %v3726_v12 }
 0xe78   : > { %3383 = vmatprep.subr.bf16.mxu1 %v3727_v13 }
 0xe7b   : > { %3384 = vmatpush3.bf16.msra.mxu1 %v3728_v14 }
 0xe7c   : > { %3231 = vmatmul.mubr.msk.bf16.gmra.mrb[56].mxu0 %vm495_vm0, %v2519_v8  ;;  %3385 = vmatprep.subr.bf16.mxu1 %v3729_v55 }
 0xe7f   : > { %3386 = vmatpush3.bf16.msra.mxu1 %v3730_v15  ;;  %v3232_v15 = vld [vmem:[%s4409_s10] ss:$0 sm:$0xff] }
 0xe80   : > { %3387 = vmatprep.subr.bf16.mxu1 %v3731_v16 }
 0xe83   : > { %3388 = vmatpush3.bf16.msra.mxu1 %v3732_v17 }
 0xe84   : > { %3389 = vmatprep.subr.bf16.mxu1 %v3733_v57 }
 0xe87   : > { %3390 = vmatpush3.bf16.msra.mxu1 %v3734_v18 }
 0xf47   : > { %v2620_v28 = vpop.f32.mrb[52].mxu0 }
 0xf48   : > { %v2621_v29 = vadd.f32 %v2620_v28, %v2533_v25  ;;  %v2622_v32 = vpop.f32.mrb[53].mxu0 }
 0xf49   : > { %v2623_v34 = vadd.f32 %v2622_v32, %v2537_v26  ;;  %v2624_v35 = vpop.f32.mrb[54].mxu0 }
 0xf4a   : > { %v2643_v36 = vmul.f32 0.70710677, %v2621_v29  ;;  %v2625_v37 = vadd.f32 %v2624_v35, %v2533_v25  ;;  %v2626_v38 = vpop.f32.mrb[55].mxu0  ;;  %v2637_v54 = vmul.f32 0.5, %v2621_v29 }
 0xf4b   : > { %v2644_v39 = vmul.f32 0.70710677, %v2623_v34  ;;  %v2627_v40 = vadd.f32 %v2626_v38, %v2537_v26  ;;  %v2638_v59 = vmul.f32 0.5, %v2623_v34 }
 0xf4c   : > { %3790 = verf.f32 %v2643_v36  ;;  %v2645_v31 = vmul.f32 0.70710677, %v2625_v37  ;;  %v2639_v56 = vmul.f32 0.5, %v2625_v37 }
 0xf4d   : > { %3792 = verf.f32 %v2644_v39  ;;  %v2646_v52 = vmul.f32 0.70710677, %v2627_v40  ;;  %v2640_v61 = vmul.f32 0.5, %v2627_v40 }
 0xf4e   : > { %3794 = verf.f32 %v2645_v31 }
 0xf4f   : > { %3796 = verf.f32 %v2646_v52  ;;  %v2630_v30 = vpop.f32.mrb[56].mxu0 }
 0xf50   : > { %v2631_v5 = vadd.f32 %v2630_v30, %v2533_v25  ;;  %v2632_v33 = vpop.f32.mrb[57].mxu0 }
 0xf51   : > { %v2633_v41 = vadd.f32 %v2632_v33, %v2537_v26  ;;  %v2634_v42 = vpop.f32.mrb[58].mxu0 }
 0xf52   : > { %v2647_v43 = vmul.f32 0.70710677, %v2631_v5  ;;  %v2635_v44 = vpop.f32.mrb[59].mxu0  ;;  %v2641_v11 = vmul.f32 0.5, %v2631_v5 }
 0xf53   : > { %v2648_v45 = vmul.f32 0.70710677, %v2633_v41  ;;  %v2642_v8 = vmul.f32 0.5, %v2633_v41 }
 0xf54   : > { %3798 = verf.f32 %v2647_v43 }
 0xf55   : > { %3800 = verf.f32 %v2648_v45 }
 0xf56   : > { %v3791_v46 = vpop.eup %3790 }
 0xf57   : > { %v3793_v47 = vpop.eup %3792  ;;  %v2655_v48 = vadd.f32 1.0, %v3791_v46 }
 0xf58   : > { %v3795_v49 = vpop.eup %3794  ;;  %v2656_v50 = vadd.f32 1.0, %v3793_v47 }
 0xf59   : > { %v3797_v53 = vpop.eup %3796  ;;  %v2657_v58 = vadd.f32 1.0, %v3795_v49  ;;  %v2661_v63 = vmul.f32 %v2655_v48, %v2637_v54 }
 0xf5a   : > { %v2658_v62 = vadd.f32 1.0, %v3797_v53  ;;  %v2662_v0 = vmul.f32 %v2656_v50, %v2638_v59  ;;  %v3249_v59 = vld [vmem:[%s4410_s11] ss:$0 sm:$0xff] }
 0xf5b   : > { %v2663_v10 = vmul.f32 %v2657_v58, %v2639_v56 }
 0xf5c   : > { %v2664_v1 = vmul.f32 %v2658_v62, %v2640_v61 }
 0xf5d   : > { %v2667_v22 = vpack.c.bf16 %v2663_v10, %v2661_v63  ;;  %v3250_v63 = vld [vmem:[%s4411_s12] ss:$0 sm:$0xff] }
 0xf5e   : > { %v3799_v2 = vpop.eup %3798  ;;  %v2668_v3 = vpack.c.bf16 %v2664_v1, %v2662_v0 }
 0xf5f   : > { %v3801_v27 = vpop.eup %3800  ;;  %v2659_v6 = vadd.f32 1.0, %v3799_v2 }
 0xf60   : > { %v2660_v9 = vadd.f32 1.0, %v3801_v27  ;;  %2838 = vmatprep.mubr.bf16.mxu1 %v2668_v3 }
 0xf61   : > { %2839 = vmatmul.mubr.bf16.vlgmr.msra.gmra.mrb[44].mxu1 %v2667_v22  ;;  %v2665_v12 = vmul.f32 %v2659_v6, %v2641_v11 }
 0xf62   : > { %v2666_v51 = vmul.f32 %v2660_v9, %v2642_v8  ;;  %v2935_v9 = vld [vmem:[%s440_s17 + $0x8] sm:$0x1] }
 0xf63   : > { %v2669_v14 = vpack.c.bf16 %v2665_v12, %v2665_v12 }
 0xf64   : > { %v2670_v13 = vpack.c.bf16 %v2666_v51, %v2666_v51 }
 0xf66   : > { %2846 = vmatprep.mubr.bf16.mxu1 %v2670_v13 }
 0xf69   : > { %2847 = vmatmul.mubr.bf16.gmra.mrb[48].mxu1 %v2669_v14 }
0x1034   : > { %v3391_v55 = vpop.f32.mrb[44].mxu1 }
0x1035   : > { %v3392_v16 = vpop.f32.mrb[45].mxu1 }
0x1036   : > { %v3393_v17 = vadd.f32 %v3392_v16, %v3391_v55  ;;  %v3394_v57 = vpop.f32.mrb[46].mxu1 }
0x1037   : > { %v3395_v18 = vpop.f32.mrb[47].mxu1 }
0x1038   : > { %v2841_v19 = vadd.f32 %v3393_v17, %v3232_v15  ;;  %v3396_v20 = vadd.f32 %v3395_v18, %v3394_v57 }
0x103a   : > { %v2854_v21 = vadd.f32 %v2841_v19, %v4318_v4  ;;  %v2844_v32 = vadd.f32 %v3396_v20, %v3232_v15 }
0x103c   : > { %v3397_v23 = vpop.f32.mrb[48].mxu1  ;;  %v2859_v60 = vsel %vm495_vm0, %v2854_v21, 0.0  ;;  %v2855_v37 = vadd.f32 %v2844_v32, %v4320_v24 }
0x103d   : > { %v3398_v25 = vpop.f32.mrb[49].mxu1  ;;  %2860 = vadd.xlane.f32.xlu1 %v2859_v60 }
0x103e   : > { %v3399_v26 = vadd.f32 %v3398_v25, %v3397_v23  ;;  %v3400_v28 = vpop.f32.mrb[50].mxu1  ;;  %v2862_v38 = vsel %vm495_vm0, %v2855_v37, 0.0 }
0x103f   : > { %v3401_v29 = vpop.f32.mrb[51].mxu1 }
0x1040   : > { %v2849_v34 = vadd.f32 %v3399_v26, %v3232_v15 }
0x1042   : > { %v2856_v35 = vadd.f32 %v2849_v34, %v4326_v7 }
0x1044   : > { %v2865_v36 = vsel %vm2465_vm5, %v2856_v35, 0.0 }
0x1045   : > { %2866 = vadd.xlane.f32.xlu0 %v2865_v36 }
0x1049   : > { %2863 = vadd.xlane.f32.xlu0 %v2862_v38 }
0x10ca   : > { %v2861_v4 = vpop.xlane.xlu1 %2860 }
0x10cb   : > { %v2868_v39 = vmul.f32 0.015625, %v2861_v4 }
0x10cd   : > { %v2871_v40 = vsub.f32 %v2854_v21, %v2868_v39 }
0x10cf   : > { %v2874_v31 = vmul.f32 %v2871_v40, %v2871_v40 }
0x10d1   : > { %v2877_v52 = vsel %vm495_vm0, %v2874_v31, 0.0 }
0x10d2   : > { %v2867_v30 = vpop.xlane.xlu0 %2866  ;;  %2878 = vadd.xlane.f32.xlu0 %v2877_v52 }
0x10d3   : > { %v2870_v5 = vmul.f32 0.015625, %v2867_v30 }
0x10d5   : > { %v2873_v33 = vsub.f32 %v2856_v35, %v2870_v5 }
0x10d6   : > { %v2864_v41 = vpop.xlane.xlu0 %2863 }
0x10d7   : > { %v2869_v7 = vmul.f32 0.015625, %v2864_v41  ;;  %v2876_v42 = vmul.f32 %v2873_v33, %v2873_v33 }
0x10d9   : > { %v2872_v43 = vsub.f32 %v2855_v37, %v2869_v7  ;;  %v2883_v24 = vsel %vm2465_vm5, %v2876_v42, 0.0 }
0x10da   : > { %2884 = vadd.xlane.f32.xlu1 %v2883_v24 }
0x10db   : > { %v2875_v44 = vmul.f32 %v2872_v43, %v2872_v43 }
0x10dd   : > { %v2880_v45 = vsel %vm495_vm0, %v2875_v44, 0.0 }
0x10de   : > { %2881 = vadd.xlane.f32.xlu1 %v2880_v45 }
0x115f   : > { %v2879_v46 = vpop.xlane.xlu0 %2878 }
0x1160   : > { %v2886_v47 = vmul.f32 0.015625, %v2879_v46 }
0x1162   : > { %v2889_v48 = vadd.f32 1e-05, %v2886_v47 }
0x1164   : > { %3802 = vrsqrt.f32 %v2889_v48 }
0x1167   : > { %v2885_v49 = vpop.xlane.xlu1 %2884 }
0x1168   : > { %v2888_v50 = vmul.f32 0.015625, %v2885_v49 }
0x116a   : > { %v2891_v53 = vadd.f32 1e-05, %v2888_v50 }
0x116b   : > { %v2882_v54 = vpop.xlane.xlu1 %2881 }
0x116c   : > { %3804 = vrsqrt.f32 %v2891_v53  ;;  %v2887_v56 = vmul.f32 0.015625, %v2882_v54 }
0x116e   : > { %v3803_v58 = vpop.eup %3802  ;;  %v2890_v61 = vadd.f32 1e-05, %v2887_v56 }
0x116f   : > { %v2895_v62 = vmul.f32 %v3803_v58, %v2871_v40 }
0x1170   : > { %3806 = vrsqrt.f32 %v2890_v61 }
0x1171   : > { %v2904_v10 = vmul.f32 %v3249_v59, %v2895_v62 }
0x1173   : > { %v2913_v0 = vadd.f32 %v3250_v63, %v2904_v10 }
0x1175   : > { %v3256_v1 = vpack.c.bf16 %v2913_v0, %v2913_v0 }
0x1176   : > { %v3805_v22 = vpop.eup %3804 }
0x1177   : > { %2930 = vst.msk [vmem:[%s440_s17] sm:$0xf] %vm2929_vm6, %v3256_v1  ;;  %v2897_v2 = vmul.f32 %v3805_v22, %v2873_v33 }
0x1179   : > { %v2906_v3 = vmul.f32 %v3249_v59, %v2897_v2 }
0x117a   : > { %v3807_v27 = vpop.eup %3806 }
0x117b   : > { %v2915_v6 = vadd.f32 %v3250_v63, %v2906_v3  ;;  %v2896_v8 = vmul.f32 %v3807_v27, %v2872_v43 }
0x117d   : > { %v3258_v11 = vpack.c.bf16 %v2915_v6, %v2915_v6  ;;  %v2905_v51 = vmul.f32 %v3249_v59, %v2896_v8 }
0x117f   : > { %v2936_v12 = vsel %vm2934_vm8, %v3258_v11, %v2935_v9  ;;  %v2914_v13 = vadd.f32 %v3250_v63, %v2905_v51 }
0x1180   : > { %2937 = vst [vmem:[%s440_s17 + $0x8] sm:$0x1] %v2936_v12 }
0x1181   : > { %v3257_v14 = vpack.c.bf16 %v2914_v13, %v2914_v13 }
0x1183   : > { %2931 = vst.msk [vmem:[%s440_s17 + $0x4] sm:$0xf] %vm2929_vm6, %v3257_v14 }
0x1184 PF: > { %s23_s25 = sadd.s32 1, %s3816_s25  }
0x1185   : > { %p20_p4 = scmp.ge.s32.totalorder %s23_s25, 4  }
0x1187   :  { %22 = sbr.rel (!%p20_p4) target bundleno = 1 (0x1), region = 127 }

</bundles_post_ra>
